<compile_context>
chip_gen: v7x
topology: tpu7x:2x2x1
jax: 0.10.0
libtpu: 0.0.40
codegen_flags: <defaults>
</compile_context>

<pallas_src>
import functools

import jax
import jax.numpy as jnp
from jax.experimental import pallas as pl
from jax.experimental.pallas import tpu as pltpu

KMAX = 7                       # largest window; smaller windows centered inside
PAD = KMAX // 2                # 'same' padding for the 7x7 window
LEFT = 8                       # left column pad rounded to a sublane tile so the
                               # interior copy is an aligned, unmasked store
WINDOWS = {3: 2, 5: 3, 7: 3}   # kernel_size -> number of heads (sums to num_heads)


def _conv_relpos_kernel(w_ref, b_ref, q_ref, v_ref, o_ref, xp, *, row_block):
    # w_ref : (49, Lc)        per-lane depthwise taps, row t = ky*7 + kx
    # b_ref : (1, Lc)         per-lane bias
    # q_ref : (1, H, W, Lc)
    # v_ref : (1, H, W, Lc)   whole image, BlockSpec-pipelined (double-buffered)
    # o_ref : (1, H, W, Lc)
    # xp    : VMEM scratch (H + 2*PAD, LEFT + W + PAD, Lc) zero-bordered image
    _, H, W, Lc = v_ref.shape
    Hp = H + 2 * PAD
    Wp = LEFT + W + PAD

    # ---- fused zero padding: borders zeroed, interior copied from the already
    #      VMEM-resident v tile (pure vector stores, no DMA, no semaphores).
    xp[0:PAD, :, :] = jnp.zeros((PAD, Wp, Lc), xp.dtype)
    xp[PAD + H:Hp, :, :] = jnp.zeros((PAD, Wp, Lc), xp.dtype)
    xp[:, 0:LEFT, :] = jnp.zeros((Hp, LEFT, Lc), xp.dtype)
    xp[:, LEFT + W:Wp, :] = jnp.zeros((Hp, PAD, Lc), xp.dtype)
    r = 0
    while r < H:                       # static unroll; bounds live vregs per copy
        n = min(row_block, H - r)
        xp[PAD + r:PAD + r + n, LEFT:LEFT + W, :] = v_ref[0, r:r + n]
        r += n

    bias = b_ref[0].astype(jnp.float32)
    pow2 = (row_block & (row_block - 1)) == 0

    def do_rows(r0, rb):
        # depthwise 7x7 cross-correlation on output rows [r0, r0 + rb)
        acc = jnp.zeros((rb, W, Lc), jnp.float32)
        for ky in range(KMAX):
            for kx in range(KMAX):
                tap = xp[pl.ds(r0 + ky, rb),
                         pl.ds(LEFT - PAD + kx, W), :].astype(jnp.float32)
                acc = acc + tap * w_ref[ky * KMAX + kx, :].astype(jnp.float32)
        out = (acc + bias) * q_ref[0, pl.ds(r0, rb)].astype(jnp.float32)
        o_ref[0, pl.ds(r0, rb)] = out.astype(o_ref.dtype)

    nfull = H // row_block
    rem = H - nfull * row_block
    if nfull > 0:
        def body(c, carry):
            r0 = c * row_block
            if pow2:
                r0 = pl.multiple_of(r0, row_block)
            do_rows(r0, row_block)
            return carry
        jax.lax.fori_loop(0, nfull, body, 0)
    if rem > 0:
        do_rows(nfull * row_block, rem)


def _largest_fold(B, C, target):
    best = 1
    for d in range(1, B + 1):
        if B % d == 0 and d * C <= target:
            best = d
    return best


def _pick_row_block(H, W, Lc):
    # Keep the f32 accumulator at ~16 vregs (row_block * W * Lc <= 16 * 1024).
    cap = max(1, min(H, (16 * 1024) // max(1, W * Lc)))
    best_div = max(d for d in range(1, cap + 1) if H % d == 0)
    return best_div if best_div * 2 >= cap else cap   # tail handled in-kernel


def conv_rel_pos_enc(q, v, hw_shape, w_full, bias, *, num_heads):
    """q, v: (B, num_heads, H*W, head_dim). Returns same shape."""
    H, W = hw_shape
    B, n, N, hd = q.shape
    assert n == num_heads and N == H * W
    C = n * hd

    # Lane-dense packing: fold batch images into the channel (lane) dim so the
    # depthwise conv works on full 128-wide vregs.
    Bf = _largest_fold(B, C, max(128, C))
    G = B // Bf
    L = Bf * C
    if L > 128:                                   # pad so every lane chunk is full
        Lpad = ((L + 127) // 128) * 128
        Lc = 128
    else:
        Lpad, Lc = L, L
    LC = Lpad // Lc

    def fold(x):   # (B, n, H*W, hd) -> (G, H, W, Lpad)
        xf = (x.reshape(G, Bf, n, H, W, hd)
               .transpose(0, 3, 4, 1, 2, 5)
               .reshape(G, H, W, L))
        if Lpad != L:
            xf = jnp.pad(xf, ((0, 0), (0, 0), (0, 0), (0, Lpad - L)))
        return xf

    # TODO(synk): the fold/unfold transposes here are separate XLA HBM passes
    # over q/v/out; fusing them (in-kernel relayout or folded-layout consumers)
    # is the remaining end-to-end win at real CoaT sizes.
    q_f = fold(q)
    v_f = fold(v)
    w2 = jnp.tile(w_full, (1, 1, Bf)).reshape(KMAX * KMAX, L)   # per-lane taps
    b2 = jnp.tile(bias, (Bf,)).reshape(1, L)
    if Lpad != L:
        w2 = jnp.pad(w2, ((0, 0), (0, Lpad - L)))
        b2 = jnp.pad(b2, ((0, 0), (0, Lpad - L)))

    row_block = _pick_row_block(H, W, Lc)

    # Whole-image VMEM budget: xp scratch + double-buffered q/v/out tiles.
    q_sz = jnp.dtype(q.dtype).itemsize
    v_sz = jnp.dtype(v.dtype).itemsize
    xp_bytes = (H + 2 * PAD) * (LEFT + W + PAD) * Lc * v_sz
    tile = H * W * Lc
    vmem_est = xp_bytes + 2 * tile * (v_sz + 2 * q_sz) + 4 * KMAX * KMAX * Lc * 4
    # TODO(synk): images too large for whole-image VMEM residency need a halo'd
    # row-strip pipeline; not implemented.
    assert vmem_est < 40 * 2 ** 20, "image too large for whole-image VMEM tiling"

    flops = G * H * W * Lpad * (2 * KMAX * KMAX + 2)
    bytes_accessed = (2 * q_f.size * q_sz + v_f.size * v_sz
                      + w2.size * int(w2.dtype.itemsize)
                      + b2.size * int(b2.dtype.itemsize))

    kernel = functools.partial(_conv_relpos_kernel, row_block=row_block)
    out_f = pl.pallas_call(
        kernel,
        out_shape=jax.ShapeDtypeStruct((G, H, W, Lpad), q.dtype),
        grid_spec=pltpu.PrefetchScalarGridSpec(
            num_scalar_prefetch=0,
            grid=(G, LC),
            in_specs=[
                pl.BlockSpec((KMAX * KMAX, Lc), lambda g, l: (0, l)),
                pl.BlockSpec((1, Lc), lambda g, l: (0, l)),
                pl.BlockSpec((1, H, W, Lc), lambda g, l: (g, 0, 0, l)),
                pl.BlockSpec((1, H, W, Lc), lambda g, l: (g, 0, 0, l)),
            ],
            out_specs=pl.BlockSpec((1, H, W, Lc), lambda g, l: (g, 0, 0, l)),
            scratch_shapes=[
                pltpu.VMEM((H + 2 * PAD, LEFT + W + PAD, Lc), v.dtype),
            ],
        ),
        compiler_params=pltpu.CompilerParams(
            # NOTE: on v7x the two TensorCores shard these parallel axes; for a
            # tiny G*LC (like this unit test) only one core is busy.
            dimension_semantics=("parallel", "parallel"),
            vmem_limit_bytes=int(min(48 * 2 ** 20,
                                     max(16 * 2 ** 20, 2 * vmem_est)))),
        cost_estimate=pl.CostEstimate(
            flops=flops, transcendentals=0, bytes_accessed=bytes_accessed),
    )(w2, b2, q_f, v_f)

    out_f = out_f[..., :L]
    out = (out_f.reshape(G, H, W, Bf, n, hd)
                .transpose(0, 3, 4, 1, 2, 5)
                .reshape(B, n, H * W, hd))
    return out


def make_params(key, dim, num_heads):
    """Per-channel 7x7 depthwise weights (smaller windows centered) + bias."""
    head_dim = dim // num_heads
    w_full = jnp.zeros((KMAX, KMAX, dim), jnp.float32)
    bias = jnp.zeros((dim,), jnp.float32)
    ch_off = 0
    for i, (ksz, heads) in enumerate(WINDOWS.items()):
        c = heads * head_dim
        kkey, bkey = jax.random.split(jax.random.fold_in(key, i))
        wk = jax.random.normal(kkey, (ksz, ksz, c), jnp.float32) * 0.1
        bk = jax.random.normal(bkey, (c,), jnp.float32) * 0.1
        off = (KMAX - ksz) // 2
        w_full = w_full.at[off:off + ksz, off:off + ksz, ch_off:ch_off + c].set(wk)
        bias = bias.at[ch_off:ch_off + c].set(bk)
        ch_off += c
    assert ch_off == dim
    return w_full, bias


def reference(q, v, hw_shape, w_full, bias, *, num_heads):
    """Pure-JAX reference (NCHW depthwise conv) matching the PyTorch module."""
    H, W = hw_shape
    B, n, N, hd = q.shape
    C = n * hd
    v_nchw = v.transpose(0, 1, 3, 2).reshape(B, C, H, W)      # b n (hw) c -> b (n c) h w
    kern = jnp.transpose(w_full, (2, 0, 1))[:, None, :, :]    # (C, 1, 7, 7)
    conv = jax.lax.conv_general_dilated(
        v_nchw, kern, window_strides=(1, 1),
        padding=((PAD, PAD), (PAD, PAD)),
        dimension_numbers=("NCHW", "OIHW", "NCHW"),
        feature_group_count=C)
    conv = conv + bias[None, :, None, None]
    v_out = conv.reshape(B, n, hd, H * W).transpose(0, 1, 3, 2)  # -> b n (hw) c
    return q * v_out


if __name__ == "__main__":
    B, num_heads, H, W = 4, 8, 24, 16
    head_dim = 4
    dim = num_heads * head_dim          # 32   (folded lane dim = 4*32 = 128)
    hw_shape = (H, W)

    key = jax.random.PRNGKey(0)
    kq, kv, kp = jax.random.split(key, 3)
    q = jax.random.normal(kq, (B, num_heads, H * W, head_dim), jnp.float32)
    v = jax.random.normal(kv, (B, num_heads, H * W, head_dim), jnp.float32)
    w_full, bias = make_params(kp, dim, num_heads)

    out = conv_rel_pos_enc(q, v, hw_shape, w_full, bias, num_heads=num_heads)
    out = jax.block_until_ready(out)

    ref = reference(q, v, hw_shape, w_full, bias, num_heads=num_heads)
    assert out.shape == q.shape
    assert jnp.allclose(out, ref, atol=1e-4, rtol=1e-4), "mismatch vs reference"

    print("KERNEL_OK")
</pallas_src>

<mosaic_0001>
module attributes {stable_mosaic.version = 11 : i64} {
  func.func @_conv_relpos_kernel(%arg0: i32, %arg1: i32, %arg2: memref<49x128xf32, #tpu.memory_space<vmem>>, %arg3: memref<1x128xf32, #tpu.memory_space<vmem>>, %arg4: memref<1x24x16x128xf32, #tpu.memory_space<vmem>>, %arg5: memref<1x24x16x128xf32, #tpu.memory_space<vmem>>, %arg6: memref<1x24x16x128xf32, #tpu.memory_space<vmem>>, %arg7: memref<30x27x128xf32, #tpu.memory_space<vmem>>) attributes {dimension_semantics = [#tpu.dimension_semantics<parallel>, #tpu.dimension_semantics<parallel>], iteration_bounds = array<i64: 1, 1>, scalar_prefetch = 0 : i64, scratch_operands = 1 : i64, tpu.core_type = #tpu.core_type<tc>, window_params = [{transform_indices = @transform_0, window_bounds = array<i64: 49, 128>}, {transform_indices = @transform_1, window_bounds = array<i64: 1, 128>}, {transform_indices = @transform_2, window_bounds = array<i64: 1, 24, 16, 128>}, {transform_indices = @transform_3, window_bounds = array<i64: 1, 24, 16, 128>}, {transform_indices = @transform_4, window_bounds = array<i64: 1, 24, 16, 128>}]} {
    %cst = arith.constant 0.000000e+00 : f32
    %0 = vector.broadcast %cst : f32 to vector<3x27x128xf32>
    %c0 = arith.constant 0 : index
    %c0_0 = arith.constant 0 : index
    %c0_1 = arith.constant 0 : index
    %1 = vector.load %arg7[%c0, %c0_0, %c0_1] : memref<30x27x128xf32, #tpu.memory_space<vmem>>, vector<3x27x128xf32>
    tpu.vector_store %arg7[%c0, %c0_0, %c0_1], %0 {strides = array<i32>} : memref<30x27x128xf32, #tpu.memory_space<vmem>>, vector<3x27x128xf32>,
    %cst_2 = arith.constant 0.000000e+00 : f32
    %2 = vector.broadcast %cst_2 : f32 to vector<3x27x128xf32>
    %c27 = arith.constant 27 : index
    %c0_3 = arith.constant 0 : index
    %c0_4 = arith.constant 0 : index
    %3 = vector.load %arg7[%c27, %c0_3, %c0_4] : memref<30x27x128xf32, #tpu.memory_space<vmem>>, vector<3x27x128xf32>
    tpu.vector_store %arg7[%c27, %c0_3, %c0_4], %2 {strides = array<i32>} : memref<30x27x128xf32, #tpu.memory_space<vmem>>, vector<3x27x128xf32>,
    %cst_5 = arith.constant 0.000000e+00 : f32
    %4 = vector.broadcast %cst_5 : f32 to vector<30x8x128xf32>
    %c0_6 = arith.constant 0 : index
    %c0_7 = arith.constant 0 : index
    %c0_8 = arith.constant 0 : index
    %5 = vector.load %arg7[%c0_6, %c0_7, %c0_8] : memref<30x27x128xf32, #tpu.memory_space<vmem>>, vector<30x8x128xf32>
    tpu.vector_store %arg7[%c0_6, %c0_7, %c0_8], %4 {strides = array<i32>} : memref<30x27x128xf32, #tpu.memory_space<vmem>>, vector<30x8x128xf32>,
    %cst_9 = arith.constant 0.000000e+00 : f32
    %6 = vector.broadcast %cst_9 : f32 to vector<30x3x128xf32>
    %c0_10 = arith.constant 0 : index
    %c24 = arith.constant 24 : index
    %c0_11 = arith.constant 0 : index
    %7 = vector.load %arg7[%c0_10, %c24, %c0_11] : memref<30x27x128xf32, #tpu.memory_space<vmem>>, vector<30x3x128xf32>
    tpu.vector_store %arg7[%c0_10, %c24, %c0_11], %6 {strides = array<i32>} : memref<30x27x128xf32, #tpu.memory_space<vmem>>, vector<30x3x128xf32>,
    %c0_12 = arith.constant 0 : index
    %c0_13 = arith.constant 0 : index
    %c0_14 = arith.constant 0 : index
    %c0_15 = arith.constant 0 : index
    %8 = vector.load %arg5[%c0_12, %c0_13, %c0_14, %c0_15] : memref<1x24x16x128xf32, #tpu.memory_space<vmem>>, vector<1x8x16x128xf32>
    %9 = vector.shape_cast %8 : vector<1x8x16x128xf32> to vector<8x16x128xf32>
    %c3 = arith.constant 3 : index
    %c8 = arith.constant 8 : index
    %c0_16 = arith.constant 0 : index
    %10 = vector.load %arg7[%c3, %c8, %c0_16] : memref<30x27x128xf32, #tpu.memory_space<vmem>>, vector<8x16x128xf32>
    tpu.vector_store %arg7[%c3, %c8, %c0_16], %9 {strides = array<i32>} : memref<30x27x128xf32, #tpu.memory_space<vmem>>, vector<8x16x128xf32>,
    %c0_17 = arith.constant 0 : index
    %c8_18 = arith.constant 8 : index
    %c0_19 = arith.constant 0 : index
    %c0_20 = arith.constant 0 : index
    %11 = vector.load %arg5[%c0_17, %c8_18, %c0_19, %c0_20] : memref<1x24x16x128xf32, #tpu.memory_space<vmem>>, vector<1x8x16x128xf32>
    %12 = vector.shape_cast %11 : vector<1x8x16x128xf32> to vector<8x16x128xf32>
    %c11 = arith.constant 11 : index
    %c8_21 = arith.constant 8 : index
    %c0_22 = arith.constant 0 : index
    %13 = vector.load %arg7[%c11, %c8_21, %c0_22] : memref<30x27x128xf32, #tpu.memory_space<vmem>>, vector<8x16x128xf32>
    tpu.vector_store %arg7[%c11, %c8_21, %c0_22], %12 {strides = array<i32>} : memref<30x27x128xf32, #tpu.memory_space<vmem>>, vector<8x16x128xf32>,
    %c0_23 = arith.constant 0 : index
    %c16 = arith.constant 16 : index
    %c0_24 = arith.constant 0 : index
    %c0_25 = arith.constant 0 : index
    %14 = vector.load %arg5[%c0_23, %c16, %c0_24, %c0_25] : memref<1x24x16x128xf32, #tpu.memory_space<vmem>>, vector<1x8x16x128xf32>
    %15 = vector.shape_cast %14 : vector<1x8x16x128xf32> to vector<8x16x128xf32>
    %c19 = arith.constant 19 : index
    %c8_26 = arith.constant 8 : index
    %c0_27 = arith.constant 0 : index
    %16 = vector.load %arg7[%c19, %c8_26, %c0_27] : memref<30x27x128xf32, #tpu.memory_space<vmem>>, vector<8x16x128xf32>
    tpu.vector_store %arg7[%c19, %c8_26, %c0_27], %15 {strides = array<i32>} : memref<30x27x128xf32, #tpu.memory_space<vmem>>, vector<8x16x128xf32>,
    %c0_28 = arith.constant 0 : index
    %c0_29 = arith.constant 0 : index
    %17 = vector.load %arg3[%c0_28, %c0_29] : memref<1x128xf32, #tpu.memory_space<vmem>>, vector<1x128xf32>
    %18 = vector.shape_cast %17 : vector<1x128xf32> to vector<128xf32>
    %c0_i32 = arith.constant 0 : i32
    %c3_i32 = arith.constant 3 : i32
    %19 = arith.addi %c0_i32, %c3_i32 : i32
    %c1_i32 = arith.constant 1 : i32
    scf.for %arg8 = %c0_i32 to %19 step %c1_i32  : i32 {
      %c8_i32 = arith.constant 8 : i32
      %20 = arith.muli %arg8, %c8_i32 : i32
      %21 = tpu.assume_multiple %20, 8 : i32
      %cst_31 = arith.constant 0.000000e+00 : f32
      %22 = vector.broadcast %cst_31 : f32 to vector<8x16x128xf32>
      %c0_i32_32 = arith.constant 0 : i32
      %23 = arith.addi %21, %c0_i32_32 : i32
      %24 = arith.index_cast %23 : i32 to index
      %c5 = arith.constant 5 : index
      %c0_33 = arith.constant 0 : index
      %25 = vector.load %arg7[%24, %c5, %c0_33] : memref<30x27x128xf32, #tpu.memory_space<vmem>>, vector<8x16x128xf32>
      %c0_34 = arith.constant 0 : index
      %c0_35 = arith.constant 0 : index
      %26 = vector.load %arg2[%c0_34, %c0_35] : memref<49x128xf32, #tpu.memory_space<vmem>>, vector<1x128xf32>
      %27 = vector.shape_cast %26 : vector<1x128xf32> to vector<128xf32>
      %28 = vector.shape_cast %27 : vector<128xf32> to vector<1x1x128xf32>
      %29 = vector.broadcast %28 : vector<1x1x128xf32> to vector<8x16x128xf32>
      %30 = arith.mulf %25, %29 : vector<8x16x128xf32>
      %31 = arith.addf %22, %30 : vector<8x16x128xf32>
      %c0_i32_36 = arith.constant 0 : i32
      %32 = arith.addi %21, %c0_i32_36 : i32
      %33 = arith.index_cast %32 : i32 to index
      %c6 = arith.constant 6 : index
      %c0_37 = arith.constant 0 : index
      %34 = vector.load %arg7[%33, %c6, %c0_37] : memref<30x27x128xf32, #tpu.memory_space<vmem>>, vector<8x16x128xf32>
      %c1 = arith.constant 1 : index
      %c0_38 = arith.constant 0 : index
      %35 = vector.load %arg2[%c1, %c0_38] : memref<49x128xf32, #tpu.memory_space<vmem>>, vector<1x128xf32>
      %36 = vector.shape_cast %35 : vector<1x128xf32> to vector<128xf32>
      %37 = vector.shape_cast %36 : vector<128xf32> to vector<1x1x128xf32>
      %38 = vector.broadcast %37 : vector<1x1x128xf32> to vector<8x16x128xf32>
      %39 = arith.mulf %34, %38 : vector<8x16x128xf32>
      %40 = arith.addf %31, %39 : vector<8x16x128xf32>
      %c0_i32_39 = arith.constant 0 : i32
      %41 = arith.addi %21, %c0_i32_39 : i32
      %42 = arith.index_cast %41 : i32 to index
      %c7 = arith.constant 7 : index
      %c0_40 = arith.constant 0 : index
      %43 = vector.load %arg7[%42, %c7, %c0_40] : memref<30x27x128xf32, #tpu.memory_space<vmem>>, vector<8x16x128xf32>
      %c2 = arith.constant 2 : index
      %c0_41 = arith.constant 0 : index
      %44 = vector.load %arg2[%c2, %c0_41] : memref<49x128xf32, #tpu.memory_space<vmem>>, vector<1x128xf32>
      %45 = vector.shape_cast %44 : vector<1x128xf32> to vector<128xf32>
      %46 = vector.shape_cast %45 : vector<128xf32> to vector<1x1x128xf32>
      %47 = vector.broadcast %46 : vector<1x1x128xf32> to vector<8x16x128xf32>
      %48 = arith.mulf %43, %47 : vector<8x16x128xf32>
      %49 = arith.addf %40, %48 : vector<8x16x128xf32>
      %c0_i32_42 = arith.constant 0 : i32
      %50 = arith.addi %21, %c0_i32_42 : i32
      %51 = arith.index_cast %50 : i32 to index
      %c8_43 = arith.constant 8 : index
      %c0_44 = arith.constant 0 : index
      %52 = vector.load %arg7[%51, %c8_43, %c0_44] : memref<30x27x128xf32, #tpu.memory_space<vmem>>, vector<8x16x128xf32>
      %c3_45 = arith.constant 3 : index
      %c0_46 = arith.constant 0 : index
      %53 = vector.load %arg2[%c3_45, %c0_46] : memref<49x128xf32, #tpu.memory_space<vmem>>, vector<1x128xf32>
      %54 = vector.shape_cast %53 : vector<1x128xf32> to vector<128xf32>
      %55 = vector.shape_cast %54 : vector<128xf32> to vector<1x1x128xf32>
      %56 = vector.broadcast %55 : vector<1x1x128xf32> to vector<8x16x128xf32>
      %57 = arith.mulf %52, %56 : vector<8x16x128xf32>
      %58 = arith.addf %49, %57 : vector<8x16x128xf32>
      %c0_i32_47 = arith.constant 0 : i32
      %59 = arith.addi %21, %c0_i32_47 : i32
      %60 = arith.index_cast %59 : i32 to index
      %c9 = arith.constant 9 : index
      %c0_48 = arith.constant 0 : index
      %61 = vector.load %arg7[%60, %c9, %c0_48] : memref<30x27x128xf32, #tpu.memory_space<vmem>>, vector<8x16x128xf32>
      %c4 = arith.constant 4 : index
      %c0_49 = arith.constant 0 : index
      %62 = vector.load %arg2[%c4, %c0_49] : memref<49x128xf32, #tpu.memory_space<vmem>>, vector<1x128xf32>
      %63 = vector.shape_cast %62 : vector<1x128xf32> to vector<128xf32>
      %64 = vector.shape_cast %63 : vector<128xf32> to vector<1x1x128xf32>
      %65 = vector.broadcast %64 : vector<1x1x128xf32> to vector<8x16x128xf32>
      %66 = arith.mulf %61, %65 : vector<8x16x128xf32>
      %67 = arith.addf %58, %66 : vector<8x16x128xf32>
      %c0_i32_50 = arith.constant 0 : i32
      %68 = arith.addi %21, %c0_i32_50 : i32
      %69 = arith.index_cast %68 : i32 to index
      %c10 = arith.constant 10 : index
      %c0_51 = arith.constant 0 : index
      %70 = vector.load %arg7[%69, %c10, %c0_51] : memref<30x27x128xf32, #tpu.memory_space<vmem>>, vector<8x16x128xf32>
      %c5_52 = arith.constant 5 : index
      %c0_53 = arith.constant 0 : index
      %71 = vector.load %arg2[%c5_52, %c0_53] : memref<49x128xf32, #tpu.memory_space<vmem>>, vector<1x128xf32>
      %72 = vector.shape_cast %71 : vector<1x128xf32> to vector<128xf32>
      %73 = vector.shape_cast %72 : vector<128xf32> to vector<1x1x128xf32>
      %74 = vector.broadcast %73 : vector<1x1x128xf32> to vector<8x16x128xf32>
      %75 = arith.mulf %70, %74 : vector<8x16x128xf32>
      %76 = arith.addf %67, %75 : vector<8x16x128xf32>
      %c0_i32_54 = arith.constant 0 : i32
      %77 = arith.addi %21, %c0_i32_54 : i32
      %78 = arith.index_cast %77 : i32 to index
      %c11_55 = arith.constant 11 : index
      %c0_56 = arith.constant 0 : index
      %79 = vector.load %arg7[%78, %c11_55, %c0_56] : memref<30x27x128xf32, #tpu.memory_space<vmem>>, vector<8x16x128xf32>
      %c6_57 = arith.constant 6 : index
      %c0_58 = arith.constant 0 : index
      %80 = vector.load %arg2[%c6_57, %c0_58] : memref<49x128xf32, #tpu.memory_space<vmem>>, vector<1x128xf32>
      %81 = vector.shape_cast %80 : vector<1x128xf32> to vector<128xf32>
      %82 = vector.shape_cast %81 : vector<128xf32> to vector<1x1x128xf32>
      %83 = vector.broadcast %82 : vector<1x1x128xf32> to vector<8x16x128xf32>
      %84 = arith.mulf %79, %83 : vector<8x16x128xf32>
      %85 = arith.addf %76, %84 : vector<8x16x128xf32>
      %c1_i32_59 = arith.constant 1 : i32
      %86 = arith.addi %21, %c1_i32_59 : i32
      %87 = arith.index_cast %86 : i32 to index
      %c5_60 = arith.constant 5 : index
      %c0_61 = arith.constant 0 : index
      %88 = vector.load %arg7[%87, %c5_60, %c0_61] : memref<30x27x128xf32, #tpu.memory_space<vmem>>, vector<8x16x128xf32>
      %c7_62 = arith.constant 7 : index
      %c0_63 = arith.constant 0 : index
      %89 = vector.load %arg2[%c7_62, %c0_63] : memref<49x128xf32, #tpu.memory_space<vmem>>, vector<1x128xf32>
      %90 = vector.shape_cast %89 : vector<1x128xf32> to vector<128xf32>
      %91 = vector.shape_cast %90 : vector<128xf32> to vector<1x1x128xf32>
      %92 = vector.broadcast %91 : vector<1x1x128xf32> to vector<8x16x128xf32>
      %93 = arith.mulf %88, %92 : vector<8x16x128xf32>
      %94 = arith.addf %85, %93 : vector<8x16x128xf32>
      %c1_i32_64 = arith.constant 1 : i32
      %95 = arith.addi %21, %c1_i32_64 : i32
      %96 = arith.index_cast %95 : i32 to index
      %c6_65 = arith.constant 6 : index
      %c0_66 = arith.constant 0 : index
      %97 = vector.load %arg7[%96, %c6_65, %c0_66] : memref<30x27x128xf32, #tpu.memory_space<vmem>>, vector<8x16x128xf32>
      %c8_67 = arith.constant 8 : index
      %c0_68 = arith.constant 0 : index
      %98 = vector.load %arg2[%c8_67, %c0_68] : memref<49x128xf32, #tpu.memory_space<vmem>>, vector<1x128xf32>
      %99 = vector.shape_cast %98 : vector<1x128xf32> to vector<128xf32>
      %100 = vector.shape_cast %99 : vector<128xf32> to vector<1x1x128xf32>
      %101 = vector.broadcast %100 : vector<1x1x128xf32> to vector<8x16x128xf32>
      %102 = arith.mulf %97, %101 : vector<8x16x128xf32>
      %103 = arith.addf %94, %102 : vector<8x16x128xf32>
      %c1_i32_69 = arith.constant 1 : i32
      %104 = arith.addi %21, %c1_i32_69 : i32
      %105 = arith.index_cast %104 : i32 to index
      %c7_70 = arith.constant 7 : index
      %c0_71 = arith.constant 0 : index
      %106 = vector.load %arg7[%105, %c7_70, %c0_71] : memref<30x27x128xf32, #tpu.memory_space<vmem>>, vector<8x16x128xf32>
      %c9_72 = arith.constant 9 : index
      %c0_73 = arith.constant 0 : index
      %107 = vector.load %arg2[%c9_72, %c0_73] : memref<49x128xf32, #tpu.memory_space<vmem>>, vector<1x128xf32>
      %108 = vector.shape_cast %107 : vector<1x128xf32> to vector<128xf32>
      %109 = vector.shape_cast %108 : vector<128xf32> to vector<1x1x128xf32>
      %110 = vector.broadcast %109 : vector<1x1x128xf32> to vector<8x16x128xf32>
      %111 = arith.mulf %106, %110 : vector<8x16x128xf32>
      %112 = arith.addf %103, %111 : vector<8x16x128xf32>
      %c1_i32_74 = arith.constant 1 : i32
      %113 = arith.addi %21, %c1_i32_74 : i32
      %114 = arith.index_cast %113 : i32 to index
      %c8_75 = arith.constant 8 : index
      %c0_76 = arith.constant 0 : index
      %115 = vector.load %arg7[%114, %c8_75, %c0_76] : memref<30x27x128xf32, #tpu.memory_space<vmem>>, vector<8x16x128xf32>
      %c10_77 = arith.constant 10 : index
      %c0_78 = arith.constant 0 : index
      %116 = vector.load %arg2[%c10_77, %c0_78] : memref<49x128xf32, #tpu.memory_space<vmem>>, vector<1x128xf32>
      %117 = vector.shape_cast %116 : vector<1x128xf32> to vector<128xf32>
      %118 = vector.shape_cast %117 : vector<128xf32> to vector<1x1x128xf32>
      %119 = vector.broadcast %118 : vector<1x1x128xf32> to vector<8x16x128xf32>
      %120 = arith.mulf %115, %119 : vector<8x16x128xf32>
      %121 = arith.addf %112, %120 : vector<8x16x128xf32>
      %c1_i32_79 = arith.constant 1 : i32
      %122 = arith.addi %21, %c1_i32_79 : i32
      %123 = arith.index_cast %122 : i32 to index
      %c9_80 = arith.constant 9 : index
      %c0_81 = arith.constant 0 : index
      %124 = vector.load %arg7[%123, %c9_80, %c0_81] : memref<30x27x128xf32, #tpu.memory_space<vmem>>, vector<8x16x128xf32>
      %c11_82 = arith.constant 11 : index
      %c0_83 = arith.constant 0 : index
      %125 = vector.load %arg2[%c11_82, %c0_83] : memref<49x128xf32, #tpu.memory_space<vmem>>, vector<1x128xf32>
      %126 = vector.shape_cast %125 : vector<1x128xf32> to vector<128xf32>
      %127 = vector.shape_cast %126 : vector<128xf32> to vector<1x1x128xf32>
      %128 = vector.broadcast %127 : vector<1x1x128xf32> to vector<8x16x128xf32>
      %129 = arith.mulf %124, %128 : vector<8x16x128xf32>
      %130 = arith.addf %121, %129 : vector<8x16x128xf32>
      %c1_i32_84 = arith.constant 1 : i32
      %131 = arith.addi %21, %c1_i32_84 : i32
      %132 = arith.index_cast %131 : i32 to index
      %c10_85 = arith.constant 10 : index
      %c0_86 = arith.constant 0 : index
      %133 = vector.load %arg7[%132, %c10_85, %c0_86] : memref<30x27x128xf32, #tpu.memory_space<vmem>>, vector<8x16x128xf32>
      %c12 = arith.constant 12 : index
      %c0_87 = arith.constant 0 : index
      %134 = vector.load %arg2[%c12, %c0_87] : memref<49x128xf32, #tpu.memory_space<vmem>>, vector<1x128xf32>
      %135 = vector.shape_cast %134 : vector<1x128xf32> to vector<128xf32>
      %136 = vector.shape_cast %135 : vector<128xf32> to vector<1x1x128xf32>
      %137 = vector.broadcast %136 : vector<1x1x128xf32> to vector<8x16x128xf32>
      %138 = arith.mulf %133, %137 : vector<8x16x128xf32>
      %139 = arith.addf %130, %138 : vector<8x16x128xf32>
      %c1_i32_88 = arith.constant 1 : i32
      %140 = arith.addi %21, %c1_i32_88 : i32
      %141 = arith.index_cast %140 : i32 to index
      %c11_89 = arith.constant 11 : index
      %c0_90 = arith.constant 0 : index
      %142 = vector.load %arg7[%141, %c11_89, %c0_90] : memref<30x27x128xf32, #tpu.memory_space<vmem>>, vector<8x16x128xf32>
      %c13 = arith.constant 13 : index
      %c0_91 = arith.constant 0 : index
      %143 = vector.load %arg2[%c13, %c0_91] : memref<49x128xf32, #tpu.memory_space<vmem>>, vector<1x128xf32>
      %144 = vector.shape_cast %143 : vector<1x128xf32> to vector<128xf32>
      %145 = vector.shape_cast %144 : vector<128xf32> to vector<1x1x128xf32>
      %146 = vector.broadcast %145 : vector<1x1x128xf32> to vector<8x16x128xf32>
      %147 = arith.mulf %142, %146 : vector<8x16x128xf32>
      %148 = arith.addf %139, %147 : vector<8x16x128xf32>
      %c2_i32 = arith.constant 2 : i32
      %149 = arith.addi %21, %c2_i32 : i32
      %150 = arith.index_cast %149 : i32 to index
      %c5_92 = arith.constant 5 : index
      %c0_93 = arith.constant 0 : index
      %151 = vector.load %arg7[%150, %c5_92, %c0_93] : memref<30x27x128xf32, #tpu.memory_space<vmem>>, vector<8x16x128xf32>
      %c14 = arith.constant 14 : index
      %c0_94 = arith.constant 0 : index
      %152 = vector.load %arg2[%c14, %c0_94] : memref<49x128xf32, #tpu.memory_space<vmem>>, vector<1x128xf32>
      %153 = vector.shape_cast %152 : vector<1x128xf32> to vector<128xf32>
      %154 = vector.shape_cast %153 : vector<128xf32> to vector<1x1x128xf32>
      %155 = vector.broadcast %154 : vector<1x1x128xf32> to vector<8x16x128xf32>
      %156 = arith.mulf %151, %155 : vector<8x16x128xf32>
      %157 = arith.addf %148, %156 : vector<8x16x128xf32>
      %c2_i32_95 = arith.constant 2 : i32
      %158 = arith.addi %21, %c2_i32_95 : i32
      %159 = arith.index_cast %158 : i32 to index
      %c6_96 = arith.constant 6 : index
      %c0_97 = arith.constant 0 : index
      %160 = vector.load %arg7[%159, %c6_96, %c0_97] : memref<30x27x128xf32, #tpu.memory_space<vmem>>, vector<8x16x128xf32>
      %c15 = arith.constant 15 : index
      %c0_98 = arith.constant 0 : index
      %161 = vector.load %arg2[%c15, %c0_98] : memref<49x128xf32, #tpu.memory_space<vmem>>, vector<1x128xf32>
      %162 = vector.shape_cast %161 : vector<1x128xf32> to vector<128xf32>
      %163 = vector.shape_cast %162 : vector<128xf32> to vector<1x1x128xf32>
      %164 = vector.broadcast %163 : vector<1x1x128xf32> to vector<8x16x128xf32>
      %165 = arith.mulf %160, %164 : vector<8x16x128xf32>
      %166 = arith.addf %157, %165 : vector<8x16x128xf32>
      %c2_i32_99 = arith.constant 2 : i32
      %167 = arith.addi %21, %c2_i32_99 : i32
      %168 = arith.index_cast %167 : i32 to index
      %c7_100 = arith.constant 7 : index
      %c0_101 = arith.constant 0 : index
      %169 = vector.load %arg7[%168, %c7_100, %c0_101] : memref<30x27x128xf32, #tpu.memory_space<vmem>>, vector<8x16x128xf32>
      %c16_102 = arith.constant 16 : index
      %c0_103 = arith.constant 0 : index
      %170 = vector.load %arg2[%c16_102, %c0_103] : memref<49x128xf32, #tpu.memory_space<vmem>>, vector<1x128xf32>
      %171 = vector.shape_cast %170 : vector<1x128xf32> to vector<128xf32>
      %172 = vector.shape_cast %171 : vector<128xf32> to vector<1x1x128xf32>
      %173 = vector.broadcast %172 : vector<1x1x128xf32> to vector<8x16x128xf32>
      %174 = arith.mulf %169, %173 : vector<8x16x128xf32>
      %175 = arith.addf %166, %174 : vector<8x16x128xf32>
      %c2_i32_104 = arith.constant 2 : i32
      %176 = arith.addi %21, %c2_i32_104 : i32
      %177 = arith.index_cast %176 : i32 to index
      %c8_105 = arith.constant 8 : index
      %c0_106 = arith.constant 0 : index
      %178 = vector.load %arg7[%177, %c8_105, %c0_106] : memref<30x27x128xf32, #tpu.memory_space<vmem>>, vector<8x16x128xf32>
      %c17 = arith.constant 17 : index
      %c0_107 = arith.constant 0 : index
      %179 = vector.load %arg2[%c17, %c0_107] : memref<49x128xf32, #tpu.memory_space<vmem>>, vector<1x128xf32>
      %180 = vector.shape_cast %179 : vector<1x128xf32> to vector<128xf32>
      %181 = vector.shape_cast %180 : vector<128xf32> to vector<1x1x128xf32>
      %182 = vector.broadcast %181 : vector<1x1x128xf32> to vector<8x16x128xf32>
      %183 = arith.mulf %178, %182 : vector<8x16x128xf32>
      %184 = arith.addf %175, %183 : vector<8x16x128xf32>
      %c2_i32_108 = arith.constant 2 : i32
      %185 = arith.addi %21, %c2_i32_108 : i32
      %186 = arith.index_cast %185 : i32 to index
      %c9_109 = arith.constant 9 : index
      %c0_110 = arith.constant 0 : index
      %187 = vector.load %arg7[%186, %c9_109, %c0_110] : memref<30x27x128xf32, #tpu.memory_space<vmem>>, vector<8x16x128xf32>
      %c18 = arith.constant 18 : index
      %c0_111 = arith.constant 0 : index
      %188 = vector.load %arg2[%c18, %c0_111] : memref<49x128xf32, #tpu.memory_space<vmem>>, vector<1x128xf32>
      %189 = vector.shape_cast %188 : vector<1x128xf32> to vector<128xf32>
      %190 = vector.shape_cast %189 : vector<128xf32> to vector<1x1x128xf32>
      %191 = vector.broadcast %190 : vector<1x1x128xf32> to vector<8x16x128xf32>
      %192 = arith.mulf %187, %191 : vector<8x16x128xf32>
      %193 = arith.addf %184, %192 : vector<8x16x128xf32>
      %c2_i32_112 = arith.constant 2 : i32
      %194 = arith.addi %21, %c2_i32_112 : i32
      %195 = arith.index_cast %194 : i32 to index
      %c10_113 = arith.constant 10 : index
      %c0_114 = arith.constant 0 : index
      %196 = vector.load %arg7[%195, %c10_113, %c0_114] : memref<30x27x128xf32, #tpu.memory_space<vmem>>, vector<8x16x128xf32>
      %c19_115 = arith.constant 19 : index
      %c0_116 = arith.constant 0 : index
      %197 = vector.load %arg2[%c19_115, %c0_116] : memref<49x128xf32, #tpu.memory_space<vmem>>, vector<1x128xf32>
      %198 = vector.shape_cast %197 : vector<1x128xf32> to vector<128xf32>
      %199 = vector.shape_cast %198 : vector<128xf32> to vector<1x1x128xf32>
      %200 = vector.broadcast %199 : vector<1x1x128xf32> to vector<8x16x128xf32>
      %201 = arith.mulf %196, %200 : vector<8x16x128xf32>
      %202 = arith.addf %193, %201 : vector<8x16x128xf32>
      %c2_i32_117 = arith.constant 2 : i32
      %203 = arith.addi %21, %c2_i32_117 : i32
      %204 = arith.index_cast %203 : i32 to index
      %c11_118 = arith.constant 11 : index
      %c0_119 = arith.constant 0 : index
      %205 = vector.load %arg7[%204, %c11_118, %c0_119] : memref<30x27x128xf32, #tpu.memory_space<vmem>>, vector<8x16x128xf32>
      %c20 = arith.constant 20 : index
      %c0_120 = arith.constant 0 : index
      %206 = vector.load %arg2[%c20, %c0_120] : memref<49x128xf32, #tpu.memory_space<vmem>>, vector<1x128xf32>
      %207 = vector.shape_cast %206 : vector<1x128xf32> to vector<128xf32>
      %208 = vector.shape_cast %207 : vector<128xf32> to vector<1x1x128xf32>
      %209 = vector.broadcast %208 : vector<1x1x128xf32> to vector<8x16x128xf32>
      %210 = arith.mulf %205, %209 : vector<8x16x128xf32>
      %211 = arith.addf %202, %210 : vector<8x16x128xf32>
      %c3_i32_121 = arith.constant 3 : i32
      %212 = arith.addi %21, %c3_i32_121 : i32
      %213 = arith.index_cast %212 : i32 to index
      %c5_122 = arith.constant 5 : index
      %c0_123 = arith.constant 0 : index
      %214 = vector.load %arg7[%213, %c5_122, %c0_123] : memref<30x27x128xf32, #tpu.memory_space<vmem>>, vector<8x16x128xf32>
      %c21 = arith.constant 21 : index
      %c0_124 = arith.constant 0 : index
      %215 = vector.load %arg2[%c21, %c0_124] : memref<49x128xf32, #tpu.memory_space<vmem>>, vector<1x128xf32>
      %216 = vector.shape_cast %215 : vector<1x128xf32> to vector<128xf32>
      %217 = vector.shape_cast %216 : vector<128xf32> to vector<1x1x128xf32>
      %218 = vector.broadcast %217 : vector<1x1x128xf32> to vector<8x16x128xf32>
      %219 = arith.mulf %214, %218 : vector<8x16x128xf32>
      %220 = arith.addf %211, %219 : vector<8x16x128xf32>
      %c3_i32_125 = arith.constant 3 : i32
      %221 = arith.addi %21, %c3_i32_125 : i32
      %222 = arith.index_cast %221 : i32 to index
      %c6_126 = arith.constant 6 : index
      %c0_127 = arith.constant 0 : index
      %223 = vector.load %arg7[%222, %c6_126, %c0_127] : memref<30x27x128xf32, #tpu.memory_space<vmem>>, vector<8x16x128xf32>
      %c22 = arith.constant 22 : index
      %c0_128 = arith.constant 0 : index
      %224 = vector.load %arg2[%c22, %c0_128] : memref<49x128xf32, #tpu.memory_space<vmem>>, vector<1x128xf32>
      %225 = vector.shape_cast %224 : vector<1x128xf32> to vector<128xf32>
      %226 = vector.shape_cast %225 : vector<128xf32> to vector<1x1x128xf32>
      %227 = vector.broadcast %226 : vector<1x1x128xf32> to vector<8x16x128xf32>
      %228 = arith.mulf %223, %227 : vector<8x16x128xf32>
      %229 = arith.addf %220, %228 : vector<8x16x128xf32>
      %c3_i32_129 = arith.constant 3 : i32
      %230 = arith.addi %21, %c3_i32_129 : i32
      %231 = arith.index_cast %230 : i32 to index
      %c7_130 = arith.constant 7 : index
      %c0_131 = arith.constant 0 : index
      %232 = vector.load %arg7[%231, %c7_130, %c0_131] : memref<30x27x128xf32, #tpu.memory_space<vmem>>, vector<8x16x128xf32>
      %c23 = arith.constant 23 : index
      %c0_132 = arith.constant 0 : index
      %233 = vector.load %arg2[%c23, %c0_132] : memref<49x128xf32, #tpu.memory_space<vmem>>, vector<1x128xf32>
      %234 = vector.shape_cast %233 : vector<1x128xf32> to vector<128xf32>
      %235 = vector.shape_cast %234 : vector<128xf32> to vector<1x1x128xf32>
      %236 = vector.broadcast %235 : vector<1x1x128xf32> to vector<8x16x128xf32>
      %237 = arith.mulf %232, %236 : vector<8x16x128xf32>
      %238 = arith.addf %229, %237 : vector<8x16x128xf32>
      %c3_i32_133 = arith.constant 3 : i32
      %239 = arith.addi %21, %c3_i32_133 : i32
      %240 = arith.index_cast %239 : i32 to index
      %c8_134 = arith.constant 8 : index
      %c0_135 = arith.constant 0 : index
      %241 = vector.load %arg7[%240, %c8_134, %c0_135] : memref<30x27x128xf32, #tpu.memory_space<vmem>>, vector<8x16x128xf32>
      %c24_136 = arith.constant 24 : index
      %c0_137 = arith.constant 0 : index
      %242 = vector.load %arg2[%c24_136, %c0_137] : memref<49x128xf32, #tpu.memory_space<vmem>>, vector<1x128xf32>
      %243 = vector.shape_cast %242 : vector<1x128xf32> to vector<128xf32>
      %244 = vector.shape_cast %243 : vector<128xf32> to vector<1x1x128xf32>
      %245 = vector.broadcast %244 : vector<1x1x128xf32> to vector<8x16x128xf32>
      %246 = arith.mulf %241, %245 : vector<8x16x128xf32>
      %247 = arith.addf %238, %246 : vector<8x16x128xf32>
      %c3_i32_138 = arith.constant 3 : i32
      %248 = arith.addi %21, %c3_i32_138 : i32
      %249 = arith.index_cast %248 : i32 to index
      %c9_139 = arith.constant 9 : index
      %c0_140 = arith.constant 0 : index
      %250 = vector.load %arg7[%249, %c9_139, %c0_140] : memref<30x27x128xf32, #tpu.memory_space<vmem>>, vector<8x16x128xf32>
      %c25 = arith.constant 25 : index
      %c0_141 = arith.constant 0 : index
      %251 = vector.load %arg2[%c25, %c0_141] : memref<49x128xf32, #tpu.memory_space<vmem>>, vector<1x128xf32>
      %252 = vector.shape_cast %251 : vector<1x128xf32> to vector<128xf32>
      %253 = vector.shape_cast %252 : vector<128xf32> to vector<1x1x128xf32>
      %254 = vector.broadcast %253 : vector<1x1x128xf32> to vector<8x16x128xf32>
      %255 = arith.mulf %250, %254 : vector<8x16x128xf32>
      %256 = arith.addf %247, %255 : vector<8x16x128xf32>
      %c3_i32_142 = arith.constant 3 : i32
      %257 = arith.addi %21, %c3_i32_142 : i32
      %258 = arith.index_cast %257 : i32 to index
      %c10_143 = arith.constant 10 : index
      %c0_144 = arith.constant 0 : index
      %259 = vector.load %arg7[%258, %c10_143, %c0_144] : memref<30x27x128xf32, #tpu.memory_space<vmem>>, vector<8x16x128xf32>
      %c26 = arith.constant 26 : index
      %c0_145 = arith.constant 0 : index
      %260 = vector.load %arg2[%c26, %c0_145] : memref<49x128xf32, #tpu.memory_space<vmem>>, vector<1x128xf32>
      %261 = vector.shape_cast %260 : vector<1x128xf32> to vector<128xf32>
      %262 = vector.shape_cast %261 : vector<128xf32> to vector<1x1x128xf32>
      %263 = vector.broadcast %262 : vector<1x1x128xf32> to vector<8x16x128xf32>
      %264 = arith.mulf %259, %263 : vector<8x16x128xf32>
      %265 = arith.addf %256, %264 : vector<8x16x128xf32>
      %c3_i32_146 = arith.constant 3 : i32
      %266 = arith.addi %21, %c3_i32_146 : i32
      %267 = arith.index_cast %266 : i32 to index
      %c11_147 = arith.constant 11 : index
      %c0_148 = arith.constant 0 : index
      %268 = vector.load %arg7[%267, %c11_147, %c0_148] : memref<30x27x128xf32, #tpu.memory_space<vmem>>, vector<8x16x128xf32>
      %c27_149 = arith.constant 27 : index
      %c0_150 = arith.constant 0 : index
      %269 = vector.load %arg2[%c27_149, %c0_150] : memref<49x128xf32, #tpu.memory_space<vmem>>, vector<1x128xf32>
      %270 = vector.shape_cast %269 : vector<1x128xf32> to vector<128xf32>
      %271 = vector.shape_cast %270 : vector<128xf32> to vector<1x1x128xf32>
      %272 = vector.broadcast %271 : vector<1x1x128xf32> to vector<8x16x128xf32>
      %273 = arith.mulf %268, %272 : vector<8x16x128xf32>
      %274 = arith.addf %265, %273 : vector<8x16x128xf32>
      %c4_i32 = arith.constant 4 : i32
      %275 = arith.addi %21, %c4_i32 : i32
      %276 = arith.index_cast %275 : i32 to index
      %c5_151 = arith.constant 5 : index
      %c0_152 = arith.constant 0 : index
      %277 = vector.load %arg7[%276, %c5_151, %c0_152] : memref<30x27x128xf32, #tpu.memory_space<vmem>>, vector<8x16x128xf32>
      %c28 = arith.constant 28 : index
      %c0_153 = arith.constant 0 : index
      %278 = vector.load %arg2[%c28, %c0_153] : memref<49x128xf32, #tpu.memory_space<vmem>>, vector<1x128xf32>
      %279 = vector.shape_cast %278 : vector<1x128xf32> to vector<128xf32>
      %280 = vector.shape_cast %279 : vector<128xf32> to vector<1x1x128xf32>
      %281 = vector.broadcast %280 : vector<1x1x128xf32> to vector<8x16x128xf32>
      %282 = arith.mulf %277, %281 : vector<8x16x128xf32>
      %283 = arith.addf %274, %282 : vector<8x16x128xf32>
      %c4_i32_154 = arith.constant 4 : i32
      %284 = arith.addi %21, %c4_i32_154 : i32
      %285 = arith.index_cast %284 : i32 to index
      %c6_155 = arith.constant 6 : index
      %c0_156 = arith.constant 0 : index
      %286 = vector.load %arg7[%285, %c6_155, %c0_156] : memref<30x27x128xf32, #tpu.memory_space<vmem>>, vector<8x16x128xf32>
      %c29 = arith.constant 29 : index
      %c0_157 = arith.constant 0 : index
      %287 = vector.load %arg2[%c29, %c0_157] : memref<49x128xf32, #tpu.memory_space<vmem>>, vector<1x128xf32>
      %288 = vector.shape_cast %287 : vector<1x128xf32> to vector<128xf32>
      %289 = vector.shape_cast %288 : vector<128xf32> to vector<1x1x128xf32>
      %290 = vector.broadcast %289 : vector<1x1x128xf32> to vector<8x16x128xf32>
      %291 = arith.mulf %286, %290 : vector<8x16x128xf32>
      %292 = arith.addf %283, %291 : vector<8x16x128xf32>
      %c4_i32_158 = arith.constant 4 : i32
      %293 = arith.addi %21, %c4_i32_158 : i32
      %294 = arith.index_cast %293 : i32 to index
      %c7_159 = arith.constant 7 : index
      %c0_160 = arith.constant 0 : index
      %295 = vector.load %arg7[%294, %c7_159, %c0_160] : memref<30x27x128xf32, #tpu.memory_space<vmem>>, vector<8x16x128xf32>
      %c30 = arith.constant 30 : index
      %c0_161 = arith.constant 0 : index
      %296 = vector.load %arg2[%c30, %c0_161] : memref<49x128xf32, #tpu.memory_space<vmem>>, vector<1x128xf32>
      %297 = vector.shape_cast %296 : vector<1x128xf32> to vector<128xf32>
      %298 = vector.shape_cast %297 : vector<128xf32> to vector<1x1x128xf32>
      %299 = vector.broadcast %298 : vector<1x1x128xf32> to vector<8x16x128xf32>
      %300 = arith.mulf %295, %299 : vector<8x16x128xf32>
      %301 = arith.addf %292, %300 : vector<8x16x128xf32>
      %c4_i32_162 = arith.constant 4 : i32
      %302 = arith.addi %21, %c4_i32_162 : i32
      %303 = arith.index_cast %302 : i32 to index
      %c8_163 = arith.constant 8 : index
      %c0_164 = arith.constant 0 : index
      %304 = vector.load %arg7[%303, %c8_163, %c0_164] : memref<30x27x128xf32, #tpu.memory_space<vmem>>, vector<8x16x128xf32>
      %c31 = arith.constant 31 : index
      %c0_165 = arith.constant 0 : index
      %305 = vector.load %arg2[%c31, %c0_165] : memref<49x128xf32, #tpu.memory_space<vmem>>, vector<1x128xf32>
      %306 = vector.shape_cast %305 : vector<1x128xf32> to vector<128xf32>
      %307 = vector.shape_cast %306 : vector<128xf32> to vector<1x1x128xf32>
      %308 = vector.broadcast %307 : vector<1x1x128xf32> to vector<8x16x128xf32>
      %309 = arith.mulf %304, %308 : vector<8x16x128xf32>
      %310 = arith.addf %301, %309 : vector<8x16x128xf32>
      %c4_i32_166 = arith.constant 4 : i32
      %311 = arith.addi %21, %c4_i32_166 : i32
      %312 = arith.index_cast %311 : i32 to index
      %c9_167 = arith.constant 9 : index
      %c0_168 = arith.constant 0 : index
      %313 = vector.load %arg7[%312, %c9_167, %c0_168] : memref<30x27x128xf32, #tpu.memory_space<vmem>>, vector<8x16x128xf32>
      %c32 = arith.constant 32 : index
      %c0_169 = arith.constant 0 : index
      %314 = vector.load %arg2[%c32, %c0_169] : memref<49x128xf32, #tpu.memory_space<vmem>>, vector<1x128xf32>
      %315 = vector.shape_cast %314 : vector<1x128xf32> to vector<128xf32>
      %316 = vector.shape_cast %315 : vector<128xf32> to vector<1x1x128xf32>
      %317 = vector.broadcast %316 : vector<1x1x128xf32> to vector<8x16x128xf32>
      %318 = arith.mulf %313, %317 : vector<8x16x128xf32>
      %319 = arith.addf %310, %318 : vector<8x16x128xf32>
      %c4_i32_170 = arith.constant 4 : i32
      %320 = arith.addi %21, %c4_i32_170 : i32
      %321 = arith.index_cast %320 : i32 to index
      %c10_171 = arith.constant 10 : index
      %c0_172 = arith.constant 0 : index
      %322 = vector.load %arg7[%321, %c10_171, %c0_172] : memref<30x27x128xf32, #tpu.memory_space<vmem>>, vector<8x16x128xf32>
      %c33 = arith.constant 33 : index
      %c0_173 = arith.constant 0 : index
      %323 = vector.load %arg2[%c33, %c0_173] : memref<49x128xf32, #tpu.memory_space<vmem>>, vector<1x128xf32>
      %324 = vector.shape_cast %323 : vector<1x128xf32> to vector<128xf32>
      %325 = vector.shape_cast %324 : vector<128xf32> to vector<1x1x128xf32>
      %326 = vector.broadcast %325 : vector<1x1x128xf32> to vector<8x16x128xf32>
      %327 = arith.mulf %322, %326 : vector<8x16x128xf32>
      %328 = arith.addf %319, %327 : vector<8x16x128xf32>
      %c4_i32_174 = arith.constant 4 : i32
      %329 = arith.addi %21, %c4_i32_174 : i32
      %330 = arith.index_cast %329 : i32 to index
      %c11_175 = arith.constant 11 : index
      %c0_176 = arith.constant 0 : index
      %331 = vector.load %arg7[%330, %c11_175, %c0_176] : memref<30x27x128xf32, #tpu.memory_space<vmem>>, vector<8x16x128xf32>
      %c34 = arith.constant 34 : index
      %c0_177 = arith.constant 0 : index
      %332 = vector.load %arg2[%c34, %c0_177] : memref<49x128xf32, #tpu.memory_space<vmem>>, vector<1x128xf32>
      %333 = vector.shape_cast %332 : vector<1x128xf32> to vector<128xf32>
      %334 = vector.shape_cast %333 : vector<128xf32> to vector<1x1x128xf32>
      %335 = vector.broadcast %334 : vector<1x1x128xf32> to vector<8x16x128xf32>
      %336 = arith.mulf %331, %335 : vector<8x16x128xf32>
      %337 = arith.addf %328, %336 : vector<8x16x128xf32>
      %c5_i32 = arith.constant 5 : i32
      %338 = arith.addi %21, %c5_i32 : i32
      %339 = arith.index_cast %338 : i32 to index
      %c5_178 = arith.constant 5 : index
      %c0_179 = arith.constant 0 : index
      %340 = vector.load %arg7[%339, %c5_178, %c0_179] : memref<30x27x128xf32, #tpu.memory_space<vmem>>, vector<8x16x128xf32>
      %c35 = arith.constant 35 : index
      %c0_180 = arith.constant 0 : index
      %341 = vector.load %arg2[%c35, %c0_180] : memref<49x128xf32, #tpu.memory_space<vmem>>, vector<1x128xf32>
      %342 = vector.shape_cast %341 : vector<1x128xf32> to vector<128xf32>
      %343 = vector.shape_cast %342 : vector<128xf32> to vector<1x1x128xf32>
      %344 = vector.broadcast %343 : vector<1x1x128xf32> to vector<8x16x128xf32>
      %345 = arith.mulf %340, %344 : vector<8x16x128xf32>
      %346 = arith.addf %337, %345 : vector<8x16x128xf32>
      %c5_i32_181 = arith.constant 5 : i32
      %347 = arith.addi %21, %c5_i32_181 : i32
      %348 = arith.index_cast %347 : i32 to index
      %c6_182 = arith.constant 6 : index
      %c0_183 = arith.constant 0 : index
      %349 = vector.load %arg7[%348, %c6_182, %c0_183] : memref<30x27x128xf32, #tpu.memory_space<vmem>>, vector<8x16x128xf32>
      %c36 = arith.constant 36 : index
      %c0_184 = arith.constant 0 : index
      %350 = vector.load %arg2[%c36, %c0_184] : memref<49x128xf32, #tpu.memory_space<vmem>>, vector<1x128xf32>
      %351 = vector.shape_cast %350 : vector<1x128xf32> to vector<128xf32>
      %352 = vector.shape_cast %351 : vector<128xf32> to vector<1x1x128xf32>
      %353 = vector.broadcast %352 : vector<1x1x128xf32> to vector<8x16x128xf32>
      %354 = arith.mulf %349, %353 : vector<8x16x128xf32>
      %355 = arith.addf %346, %354 : vector<8x16x128xf32>
      %c5_i32_185 = arith.constant 5 : i32
      %356 = arith.addi %21, %c5_i32_185 : i32
      %357 = arith.index_cast %356 : i32 to index
      %c7_186 = arith.constant 7 : index
      %c0_187 = arith.constant 0 : index
      %358 = vector.load %arg7[%357, %c7_186, %c0_187] : memref<30x27x128xf32, #tpu.memory_space<vmem>>, vector<8x16x128xf32>
      %c37 = arith.constant 37 : index
      %c0_188 = arith.constant 0 : index
      %359 = vector.load %arg2[%c37, %c0_188] : memref<49x128xf32, #tpu.memory_space<vmem>>, vector<1x128xf32>
      %360 = vector.shape_cast %359 : vector<1x128xf32> to vector<128xf32>
      %361 = vector.shape_cast %360 : vector<128xf32> to vector<1x1x128xf32>
      %362 = vector.broadcast %361 : vector<1x1x128xf32> to vector<8x16x128xf32>
      %363 = arith.mulf %358, %362 : vector<8x16x128xf32>
      %364 = arith.addf %355, %363 : vector<8x16x128xf32>
      %c5_i32_189 = arith.constant 5 : i32
      %365 = arith.addi %21, %c5_i32_189 : i32
      %366 = arith.index_cast %365 : i32 to index
      %c8_190 = arith.constant 8 : index
      %c0_191 = arith.constant 0 : index
      %367 = vector.load %arg7[%366, %c8_190, %c0_191] : memref<30x27x128xf32, #tpu.memory_space<vmem>>, vector<8x16x128xf32>
      %c38 = arith.constant 38 : index
      %c0_192 = arith.constant 0 : index
      %368 = vector.load %arg2[%c38, %c0_192] : memref<49x128xf32, #tpu.memory_space<vmem>>, vector<1x128xf32>
      %369 = vector.shape_cast %368 : vector<1x128xf32> to vector<128xf32>
      %370 = vector.shape_cast %369 : vector<128xf32> to vector<1x1x128xf32>
      %371 = vector.broadcast %370 : vector<1x1x128xf32> to vector<8x16x128xf32>
      %372 = arith.mulf %367, %371 : vector<8x16x128xf32>
      %373 = arith.addf %364, %372 : vector<8x16x128xf32>
      %c5_i32_193 = arith.constant 5 : i32
      %374 = arith.addi %21, %c5_i32_193 : i32
      %375 = arith.index_cast %374 : i32 to index
      %c9_194 = arith.constant 9 : index
      %c0_195 = arith.constant 0 : index
      %376 = vector.load %arg7[%375, %c9_194, %c0_195] : memref<30x27x128xf32, #tpu.memory_space<vmem>>, vector<8x16x128xf32>
      %c39 = arith.constant 39 : index
      %c0_196 = arith.constant 0 : index
      %377 = vector.load %arg2[%c39, %c0_196] : memref<49x128xf32, #tpu.memory_space<vmem>>, vector<1x128xf32>
      %378 = vector.shape_cast %377 : vector<1x128xf32> to vector<128xf32>
      %379 = vector.shape_cast %378 : vector<128xf32> to vector<1x1x128xf32>
      %380 = vector.broadcast %379 : vector<1x1x128xf32> to vector<8x16x128xf32>
      %381 = arith.mulf %376, %380 : vector<8x16x128xf32>
      %382 = arith.addf %373, %381 : vector<8x16x128xf32>
      %c5_i32_197 = arith.constant 5 : i32
      %383 = arith.addi %21, %c5_i32_197 : i32
      %384 = arith.index_cast %383 : i32 to index
      %c10_198 = arith.constant 10 : index
      %c0_199 = arith.constant 0 : index
      %385 = vector.load %arg7[%384, %c10_198, %c0_199] : memref<30x27x128xf32, #tpu.memory_space<vmem>>, vector<8x16x128xf32>
      %c40 = arith.constant 40 : index
      %c0_200 = arith.constant 0 : index
      %386 = vector.load %arg2[%c40, %c0_200] : memref<49x128xf32, #tpu.memory_space<vmem>>, vector<1x128xf32>
      %387 = vector.shape_cast %386 : vector<1x128xf32> to vector<128xf32>
      %388 = vector.shape_cast %387 : vector<128xf32> to vector<1x1x128xf32>
      %389 = vector.broadcast %388 : vector<1x1x128xf32> to vector<8x16x128xf32>
      %390 = arith.mulf %385, %389 : vector<8x16x128xf32>
      %391 = arith.addf %382, %390 : vector<8x16x128xf32>
      %c5_i32_201 = arith.constant 5 : i32
      %392 = arith.addi %21, %c5_i32_201 : i32
      %393 = arith.index_cast %392 : i32 to index
      %c11_202 = arith.constant 11 : index
      %c0_203 = arith.constant 0 : index
      %394 = vector.load %arg7[%393, %c11_202, %c0_203] : memref<30x27x128xf32, #tpu.memory_space<vmem>>, vector<8x16x128xf32>
      %c41 = arith.constant 41 : index
      %c0_204 = arith.constant 0 : index
      %395 = vector.load %arg2[%c41, %c0_204] : memref<49x128xf32, #tpu.memory_space<vmem>>, vector<1x128xf32>
      %396 = vector.shape_cast %395 : vector<1x128xf32> to vector<128xf32>
      %397 = vector.shape_cast %396 : vector<128xf32> to vector<1x1x128xf32>
      %398 = vector.broadcast %397 : vector<1x1x128xf32> to vector<8x16x128xf32>
      %399 = arith.mulf %394, %398 : vector<8x16x128xf32>
      %400 = arith.addf %391, %399 : vector<8x16x128xf32>
      %c6_i32 = arith.constant 6 : i32
      %401 = arith.addi %21, %c6_i32 : i32
      %402 = arith.index_cast %401 : i32 to index
      %c5_205 = arith.constant 5 : index
      %c0_206 = arith.constant 0 : index
      %403 = vector.load %arg7[%402, %c5_205, %c0_206] : memref<30x27x128xf32, #tpu.memory_space<vmem>>, vector<8x16x128xf32>
      %c42 = arith.constant 42 : index
      %c0_207 = arith.constant 0 : index
      %404 = vector.load %arg2[%c42, %c0_207] : memref<49x128xf32, #tpu.memory_space<vmem>>, vector<1x128xf32>
      %405 = vector.shape_cast %404 : vector<1x128xf32> to vector<128xf32>
      %406 = vector.shape_cast %405 : vector<128xf32> to vector<1x1x128xf32>
      %407 = vector.broadcast %406 : vector<1x1x128xf32> to vector<8x16x128xf32>
      %408 = arith.mulf %403, %407 : vector<8x16x128xf32>
      %409 = arith.addf %400, %408 : vector<8x16x128xf32>
      %c6_i32_208 = arith.constant 6 : i32
      %410 = arith.addi %21, %c6_i32_208 : i32
      %411 = arith.index_cast %410 : i32 to index
      %c6_209 = arith.constant 6 : index
      %c0_210 = arith.constant 0 : index
      %412 = vector.load %arg7[%411, %c6_209, %c0_210] : memref<30x27x128xf32, #tpu.memory_space<vmem>>, vector<8x16x128xf32>
      %c43 = arith.constant 43 : index
      %c0_211 = arith.constant 0 : index
      %413 = vector.load %arg2[%c43, %c0_211] : memref<49x128xf32, #tpu.memory_space<vmem>>, vector<1x128xf32>
      %414 = vector.shape_cast %413 : vector<1x128xf32> to vector<128xf32>
      %415 = vector.shape_cast %414 : vector<128xf32> to vector<1x1x128xf32>
      %416 = vector.broadcast %415 : vector<1x1x128xf32> to vector<8x16x128xf32>
      %417 = arith.mulf %412, %416 : vector<8x16x128xf32>
      %418 = arith.addf %409, %417 : vector<8x16x128xf32>
      %c6_i32_212 = arith.constant 6 : i32
      %419 = arith.addi %21, %c6_i32_212 : i32
      %420 = arith.index_cast %419 : i32 to index
      %c7_213 = arith.constant 7 : index
      %c0_214 = arith.constant 0 : index
      %421 = vector.load %arg7[%420, %c7_213, %c0_214] : memref<30x27x128xf32, #tpu.memory_space<vmem>>, vector<8x16x128xf32>
      %c44 = arith.constant 44 : index
      %c0_215 = arith.constant 0 : index
      %422 = vector.load %arg2[%c44, %c0_215] : memref<49x128xf32, #tpu.memory_space<vmem>>, vector<1x128xf32>
      %423 = vector.shape_cast %422 : vector<1x128xf32> to vector<128xf32>
      %424 = vector.shape_cast %423 : vector<128xf32> to vector<1x1x128xf32>
      %425 = vector.broadcast %424 : vector<1x1x128xf32> to vector<8x16x128xf32>
      %426 = arith.mulf %421, %425 : vector<8x16x128xf32>
      %427 = arith.addf %418, %426 : vector<8x16x128xf32>
      %c6_i32_216 = arith.constant 6 : i32
      %428 = arith.addi %21, %c6_i32_216 : i32
      %429 = arith.index_cast %428 : i32 to index
      %c8_217 = arith.constant 8 : index
      %c0_218 = arith.constant 0 : index
      %430 = vector.load %arg7[%429, %c8_217, %c0_218] : memref<30x27x128xf32, #tpu.memory_space<vmem>>, vector<8x16x128xf32>
      %c45 = arith.constant 45 : index
      %c0_219 = arith.constant 0 : index
      %431 = vector.load %arg2[%c45, %c0_219] : memref<49x128xf32, #tpu.memory_space<vmem>>, vector<1x128xf32>
      %432 = vector.shape_cast %431 : vector<1x128xf32> to vector<128xf32>
      %433 = vector.shape_cast %432 : vector<128xf32> to vector<1x1x128xf32>
      %434 = vector.broadcast %433 : vector<1x1x128xf32> to vector<8x16x128xf32>
      %435 = arith.mulf %430, %434 : vector<8x16x128xf32>
      %436 = arith.addf %427, %435 : vector<8x16x128xf32>
      %c6_i32_220 = arith.constant 6 : i32
      %437 = arith.addi %21, %c6_i32_220 : i32
      %438 = arith.index_cast %437 : i32 to index
      %c9_221 = arith.constant 9 : index
      %c0_222 = arith.constant 0 : index
      %439 = vector.load %arg7[%438, %c9_221, %c0_222] : memref<30x27x128xf32, #tpu.memory_space<vmem>>, vector<8x16x128xf32>
      %c46 = arith.constant 46 : index
      %c0_223 = arith.constant 0 : index
      %440 = vector.load %arg2[%c46, %c0_223] : memref<49x128xf32, #tpu.memory_space<vmem>>, vector<1x128xf32>
      %441 = vector.shape_cast %440 : vector<1x128xf32> to vector<128xf32>
      %442 = vector.shape_cast %441 : vector<128xf32> to vector<1x1x128xf32>
      %443 = vector.broadcast %442 : vector<1x1x128xf32> to vector<8x16x128xf32>
      %444 = arith.mulf %439, %443 : vector<8x16x128xf32>
      %445 = arith.addf %436, %444 : vector<8x16x128xf32>
      %c6_i32_224 = arith.constant 6 : i32
      %446 = arith.addi %21, %c6_i32_224 : i32
      %447 = arith.index_cast %446 : i32 to index
      %c10_225 = arith.constant 10 : index
      %c0_226 = arith.constant 0 : index
      %448 = vector.load %arg7[%447, %c10_225, %c0_226] : memref<30x27x128xf32, #tpu.memory_space<vmem>>, vector<8x16x128xf32>
      %c47 = arith.constant 47 : index
      %c0_227 = arith.constant 0 : index
      %449 = vector.load %arg2[%c47, %c0_227] : memref<49x128xf32, #tpu.memory_space<vmem>>, vector<1x128xf32>
      %450 = vector.shape_cast %449 : vector<1x128xf32> to vector<128xf32>
      %451 = vector.shape_cast %450 : vector<128xf32> to vector<1x1x128xf32>
      %452 = vector.broadcast %451 : vector<1x1x128xf32> to vector<8x16x128xf32>
      %453 = arith.mulf %448, %452 : vector<8x16x128xf32>
      %454 = arith.addf %445, %453 : vector<8x16x128xf32>
      %c6_i32_228 = arith.constant 6 : i32
      %455 = arith.addi %21, %c6_i32_228 : i32
      %456 = arith.index_cast %455 : i32 to index
      %c11_229 = arith.constant 11 : index
      %c0_230 = arith.constant 0 : index
      %457 = vector.load %arg7[%456, %c11_229, %c0_230] : memref<30x27x128xf32, #tpu.memory_space<vmem>>, vector<8x16x128xf32>
      %c48 = arith.constant 48 : index
      %c0_231 = arith.constant 0 : index
      %458 = vector.load %arg2[%c48, %c0_231] : memref<49x128xf32, #tpu.memory_space<vmem>>, vector<1x128xf32>
      %459 = vector.shape_cast %458 : vector<1x128xf32> to vector<128xf32>
      %460 = vector.shape_cast %459 : vector<128xf32> to vector<1x1x128xf32>
      %461 = vector.broadcast %460 : vector<1x1x128xf32> to vector<8x16x128xf32>
      %462 = arith.mulf %457, %461 : vector<8x16x128xf32>
      %463 = arith.addf %454, %462 : vector<8x16x128xf32>
      %464 = vector.shape_cast %18 : vector<128xf32> to vector<1x1x128xf32>
      %465 = vector.broadcast %464 : vector<1x1x128xf32> to vector<8x16x128xf32>
      %466 = arith.addf %463, %465 : vector<8x16x128xf32>
      %c0_232 = arith.constant 0 : index
      %467 = arith.index_cast %21 : i32 to index
      %c0_233 = arith.constant 0 : index
      %c0_234 = arith.constant 0 : index
      %468 = vector.load %arg4[%c0_232, %467, %c0_233, %c0_234] : memref<1x24x16x128xf32, #tpu.memory_space<vmem>>, vector<1x8x16x128xf32>
      %469 = vector.shape_cast %468 : vector<1x8x16x128xf32> to vector<8x16x128xf32>
      %470 = arith.mulf %466, %469 : vector<8x16x128xf32>
      %c0_235 = arith.constant 0 : index
      %471 = arith.index_cast %21 : i32 to index
      %c0_236 = arith.constant 0 : index
      %c0_237 = arith.constant 0 : index
      %472 = vector.load %arg6[%c0_235, %471, %c0_236, %c0_237] : memref<1x24x16x128xf32, #tpu.memory_space<vmem>>, vector<1x8x16x128xf32>
      %473 = vector.shape_cast %472 : vector<1x8x16x128xf32> to vector<8x16x128xf32>
      %474 = vector.shape_cast %470 : vector<8x16x128xf32> to vector<1x8x16x128xf32>
      tpu.vector_store %arg6[%c0_235, %471, %c0_236, %c0_237], %474 {strides = array<i32>} : memref<1x24x16x128xf32, #tpu.memory_space<vmem>>, vector<1x8x16x128xf32>,
    }
    %c3_i32_30 = arith.constant 3 : i32
    return
  }
  func.func @transform_0(%arg0: i32, %arg1: i32) -> (i32, i32) {
    %c0_i32 = arith.constant 0 : i32
    %c0_i32_0 = arith.constant 0 : i32
    return %c0_i32, %arg1 : i32, i32
  }
  func.func @transform_1(%arg0: i32, %arg1: i32) -> (i32, i32) {
    %c0_i32 = arith.constant 0 : i32
    %c0_i32_0 = arith.constant 0 : i32
    return %c0_i32, %arg1 : i32, i32
  }
  func.func @transform_2(%arg0: i32, %arg1: i32) -> (i32, i32, i32, i32) {
    %c0_i32 = arith.constant 0 : i32
    %c0_i32_0 = arith.constant 0 : i32
    %c0_i32_1 = arith.constant 0 : i32
    return %arg0, %c0_i32, %c0_i32_0, %arg1 : i32, i32, i32, i32
  }
  func.func @transform_3(%arg0: i32, %arg1: i32) -> (i32, i32, i32, i32) {
    %c0_i32 = arith.constant 0 : i32
    %c0_i32_0 = arith.constant 0 : i32
    %c0_i32_1 = arith.constant 0 : i32
    return %arg0, %c0_i32, %c0_i32_0, %arg1 : i32, i32, i32, i32
  }
  func.func @transform_4(%arg0: i32, %arg1: i32) -> (i32, i32, i32, i32) {
    %c0_i32 = arith.constant 0 : i32
    %c0_i32_0 = arith.constant 0 : i32
    %c0_i32_1 = arith.constant 0 : i32
    return %arg0, %c0_i32, %c0_i32_0, %arg1 : i32, i32, i32, i32
  }
}

</mosaic_0001>

<bundles_post_ra>
// kernel: tpu_custom_call.1
= control target key start
LH: loop header
LB: loop body
LE: loop exit
PB: predicated region body
PF: predicated region fallthrough
CT: control target
= control target key end

     0   :  { %9 = vsyncpa [#allocation4], 0  ;;  %s5923_s0 = inlined_call_operand.hbm [shape: f32[49,128], index: 0, kind: input, shape index: {}]   ;;  %s5924_s1 = inlined_call_operand.vmem [shape: f32[1,128], index: 1, kind: input, shape index: {}]   ;;  %s5925_s2 = inlined_call_operand.hbm [shape: f32[1,24,16,128], index: 2, kind: input, shape index: {}]   ;;  %s5926_s3 = inlined_call_operand.hbm [shape: f32[1,24,16,128], index: 3, kind: input, shape index: {}]   ;;  %s5927_s4 = inlined_call_operand.hbm [shape: f32[1,24,16,128], index: 4, kind: output, shape index: {}]  }
   0x1   :  { %10 = vsyncpa [#allocation7], 0 }
   0x2   :  { %11 = vsyncpa [#allocation5], 0  ;;  %s3858_s15 = smov [#allocation6]   ;;  %s3859_s17 = smov [#allocation3]  }
   0x3   :  { %s31_s16 = sshll.u32 %s3858_s15, 4  ;;  %s17_s18 = sshll.u32 %s3859_s17, 4  ;;  %s32_s16 = int_to_ptr.vmem [resolvable:$true] %s31_s16  ;;  %s3890_s18 = int_to_ptr.vmem [resolvable:$true] %s17_s18 }
   0x4   :  { %s3756_s21 = scalar_lea.hbm %s5925_s2, 6144 }
   0x5   :  { %p3757_p0 = scmp.ne.s32.totalorder %s5925_s2, %s3756_s21  ;;  %p3760_p1 = scmp.lt.u32.totalorder %s3756_s21, %s5925_s2 }
   0x7   :  { %p3762_p2 = pnand %p3760_p1, %p3757_p0 }
   0x9   :  { %3765 = shalt.err (!%p3762_p2)
}
   0xa   :  { %s3766_s26 = scalar_lea.vmem %s32_s16, 6144  ;;  %p3771_p4 = scmp.lt.s32.totalorder %s32_s16, %s32_s16 }
   0xb   :  { %p3767_p3 = scmp.ne.s32.totalorder %s32_s16, %s3766_s26  ;;  %p3772_p5 = scmp.lt.s32.totalorder %s3766_s26, %s3766_s26 }
   0xd   :  { %p3773_p6 = por %p3772_p5, %p3771_p4 }
   0xf   :  { %p3774_p7 = pnand %p3773_p6, %p3767_p3 }
  0x11   :  { %3777 = shalt.err (!%p3774_p7)
}
  0x12   :  { %s3860_s27 = smov 128   ;;  %s3861_s28 = smov 8  }
  0x13   :  { %37 = dma.hbm_to_vmem [thread:$0]  %s5925_s2, 6144, %s32_s16, [#allocation7], %s3860_s27, %s3860_s27, %s3861_s28  }
  0x14   :  { %s3778_s7 = scalar_lea.hbm %s5923_s0, 896 }
  0x15   :  { %p3779_p8 = scmp.ne.s32.totalorder %s5923_s0, %s3778_s7  ;;  %p3782_p9 = scmp.lt.u32.totalorder %s3778_s7, %s5923_s0 }
  0x17   :  { %p3784_p10 = pnand %p3782_p9, %p3779_p8 }
  0x19   :  { %3787 = shalt.err (!%p3784_p10)
}
  0x1a   :  { %s3788_s12 = scalar_lea.vmem %s3890_s18, 896  ;;  %p3793_p12 = scmp.lt.s32.totalorder %s3890_s18, %s3890_s18 }
  0x1b   :  { %p3789_p11 = scmp.ne.s32.totalorder %s3890_s18, %s3788_s12  ;;  %p3794_p13 = scmp.lt.s32.totalorder %s3788_s12, %s3788_s12 }
  0x1d   :  { %p3795_p0 = por %p3794_p13, %p3793_p12 }
  0x1f   :  { %p3796_p1 = pnand %p3795_p0, %p3789_p11 }
  0x21   :  { %3799 = shalt.err (!%p3796_p1)
}
  0x22   :  { %23 = dma.hbm_to_vmem [thread:$0]  %s5923_s0, 896, %s3890_s18, [#allocation4], %s3860_s27, %s3860_s27, %s3861_s28  }
  0x23   :  { %s3862_s14 = smov [#allocation8]   ;;  %s3800_s19 = scalar_lea.hbm %s5926_s3, 6144 }
  0x24   :  { %s43_s15 = sshll.u32 %s3862_s14, 4  ;;  %p3801_p2 = scmp.ne.s32.totalorder %s5926_s3, %s3800_s19  ;;  %s44_s15 = int_to_ptr.vmem [resolvable:$true] %s43_s15 }
  0x25   :  { %p3804_p3 = scmp.lt.u32.totalorder %s3800_s19, %s5926_s3 }
  0x27   :  { %p3806_p4 = pnand %p3804_p3, %p3801_p2 }
  0x29   :  { %3809 = shalt.err (!%p3806_p4)
}
  0x2a   :  { %s3810_s24 = scalar_lea.vmem %s44_s15, 6144  ;;  %p3815_p6 = scmp.lt.s32.totalorder %s44_s15, %s44_s15 }
  0x2b   :  { %p3811_p5 = scmp.ne.s32.totalorder %s44_s15, %s3810_s24  ;;  %p3816_p7 = scmp.lt.s32.totalorder %s3810_s24, %s3810_s24 }
  0x2d   :  { %p3817_p8 = por %p3816_p7, %p3815_p6 }
  0x2f   :  { %p3818_p9 = pnand %p3817_p8, %p3811_p5 }
  0x31   :  { %3821 = shalt.err (!%p3818_p9)
}
  0x32   :  { %49 = dma.hbm_to_vmem [thread:$0]  %s5926_s3, 6144, %s44_s15, [#allocation7], %s3860_s27, %s3860_s27, %s3861_s28  }
  0x33   :  { %3848 = dma.done.wait [#allocation4], 896  }
  0x34   :  { %3849 = vsyncadd [#allocation4], 4294966400 }
  0x35   :  { %3850 = dma.done.wait [#allocation7], 12288  }
  0x36   :  { %3851 = vsyncadd [#allocation7], 4294955008  ;;  %v3863_v0 = vmov 0.0   ;;  %v4023_v1 = vld [vmem:[%s5924_s1] ss:$0 sm:$0xff]  ;;  %v144_v2 = vld [vmem:[#allocation8] sm:$0xff] }
  0x37   :  { %60 = vst [vmem:[#allocation2 + $0x8] sm:$0xff] %v3863_v0  ;;  %61 = vst [vmem:[#allocation2 + $0x10] sm:$0xff] %v3863_v0  ;;  %v145_v3 = vld [vmem:[#allocation8 + $0x8] sm:$0xff]  ;;  %v146_v4 = vld [vmem:[#allocation8 + $0x10] sm:$0xff]  ;;  %s4025_s1 = smov 0  }
  0x38   :  { %62 = vst [vmem:[#allocation2 + $0x18] sm:$0x7] %v3863_v0  ;;  %64 = vst [vmem:[#allocation2 + $0x28] sm:$0xff] %v3863_v0  ;;  %v147_v5 = vld [vmem:[#allocation8 + $0x18] sm:$0xff]  ;;  %v148_v6 = vld [vmem:[#allocation8 + $0x20] sm:$0xff] }
  0x39   :  { %65 = vst [vmem:[#allocation2 + $0x30] sm:$0xff] %v3863_v0  ;;  %66 = vst [vmem:[#allocation2 + $0x38] sm:$0x7] %v3863_v0  ;;  %v149_v7 = vld [vmem:[#allocation8 + $0x28] sm:$0xff]  ;;  %v150_v8 = vld [vmem:[#allocation8 + $0x30] sm:$0xff] }
  0x3a   :  { %68 = vst [vmem:[#allocation2 + $0x48] sm:$0xff] %v3863_v0  ;;  %69 = vst [vmem:[#allocation2 + $0x50] sm:$0xff] %v3863_v0  ;;  %v151_v9 = vld [vmem:[#allocation8 + $0x38] sm:$0xff]  ;;  %v152_v10 = vld [vmem:[#allocation8 + $0x40] sm:$0xff] }
  0x3b   :  { %70 = vst [vmem:[#allocation2 + $0x58] sm:$0x7] %v3863_v0  ;;  %73 = vst [vmem:[#allocation2 + $0x368] sm:$0xff] %v3863_v0  ;;  %v153_v11 = vld [vmem:[#allocation8 + $0x48] sm:$0xff]  ;;  %v154_v12 = vld [vmem:[#allocation8 + $0x50] sm:$0xff] }
  0x3c   :  { %74 = vst [vmem:[#allocation2 + $0x370] sm:$0xff] %v3863_v0  ;;  %75 = vst [vmem:[#allocation2 + $0x378] sm:$0x7] %v3863_v0  ;;  %v155_v13 = vld [vmem:[#allocation8 + $0x58] sm:$0xff]  ;;  %v156_v14 = vld [vmem:[#allocation8 + $0x60] sm:$0xff] }
  0x3d   :  { %77 = vst [vmem:[#allocation2 + $0x388] sm:$0xff] %v3863_v0  ;;  %78 = vst [vmem:[#allocation2 + $0x390] sm:$0xff] %v3863_v0  ;;  %v157_v15 = vld [vmem:[#allocation8 + $0x68] sm:$0xff]  ;;  %v158_v16 = vld [vmem:[#allocation8 + $0x70] sm:$0xff] }
  0x3e   :  { %79 = vst [vmem:[#allocation2 + $0x398] sm:$0x7] %v3863_v0  ;;  %81 = vst [vmem:[#allocation2 + $0x3a8] sm:$0xff] %v3863_v0  ;;  %v159_v17 = vld [vmem:[#allocation8 + $0x78] sm:$0xff]  ;;  %v178_v18 = vld [vmem:[#allocation8 + $0x80] sm:$0xff] }
  0x3f   :  { %82 = vst [vmem:[#allocation2 + $0x3b0] sm:$0xff] %v3863_v0  ;;  %83 = vst [vmem:[#allocation2 + $0x3b8] sm:$0x7] %v3863_v0  ;;  %v179_v19 = vld [vmem:[#allocation8 + $0x88] sm:$0xff]  ;;  %v180_v20 = vld [vmem:[#allocation8 + $0x90] sm:$0xff] }
  0x40   :  { %84 = vst [vmem:[#allocation2] sm:$0xff] %v3863_v0  ;;  %87 = vst [vmem:[#allocation2 + $0x60] sm:$0xff] %v3863_v0  ;;  %v181_v21 = vld [vmem:[#allocation8 + $0x98] sm:$0xff]  ;;  %v182_v22 = vld [vmem:[#allocation8 + $0xa0] sm:$0xff] }
  0x41   :  { %88 = vst [vmem:[#allocation2 + $0x80] sm:$0xff] %v3863_v0  ;;  %89 = vst [vmem:[#allocation2 + $0xa0] sm:$0xff] %v3863_v0  ;;  %v183_v23 = vld [vmem:[#allocation8 + $0xa8] sm:$0xff]  ;;  %v184_v24 = vld [vmem:[#allocation8 + $0xb0] sm:$0xff] }
  0x42   :  { %90 = vst [vmem:[#allocation2 + $0xc0] sm:$0xff] %v3863_v0  ;;  %91 = vst [vmem:[#allocation2 + $0xe0] sm:$0xff] %v3863_v0  ;;  %v185_v25 = vld [vmem:[#allocation8 + $0xb8] sm:$0xff]  ;;  %v186_v26 = vld [vmem:[#allocation8 + $0xc0] sm:$0xff] }
  0x43   :  { %92 = vst [vmem:[#allocation2 + $0x100] sm:$0xff] %v3863_v0  ;;  %93 = vst [vmem:[#allocation2 + $0x120] sm:$0xff] %v3863_v0  ;;  %v187_v27 = vld [vmem:[#allocation8 + $0xc8] sm:$0xff]  ;;  %v188_v28 = vld [vmem:[#allocation8 + $0xd0] sm:$0xff] }
  0x44   :  { %94 = vst [vmem:[#allocation2 + $0x140] sm:$0xff] %v3863_v0  ;;  %95 = vst [vmem:[#allocation2 + $0x160] sm:$0xff] %v3863_v0  ;;  %v189_v29 = vld [vmem:[#allocation8 + $0xd8] sm:$0xff]  ;;  %v190_v30 = vld [vmem:[#allocation8 + $0xe0] sm:$0xff] }
  0x45   :  { %96 = vst [vmem:[#allocation2 + $0x180] sm:$0xff] %v3863_v0  ;;  %97 = vst [vmem:[#allocation2 + $0x1a0] sm:$0xff] %v3863_v0  ;;  %v191_v31 = vld [vmem:[#allocation8 + $0xe8] sm:$0xff]  ;;  %v192_v32 = vld [vmem:[#allocation8 + $0xf0] sm:$0xff] }
  0x46   :  { %98 = vst [vmem:[#allocation2 + $0x1c0] sm:$0xff] %v3863_v0  ;;  %99 = vst [vmem:[#allocation2 + $0x1e0] sm:$0xff] %v3863_v0  ;;  %v193_v33 = vld [vmem:[#allocation8 + $0xf8] sm:$0xff]  ;;  %v212_v34 = vld [vmem:[#allocation8 + $0x100] sm:$0xff] }
  0x47   :  { %100 = vst [vmem:[#allocation2 + $0x200] sm:$0xff] %v3863_v0  ;;  %101 = vst [vmem:[#allocation2 + $0x220] sm:$0xff] %v3863_v0  ;;  %v213_v35 = vld [vmem:[#allocation8 + $0x108] sm:$0xff]  ;;  %v214_v36 = vld [vmem:[#allocation8 + $0x110] sm:$0xff] }
  0x48   :  { %102 = vst [vmem:[#allocation2 + $0x240] sm:$0xff] %v3863_v0  ;;  %103 = vst [vmem:[#allocation2 + $0x260] sm:$0xff] %v3863_v0  ;;  %v215_v37 = vld [vmem:[#allocation8 + $0x118] sm:$0xff]  ;;  %v216_v38 = vld [vmem:[#allocation8 + $0x120] sm:$0xff] }
  0x49   :  { %104 = vst [vmem:[#allocation2 + $0x280] sm:$0xff] %v3863_v0  ;;  %105 = vst [vmem:[#allocation2 + $0x2a0] sm:$0xff] %v3863_v0  ;;  %v217_v39 = vld [vmem:[#allocation8 + $0x128] sm:$0xff]  ;;  %v218_v40 = vld [vmem:[#allocation8 + $0x130] sm:$0xff] }
  0x4a   :  { %106 = vst [vmem:[#allocation2 + $0x2c0] sm:$0xff] %v3863_v0  ;;  %107 = vst [vmem:[#allocation2 + $0x2e0] sm:$0xff] %v3863_v0  ;;  %v219_v41 = vld [vmem:[#allocation8 + $0x138] sm:$0xff]  ;;  %v220_v42 = vld [vmem:[#allocation8 + $0x140] sm:$0xff] }
  0x4b   :  { %108 = vst [vmem:[#allocation2 + $0x300] sm:$0xff] %v3863_v0  ;;  %109 = vst [vmem:[#allocation2 + $0x320] sm:$0xff] %v3863_v0  ;;  %v221_v43 = vld [vmem:[#allocation8 + $0x148] sm:$0xff]  ;;  %v222_v44 = vld [vmem:[#allocation8 + $0x150] sm:$0xff] }
  0x4c   :  { %110 = vst [vmem:[#allocation2 + $0x340] sm:$0xff] %v3863_v0  ;;  %117 = vst [vmem:[#allocation2 + $0x78] sm:$0x7] %v3863_v0  ;;  %v223_v45 = vld [vmem:[#allocation8 + $0x158] sm:$0xff]  ;;  %v224_v46 = vld [vmem:[#allocation8 + $0x160] sm:$0xff] }
  0x4d   :  { %118 = vst [vmem:[#allocation2 + $0x98] sm:$0x7] %v3863_v0  ;;  %119 = vst [vmem:[#allocation2 + $0xb8] sm:$0x7] %v3863_v0  ;;  %v225_v47 = vld [vmem:[#allocation8 + $0x168] sm:$0xff]  ;;  %v226_v48 = vld [vmem:[#allocation8 + $0x170] sm:$0xff] }
  0x4e   :  { %120 = vst [vmem:[#allocation2 + $0xd8] sm:$0x7] %v3863_v0  ;;  %121 = vst [vmem:[#allocation2 + $0xf8] sm:$0x7] %v3863_v0  ;;  %v227_v49 = vld [vmem:[#allocation8 + $0x178] sm:$0xff] }
  0x4f   :  { %122 = vst [vmem:[#allocation2 + $0x118] sm:$0x7] %v3863_v0  ;;  %123 = vst [vmem:[#allocation2 + $0x138] sm:$0x7] %v3863_v0 }
  0x50   :  { %124 = vst [vmem:[#allocation2 + $0x158] sm:$0x7] %v3863_v0  ;;  %125 = vst [vmem:[#allocation2 + $0x178] sm:$0x7] %v3863_v0 }
  0x51   :  { %126 = vst [vmem:[#allocation2 + $0x198] sm:$0x7] %v3863_v0  ;;  %127 = vst [vmem:[#allocation2 + $0x1b8] sm:$0x7] %v3863_v0 }
  0x52   :  { %128 = vst [vmem:[#allocation2 + $0x1d8] sm:$0x7] %v3863_v0  ;;  %129 = vst [vmem:[#allocation2 + $0x1f8] sm:$0x7] %v3863_v0 }
  0x53   :  { %130 = vst [vmem:[#allocation2 + $0x218] sm:$0x7] %v3863_v0  ;;  %131 = vst [vmem:[#allocation2 + $0x238] sm:$0x7] %v3863_v0 }
  0x54   :  { %132 = vst [vmem:[#allocation2 + $0x258] sm:$0x7] %v3863_v0  ;;  %133 = vst [vmem:[#allocation2 + $0x278] sm:$0x7] %v3863_v0 }
  0x55   :  { %134 = vst [vmem:[#allocation2 + $0x298] sm:$0x7] %v3863_v0  ;;  %135 = vst [vmem:[#allocation2 + $0x2b8] sm:$0x7] %v3863_v0 }
  0x56   :  { %136 = vst [vmem:[#allocation2 + $0x2d8] sm:$0x7] %v3863_v0  ;;  %137 = vst [vmem:[#allocation2 + $0x2f8] sm:$0x7] %v3863_v0 }
  0x57   :  { %138 = vst [vmem:[#allocation2 + $0x318] sm:$0x7] %v3863_v0  ;;  %139 = vst [vmem:[#allocation2 + $0x338] sm:$0x7] %v3863_v0 }
  0x58   :  { %140 = vst [vmem:[#allocation2 + $0x358] sm:$0x7] %v3863_v0  ;;  %85 = vst [vmem:[#allocation2 + $0x20] sm:$0xff] %v3863_v0 }
  0x59   :  { %86 = vst [vmem:[#allocation2 + $0x40] sm:$0xff] %v3863_v0  ;;  %111 = vst [vmem:[#allocation2 + $0x360] sm:$0xff] %v3863_v0 }
  0x5a   :  { %112 = vst [vmem:[#allocation2 + $0x380] sm:$0xff] %v3863_v0  ;;  %113 = vst [vmem:[#allocation2 + $0x3a0] sm:$0xff] %v3863_v0 }
  0x5b   :  { %114 = vst [vmem:[#allocation2 + $0x18] sm:$0x7] %v3863_v0  ;;  %115 = vst [vmem:[#allocation2 + $0x38] sm:$0x7] %v3863_v0 }
  0x5c   :  { %116 = vst [vmem:[#allocation2 + $0x58] sm:$0x7] %v3863_v0  ;;  %141 = vst [vmem:[#allocation2 + $0x378] sm:$0x7] %v3863_v0 }
  0x5d   :  { %142 = vst [vmem:[#allocation2 + $0x398] sm:$0x7] %v3863_v0  ;;  %143 = vst [vmem:[#allocation2 + $0x3b8] sm:$0x7] %v3863_v0 }
  0x5e   :  { %6168 = vst [vmem:[#allocation13_spill] sm:$0xff] %v4023_v1  ;;  %161 = vst [vmem:[#allocation2 + $0x68] sm:$0xff] %v144_v2 }
  0x5f   :  { %162 = vst [vmem:[#allocation2 + $0x70] sm:$0xff] %v145_v3  ;;  %163 = vst [vmem:[#allocation2 + $0x88] sm:$0xff] %v146_v4 }
  0x60   :  { %164 = vst [vmem:[#allocation2 + $0x90] sm:$0xff] %v147_v5  ;;  %165 = vst [vmem:[#allocation2 + $0xa8] sm:$0xff] %v148_v6 }
  0x61   :  { %166 = vst [vmem:[#allocation2 + $0xb0] sm:$0xff] %v149_v7  ;;  %167 = vst [vmem:[#allocation2 + $0xc8] sm:$0xff] %v150_v8 }
  0x62   :  { %168 = vst [vmem:[#allocation2 + $0xd0] sm:$0xff] %v151_v9  ;;  %169 = vst [vmem:[#allocation2 + $0xe8] sm:$0xff] %v152_v10 }
  0x63   :  { %170 = vst [vmem:[#allocation2 + $0xf0] sm:$0xff] %v153_v11  ;;  %171 = vst [vmem:[#allocation2 + $0x108] sm:$0xff] %v154_v12 }
  0x64   :  { %172 = vst [vmem:[#allocation2 + $0x110] sm:$0xff] %v155_v13  ;;  %173 = vst [vmem:[#allocation2 + $0x128] sm:$0xff] %v156_v14 }
  0x65   :  { %174 = vst [vmem:[#allocation2 + $0x130] sm:$0xff] %v157_v15  ;;  %175 = vst [vmem:[#allocation2 + $0x148] sm:$0xff] %v158_v16 }
  0x66   :  { %176 = vst [vmem:[#allocation2 + $0x150] sm:$0xff] %v159_v17  ;;  %195 = vst [vmem:[#allocation2 + $0x168] sm:$0xff] %v178_v18 }
  0x67   :  { %196 = vst [vmem:[#allocation2 + $0x170] sm:$0xff] %v179_v19  ;;  %197 = vst [vmem:[#allocation2 + $0x188] sm:$0xff] %v180_v20 }
  0x68   :  { %198 = vst [vmem:[#allocation2 + $0x190] sm:$0xff] %v181_v21  ;;  %199 = vst [vmem:[#allocation2 + $0x1a8] sm:$0xff] %v182_v22 }
  0x69   :  { %200 = vst [vmem:[#allocation2 + $0x1b0] sm:$0xff] %v183_v23  ;;  %201 = vst [vmem:[#allocation2 + $0x1c8] sm:$0xff] %v184_v24 }
  0x6a   :  { %202 = vst [vmem:[#allocation2 + $0x1d0] sm:$0xff] %v185_v25  ;;  %203 = vst [vmem:[#allocation2 + $0x1e8] sm:$0xff] %v186_v26 }
  0x6b   :  { %204 = vst [vmem:[#allocation2 + $0x1f0] sm:$0xff] %v187_v27  ;;  %205 = vst [vmem:[#allocation2 + $0x208] sm:$0xff] %v188_v28 }
  0x6c   :  { %206 = vst [vmem:[#allocation2 + $0x210] sm:$0xff] %v189_v29  ;;  %207 = vst [vmem:[#allocation2 + $0x228] sm:$0xff] %v190_v30 }
  0x6d   :  { %208 = vst [vmem:[#allocation2 + $0x230] sm:$0xff] %v191_v31  ;;  %209 = vst [vmem:[#allocation2 + $0x248] sm:$0xff] %v192_v32 }
  0x6e   :  { %210 = vst [vmem:[#allocation2 + $0x250] sm:$0xff] %v193_v33  ;;  %229 = vst [vmem:[#allocation2 + $0x268] sm:$0xff] %v212_v34 }
  0x6f   :  { %230 = vst [vmem:[#allocation2 + $0x270] sm:$0xff] %v213_v35  ;;  %231 = vst [vmem:[#allocation2 + $0x288] sm:$0xff] %v214_v36 }
  0x70   :  { %232 = vst [vmem:[#allocation2 + $0x290] sm:$0xff] %v215_v37  ;;  %233 = vst [vmem:[#allocation2 + $0x2a8] sm:$0xff] %v216_v38 }
  0x71   :  { %234 = vst [vmem:[#allocation2 + $0x2b0] sm:$0xff] %v217_v39  ;;  %235 = vst [vmem:[#allocation2 + $0x2c8] sm:$0xff] %v218_v40 }
  0x72   :  { %236 = vst [vmem:[#allocation2 + $0x2d0] sm:$0xff] %v219_v41  ;;  %237 = vst [vmem:[#allocation2 + $0x2e8] sm:$0xff] %v220_v42 }
  0x73   :  { %238 = vst [vmem:[#allocation2 + $0x2f0] sm:$0xff] %v221_v43  ;;  %239 = vst [vmem:[#allocation2 + $0x308] sm:$0xff] %v222_v44 }
  0x74   :  { %240 = vst [vmem:[#allocation2 + $0x310] sm:$0xff] %v223_v45  ;;  %241 = vst [vmem:[#allocation2 + $0x328] sm:$0xff] %v224_v46 }
  0x75   :  { %242 = vst [vmem:[#allocation2 + $0x330] sm:$0xff] %v225_v47  ;;  %243 = vst [vmem:[#allocation2 + $0x348] sm:$0xff] %v226_v48 }
  0x76   :  { %244 = vst [vmem:[#allocation2 + $0x350] sm:$0xff] %v227_v49 }
  0x77 LB: > { %s3733_s26 = sshll.u32 %s3856_s1, 8  ;;  %v2998_v50 = vld [vmem:[#allocation3] ss:$0 sm:$0xff]  ;;  %v4031_v51 = vld [vmem:[#allocation3 + $0x7] ss:$0 sm:$0xff]  ;;  %s3740_s30 = sshll.u32 %s3856_s1, 7  ;;  %s3856_s1 = sphi %s4025_s1, %s251_s1  }
  0x78   : > { %s4033_s29 = scalar_lea.vmem [#allocation2], %s3733_s26  ;;  %v4043_v61 = vld [vmem:[#allocation3 + $0x1] ss:$0 sm:$0xff]  ;;  %s5869_s5 = scalar_lea.vmem [#allocation6], %s3740_s30 }
  0x79   : > { %s2926_s6 = scalar_lea.vmem [#allocation9], %s3740_s30  ;;  %s251_s1 = sadd.s32 1, %s3856_s1  }
  0x7a   : > { %p248_p10 = scmp.ge.s32.totalorder %s251_s1, 3  }
  0x7b   :  { %s3864_s7 = smov (%p248_p10), [#allocation9]  }
  0x7c   :  { %s2948_s8 = sshll.u32 (%p248_p10), %s3864_s7, 4  ;;  %s2949_s8 = int_to_ptr.vmem [resolvable:$true] %s2948_s8 }
  0x7d   : > { %v255_v52 = vld [vmem:[%s4033_s29 + $0x5] sm:$0xff]  ;;  %v256_v53 = vld [vmem:[%s4033_s29 + $0xd] sm:$0xff]  ;;  %s3822_s9 = scalar_lea.vmem (%p248_p10), %s2949_s8, 6144  ;;  %p3827_p12 = scmp.lt.s32.totalorder (%p248_p10), %s2949_s8, %s2949_s8 }
  0x7e   : > { %v257_v54 = vld [vmem:[%s4033_s29 + $0x25] sm:$0xff]  ;;  %v258_v55 = vld [vmem:[%s4033_s29 + $0x2d] sm:$0xff]  ;;  %v276_v58 = vmul.f32 %v2998_v50, %v255_v52  ;;  %v277_v59 = vmul.f32 %v2998_v50, %v256_v53  ;;  %p3823_p11 = scmp.ne.s32.totalorder (%p248_p10), %s2949_s8, %s3822_s9  ;;  %p3828_p13 = scmp.lt.s32.totalorder (%p248_p10), %s3822_s9, %s3822_s9 }
  0x7f   : > { %v259_v56 = vld [vmem:[%s4033_s29 + $0x45] sm:$0xff]  ;;  %v260_v57 = vld [vmem:[%s4033_s29 + $0x4d] sm:$0xff]  ;;  %v4041_v60 = vmul.f32 %v2998_v50, %v257_v54  ;;  %v4046_v62 = vmul.f32 %v4031_v51, %v257_v54  ;;  %v4051_v3 = vmul.f32 %v2998_v50, %v258_v55  ;;  %v4058_v6 = vmul.f32 %v4031_v51, %v258_v55 }
  0x80   : > { %v261_v63 = vld [vmem:[%s4033_s29 + $0x65] sm:$0xff]  ;;  %v262_v0 = vld [vmem:[%s4033_s29 + $0x6d] sm:$0xff]  ;;  %v4053_v4 = vmul.f32 %v2998_v50, %v259_v56  ;;  %v4055_v5 = vmul.f32 %v2998_v50, %v260_v57  ;;  %v4070_v13 = vmul.f32 %v4031_v51, %v259_v56  ;;  %v4085_v20 = vmul.f32 %v4031_v51, %v260_v57  ;;  %v3000_v57 = vld [vmem:[#allocation3 + $0x2] ss:$0 sm:$0xff]  ;;  %p3829_p0 = por (%p248_p10), %p3828_p13, %p3827_p12 }
  0x81   : > { %v263_v2 = vld [vmem:[%s4033_s29 + $0x85] sm:$0xff]  ;;  %v4061_v7 = vld [vmem:[%s4033_s29 + $0x8d] sm:$0xff]  ;;  %v282_v10 = vmul.f32 %v2998_v50, %v261_v63  ;;  %v283_v11 = vmul.f32 %v2998_v50, %v262_v0  ;;  %v4096_v27 = vmul.f32 %v4031_v51, %v261_v63  ;;  %v4111_v34 = vmul.f32 %v4031_v51, %v262_v0 }
  0x82   : > { %v4064_v8 = vld [vmem:[%s4033_s29 + $0xa5] sm:$0xff]  ;;  %v4067_v9 = vld [vmem:[%s4033_s29 + $0xad] sm:$0xff]  ;;  %v284_v12 = vmul.f32 %v2998_v50, %v263_v2  ;;  %v285_v17 = vmul.f32 %v2998_v50, %v4061_v7  ;;  %v4129_v41 = vmul.f32 %v4031_v51, %v263_v2  ;;  %p3830_p1 = pnand (%p248_p10), %p3829_p0, %p3823_p11 }
  0x83   : > { %v4073_v14 = vld [vmem:[%s4033_s29 + $0xc5] sm:$0xff]  ;;  %v4076_v15 = vld [vmem:[%s4033_s29 + $0xcd] sm:$0xff]  ;;  %v286_v18 = vmul.f32 %v2998_v50, %v4064_v8  ;;  %v287_v19 = vmul.f32 %v2998_v50, %v4067_v9  ;;  %6172 = vst [vmem:[#allocation17_spill] sm:$0xff] %v4111_v34 }
  0x84   : > { %v4079_v16 = vld [vmem:[%s4033_s29 + $0xe5] sm:$0xff]  ;;  %v4088_v21 = vld [vmem:[%s4033_s29 + $0xed] sm:$0xff]  ;;  %v288_v22 = vmul.f32 %v2998_v50, %v4073_v14  ;;  %v289_v23 = vmul.f32 %v2998_v50, %v4076_v15  ;;  %6176 = vst [vmem:[#allocation21_spill] sm:$0xff] %v4129_v41 }
  0x85   : > { %v290_v24 = vmul.f32 %v2998_v50, %v4079_v16  ;;  %v308_v25 = vld [vmem:[%s4033_s29 + $0x6] sm:$0xff]  ;;  %v309_v26 = vld [vmem:[%s4033_s29 + $0xe] sm:$0xff]  ;;  %v291_v28 = vmul.f32 %v2998_v50, %v4088_v21 }
  0x86   : > { %v4100_v29 = vld [vmem:[%s4033_s29 + $0x26] sm:$0xff]  ;;  %v4103_v30 = vld [vmem:[%s4033_s29 + $0x2e] sm:$0xff]  ;;  %v329_v32 = vmul.f32 %v4043_v61, %v308_v25  ;;  %v330_v33 = vmul.f32 %v4043_v61, %v309_v26 }
  0x87   : > { %6169 = vst [vmem:[#allocation14_spill] sm:$0xff] %v4100_v29  ;;  %6170 = vst [vmem:[#allocation15_spill] sm:$0xff] %v4103_v30  ;;  %v4106_v31 = vld [vmem:[%s4033_s29 + $0x46] sm:$0xff]  ;;  %v4114_v35 = vld [vmem:[%s4033_s29 + $0x4e] sm:$0xff]  ;;  %v331_v38 = vmul.f32 %v4043_v61, %v4100_v29  ;;  %v332_v39 = vmul.f32 %v4043_v61, %v4103_v30 }
  0x88   : > { %6171 = vst [vmem:[#allocation16_spill] sm:$0xff] %v4106_v31  ;;  %6173 = vst [vmem:[#allocation18_spill] sm:$0xff] %v4114_v35  ;;  %v4117_v36 = vld [vmem:[%s4033_s29 + $0x66] sm:$0xff]  ;;  %v4120_v37 = vld [vmem:[%s4033_s29 + $0x6e] sm:$0xff]  ;;  %v333_v40 = vmul.f32 %v4043_v61, %v4106_v31  ;;  %v334_v45 = vmul.f32 %v4043_v61, %v4114_v35  ;;  %v345_v48 = vadd.f32 %v329_v32, %v276_v58 }
  0x89   : > { %6174 = vst [vmem:[#allocation19_spill] sm:$0xff] %v4117_v36  ;;  %6175 = vst [vmem:[#allocation20_spill] sm:$0xff] %v4120_v37  ;;  %v4132_v42 = vld [vmem:[%s4033_s29 + $0x86] sm:$0xff]  ;;  %v4135_v43 = vld [vmem:[%s4033_s29 + $0x8e] sm:$0xff]  ;;  %v335_v46 = vmul.f32 %v4043_v61, %v4117_v36  ;;  %v336_v47 = vmul.f32 %v4043_v61, %v4120_v37  ;;  %v346_v56 = vadd.f32 %v330_v33, %v277_v59 }
  0x8a   : > { %6177 = vst [vmem:[#allocation22_spill] sm:$0xff] %v4132_v42  ;;  %6178 = vst [vmem:[#allocation23_spill] sm:$0xff] %v4135_v43  ;;  %v4138_v44 = vld [vmem:[%s4033_s29 + $0xa6] sm:$0xff]  ;;  %v4147_v49 = vld [vmem:[%s4033_s29 + $0xae] sm:$0xff]  ;;  %v337_v53 = vmul.f32 %v4043_v61, %v4132_v42  ;;  %v338_v54 = vmul.f32 %v4043_v61, %v4135_v43  ;;  %v347_v26 = vadd.f32 %v331_v38, %v4041_v60 }
  0x8b   : > { %6179 = vst [vmem:[#allocation24_spill] sm:$0xff] %v4138_v44  ;;  %6180 = vst [vmem:[#allocation25_spill] sm:$0xff] %v4147_v49  ;;  %v4150_v50 = vld [vmem:[%s4033_s29 + $0xc6] sm:$0xff]  ;;  %v4153_v52 = vld [vmem:[%s4033_s29 + $0xce] sm:$0xff]  ;;  %v339_v55 = vmul.f32 %v4043_v61, %v4138_v44  ;;  %v340_v0 = vmul.f32 %v4043_v61, %v4147_v49  ;;  %v348_v1 = vadd.f32 %v332_v39, %v4051_v3 }
  0x8c   : > { %6181 = vst [vmem:[#allocation26_spill] sm:$0xff] %v4150_v50  ;;  %6182 = vst [vmem:[#allocation27_spill] sm:$0xff] %v4153_v52  ;;  %v4162_v58 = vld [vmem:[%s4033_s29 + $0xe6] sm:$0xff]  ;;  %v4165_v63 = vld [vmem:[%s4033_s29 + $0xee] sm:$0xff]  ;;  %v341_v2 = vmul.f32 %v4043_v61, %v4150_v50  ;;  %v342_v25 = vmul.f32 %v4043_v61, %v4153_v52  ;;  %v349_v49 = vadd.f32 %v333_v40, %v4053_v4 }
  0x8d   : > { %6183 = vst [vmem:[#allocation28_spill] sm:$0xff] %v4162_v58  ;;  %6184 = vst [vmem:[#allocation29_spill] sm:$0xff] %v4165_v63  ;;  %v361_v59 = vld [vmem:[%s4033_s29 + $0x7] sm:$0xff]  ;;  %v343_v32 = vmul.f32 %v4043_v61, %v4162_v58  ;;  %v344_v33 = vmul.f32 %v4043_v61, %v4165_v63  ;;  %v362_v50 = vld [vmem:[%s4033_s29 + $0xf] sm:$0xff]  ;;  %v350_v60 = vadd.f32 %v334_v45, %v4055_v5 }
  0x8e   : > { %v4183_v44 = vld [vmem:[%s4033_s29 + $0x27] sm:$0xff]  ;;  %v4186_v52 = vld [vmem:[%s4033_s29 + $0x2f] sm:$0xff]  ;;  %v351_v38 = vadd.f32 %v335_v46, %v282_v10  ;;  %v352_v58 = vadd.f32 %v336_v47, %v283_v11  ;;  %v353_v43 = vadd.f32 %v337_v53, %v284_v12  ;;  %v354_v39 = vadd.f32 %v338_v54, %v285_v17 }
  0x8f   : > { %6185 = vst [vmem:[#allocation30_spill] sm:$0xff] %v4183_v44  ;;  %6186 = vst [vmem:[#allocation31_spill] sm:$0xff] %v4186_v52  ;;  %v4190_v61 = vld [vmem:[%s4033_s29 + $0x47] sm:$0xff]  ;;  %v4193_v3 = vld [vmem:[%s4033_s29 + $0x4f] sm:$0xff]  ;;  %v355_v40 = vadd.f32 %v339_v55, %v286_v18  ;;  %v356_v63 = vadd.f32 %v340_v0, %v287_v19  ;;  %v357_v42 = vadd.f32 %v341_v2, %v288_v22 }
  0x90   : > { %6187 = vst [vmem:[#allocation32_spill] sm:$0xff] %v4190_v61  ;;  %6188 = vst [vmem:[#allocation33_spill] sm:$0xff] %v4193_v3  ;;  %v4196_v4 = vld [vmem:[%s4033_s29 + $0x67] sm:$0xff]  ;;  %v4199_v5 = vld [vmem:[%s4033_s29 + $0x6f] sm:$0xff]  ;;  %v358_v12 = vadd.f32 %v342_v25, %v289_v23  ;;  %v359_v45 = vadd.f32 %v343_v32, %v290_v24  ;;  %v360_v46 = vadd.f32 %v344_v33, %v291_v28 }
  0x91   : > { %6189 = vst [vmem:[#allocation34_spill] sm:$0xff] %v4196_v4  ;;  %6190 = vst [vmem:[#allocation35_spill] sm:$0xff] %v4199_v5  ;;  %v4202_v10 = vld [vmem:[%s4033_s29 + $0x87] sm:$0xff]  ;;  %v4205_v11 = vld [vmem:[%s4033_s29 + $0x8f] sm:$0xff]  ;;  %v382_v17 = vmul.f32 %v3000_v57, %v361_v59  ;;  %v383_v22 = vmul.f32 %v3000_v57, %v362_v50  ;;  %v384_v55 = vmul.f32 %v3000_v57, %v4183_v44 }
  0x92   : > { %6191 = vst [vmem:[#allocation36_spill] sm:$0xff] %v4202_v10  ;;  %6192 = vst [vmem:[#allocation37_spill] sm:$0xff] %v4205_v11  ;;  %v4208_v47 = vld [vmem:[%s4033_s29 + $0xa7] sm:$0xff]  ;;  %v4211_v53 = vld [vmem:[%s4033_s29 + $0xaf] sm:$0xff]  ;;  %v385_v23 = vmul.f32 %v3000_v57, %v4186_v52  ;;  %v386_v24 = vmul.f32 %v3000_v57, %v4190_v61  ;;  %v387_v28 = vmul.f32 %v3000_v57, %v4193_v3 }
  0x93   : > { %6193 = vst [vmem:[#allocation38_spill] sm:$0xff] %v4208_v47  ;;  %6194 = vst [vmem:[#allocation39_spill] sm:$0xff] %v4211_v53  ;;  %v4214_v37 = vld [vmem:[%s4033_s29 + $0xc7] sm:$0xff]  ;;  %v4217_v54 = vld [vmem:[%s4033_s29 + $0xcf] sm:$0xff]  ;;  %v388_v0 = vmul.f32 %v3000_v57, %v4196_v4  ;;  %v389_v2 = vmul.f32 %v3000_v57, %v4199_v5  ;;  %v390_v25 = vmul.f32 %v3000_v57, %v4202_v10 }
  0x94   : > { %6195 = vst [vmem:[#allocation40_spill] sm:$0xff] %v4214_v37  ;;  %6196 = vst [vmem:[#allocation41_spill] sm:$0xff] %v4217_v54  ;;  %v4220_v18 = vld [vmem:[%s4033_s29 + $0xe7] sm:$0xff]  ;;  %v4223_v19 = vld [vmem:[%s4033_s29 + $0xef] sm:$0xff]  ;;  %v391_v59 = vmul.f32 %v3000_v57, %v4205_v11  ;;  %v392_v50 = vmul.f32 %v3000_v57, %v4208_v47  ;;  %v393_v32 = vmul.f32 %v3000_v57, %v4211_v53 }
  0x95   : > { %6197 = vst [vmem:[#allocation42_spill] sm:$0xff] %v4220_v18  ;;  %6198 = vst [vmem:[#allocation43_spill] sm:$0xff] %v4223_v19  ;;  %v394_v33 = vmul.f32 %v3000_v57, %v4214_v37  ;;  %v395_v61 = vmul.f32 %v3000_v57, %v4217_v54  ;;  %v396_v3 = vmul.f32 %v3000_v57, %v4220_v18  ;;  %v414_v10 = vld [vmem:[%s4033_s29 + $0x8] sm:$0xff]  ;;  %v3001_v52 = vld [vmem:[#allocation3 + $0x3] ss:$0 sm:$0xff] }
  0x96   : > { %v397_v5 = vmul.f32 %v3000_v57, %v4223_v19  ;;  %v398_v4 = vadd.f32 %v382_v17, %v345_v48  ;;  %v399_v11 = vadd.f32 %v383_v22, %v346_v56  ;;  %v400_v44 = vadd.f32 %v384_v55, %v347_v26  ;;  %v415_v53 = vld [vmem:[%s4033_s29 + $0x10] sm:$0xff]  ;;  %v4242_v37 = vld [vmem:[%s4033_s29 + $0x28] sm:$0xff] }
  0x97   : > { %v401_v36 = vadd.f32 %v385_v23, %v348_v1  ;;  %v402_v47 = vadd.f32 %v386_v24, %v349_v49  ;;  %6199 = vst [vmem:[#allocation44_spill] sm:$0xff] %v4242_v37  ;;  %v4245_v54 = vld [vmem:[%s4033_s29 + $0x30] sm:$0xff]  ;;  %v403_v18 = vadd.f32 %v387_v28, %v350_v60  ;;  %v404_v35 = vadd.f32 %v388_v0, %v351_v38  ;;  %v4248_v17 = vld [vmem:[%s4033_s29 + $0x48] sm:$0xff] }
  0x98   : > { %6200 = vst [vmem:[#allocation45_spill] sm:$0xff] %v4245_v54  ;;  %v405_v57 = vadd.f32 %v389_v2, %v352_v58  ;;  %v406_v48 = vadd.f32 %v390_v25, %v353_v43  ;;  %6201 = vst [vmem:[#allocation46_spill] sm:$0xff] %v4248_v17  ;;  %v4251_v56 = vld [vmem:[%s4033_s29 + $0x50] sm:$0xff]  ;;  %v4254_v1 = vld [vmem:[%s4033_s29 + $0x68] sm:$0xff]  ;;  %v407_v49 = vadd.f32 %v391_v59, %v354_v39 }
  0x99   : > { %6202 = vst [vmem:[#allocation47_spill] sm:$0xff] %v4251_v56  ;;  %6203 = vst [vmem:[#allocation48_spill] sm:$0xff] %v4254_v1  ;;  %v408_v26 = vadd.f32 %v392_v50, %v355_v40  ;;  %v409_v22 = vadd.f32 %v393_v32, %v356_v63  ;;  %v410_v55 = vadd.f32 %v394_v33, %v357_v42  ;;  %v4257_v60 = vld [vmem:[%s4033_s29 + $0x70] sm:$0xff]  ;;  %v4260_v38 = vld [vmem:[%s4033_s29 + $0x88] sm:$0xff] }
  0x9a   : > { %6204 = vst [vmem:[#allocation49_spill] sm:$0xff] %v4257_v60  ;;  %6205 = vst [vmem:[#allocation50_spill] sm:$0xff] %v4260_v38  ;;  %v4263_v58 = vld [vmem:[%s4033_s29 + $0x90] sm:$0xff]  ;;  %v411_v43 = vadd.f32 %v395_v61, %v358_v12  ;;  %v412_v23 = vadd.f32 %v396_v3, %v359_v45  ;;  %v413_v24 = vadd.f32 %v397_v5, %v360_v46  ;;  %v4266_v28 = vld [vmem:[%s4033_s29 + $0xa8] sm:$0xff] }
  0x9b   : > { %6206 = vst [vmem:[#allocation51_spill] sm:$0xff] %v4263_v58  ;;  %6207 = vst [vmem:[#allocation52_spill] sm:$0xff] %v4266_v28  ;;  %v4269_v0 = vld [vmem:[%s4033_s29 + $0xb0] sm:$0xff]  ;;  %v4272_v2 = vld [vmem:[%s4033_s29 + $0xc8] sm:$0xff]  ;;  %v435_v39 = vmul.f32 %v3001_v52, %v414_v10  ;;  %v436_v40 = vmul.f32 %v3001_v52, %v415_v53  ;;  %v437_v59 = vmul.f32 %v3001_v52, %v4242_v37 }
  0x9c   : > { %6208 = vst [vmem:[#allocation53_spill] sm:$0xff] %v4269_v0  ;;  %6209 = vst [vmem:[#allocation54_spill] sm:$0xff] %v4272_v2  ;;  %v4275_v25 = vld [vmem:[%s4033_s29 + $0xd0] sm:$0xff]  ;;  %v4278_v63 = vld [vmem:[%s4033_s29 + $0xe8] sm:$0xff]  ;;  %v438_v61 = vmul.f32 %v3001_v52, %v4245_v54  ;;  %v439_v3 = vmul.f32 %v3001_v52, %v4248_v17  ;;  %v440_v5 = vmul.f32 %v3001_v52, %v4251_v56 }
  0x9d   : > { %6210 = vst [vmem:[#allocation55_spill] sm:$0xff] %v4275_v25  ;;  %6211 = vst [vmem:[#allocation56_spill] sm:$0xff] %v4278_v63  ;;  %v4281_v42 = vld [vmem:[%s4033_s29 + $0xf0] sm:$0xff]  ;;  %v441_v12 = vmul.f32 %v3001_v52, %v4254_v1  ;;  %v442_v10 = vmul.f32 %v3001_v52, %v4257_v60  ;;  %v443_v45 = vmul.f32 %v3001_v52, %v4260_v38  ;;  %v3002_v17 = vld [vmem:[#allocation3 + $0x4] ss:$0 sm:$0xff] }
  0x9e   : > { %6212 = vst [vmem:[#allocation57_spill] sm:$0xff] %v4281_v42  ;;  %v444_v46 = vmul.f32 %v3001_v52, %v4263_v58  ;;  %v445_v53 = vmul.f32 %v3001_v52, %v4266_v28  ;;  %v446_v50 = vmul.f32 %v3001_v52, %v4269_v0  ;;  %v447_v32 = vmul.f32 %v3001_v52, %v4272_v2  ;;  %v467_v38 = vld [vmem:[%s4033_s29 + $0x9] sm:$0xff]  ;;  %v468_v0 = vld [vmem:[%s4033_s29 + $0x11] sm:$0xff] }
  0x9f   : > { %v448_v33 = vmul.f32 %v3001_v52, %v4275_v25  ;;  %v449_v56 = vmul.f32 %v3001_v52, %v4278_v63  ;;  %v450_v60 = vmul.f32 %v3001_v52, %v4281_v42  ;;  %v451_v1 = vadd.f32 %v435_v39, %v398_v4  ;;  %v4300_v2 = vld [vmem:[%s4033_s29 + $0x29] sm:$0xff]  ;;  %v4303_v25 = vld [vmem:[%s4033_s29 + $0x31] sm:$0xff] }
  0xa0   : > { %v452_v58 = vadd.f32 %v436_v40, %v399_v11  ;;  %v453_v54 = vadd.f32 %v437_v59, %v400_v44  ;;  %v454_v37 = vadd.f32 %v438_v61, %v401_v36  ;;  %v455_v28 = vadd.f32 %v439_v3, %v402_v47  ;;  %6213 = vst [vmem:[#allocation58_spill] sm:$0xff] %v4300_v2  ;;  %v4306_v39 = vld [vmem:[%s4033_s29 + $0x49] sm:$0xff]  ;;  %v4309_v44 = vld [vmem:[%s4033_s29 + $0x51] sm:$0xff] }
  0xa1   : > { %6214 = vst [vmem:[#allocation59_spill] sm:$0xff] %v4303_v25  ;;  %v456_v63 = vadd.f32 %v440_v5, %v403_v18  ;;  %v457_v19 = vadd.f32 %v441_v12, %v404_v35  ;;  %v458_v52 = vadd.f32 %v442_v10, %v405_v57  ;;  %v459_v4 = vadd.f32 %v443_v45, %v406_v48  ;;  %v4312_v36 = vld [vmem:[%s4033_s29 + $0x69] sm:$0xff]  ;;  %v4315_v18 = vld [vmem:[%s4033_s29 + $0x71] sm:$0xff] }
  0xa2   : > { %6215 = vst [vmem:[#allocation60_spill] sm:$0xff] %v4306_v39  ;;  %6216 = vst [vmem:[#allocation61_spill] sm:$0xff] %v4309_v44  ;;  %v460_v11 = vadd.f32 %v444_v46, %v407_v49  ;;  %v461_v47 = vadd.f32 %v445_v53, %v408_v26  ;;  %v462_v40 = vadd.f32 %v446_v50, %v409_v22  ;;  %v4318_v35 = vld [vmem:[%s4033_s29 + $0x89] sm:$0xff]  ;;  %v4321_v57 = vld [vmem:[%s4033_s29 + $0x91] sm:$0xff] }
  0xa3   : > { %6217 = vst [vmem:[#allocation62_spill] sm:$0xff] %v4312_v36  ;;  %v463_v59 = vadd.f32 %v447_v32, %v410_v55  ;;  %6218 = vst [vmem:[#allocation63_spill] sm:$0xff] %v4315_v18  ;;  %v464_v48 = vadd.f32 %v448_v33, %v411_v43  ;;  %v465_v61 = vadd.f32 %v449_v56, %v412_v23  ;;  %v4324_v5 = vld [vmem:[%s4033_s29 + $0xa9] sm:$0xff]  ;;  %v4327_v12 = vld [vmem:[%s4033_s29 + $0xb1] sm:$0xff] }
  0xa4   : > { %6219 = vst [vmem:[#allocation64_spill] sm:$0xff] %v4318_v35  ;;  %6220 = vst [vmem:[#allocation65_spill] sm:$0xff] %v4321_v57  ;;  %v466_v3 = vadd.f32 %v450_v60, %v413_v24  ;;  %v4330_v10 = vld [vmem:[%s4033_s29 + $0xc9] sm:$0xff]  ;;  %v488_v49 = vmul.f32 %v3002_v17, %v467_v38  ;;  %v4333_v45 = vld [vmem:[%s4033_s29 + $0xd1] sm:$0xff]  ;;  %v489_v55 = vmul.f32 %v3002_v17, %v468_v0 }
  0xa5   : > { %6221 = vst [vmem:[#allocation66_spill] sm:$0xff] %v4324_v5  ;;  %6222 = vst [vmem:[#allocation67_spill] sm:$0xff] %v4327_v12  ;;  %v4336_v26 = vld [vmem:[%s4033_s29 + $0xe9] sm:$0xff]  ;;  %v4339_v22 = vld [vmem:[%s4033_s29 + $0xf1] sm:$0xff]  ;;  %v490_v46 = vmul.f32 %v3002_v17, %v4300_v2  ;;  %v491_v56 = vmul.f32 %v3002_v17, %v4303_v25  ;;  %v492_v60 = vmul.f32 %v3002_v17, %v4306_v39 }
  0xa6   : > { %6223 = vst [vmem:[#allocation68_spill] sm:$0xff] %v4330_v10  ;;  %6224 = vst [vmem:[#allocation69_spill] sm:$0xff] %v4333_v45  ;;  %v493_v43 = vmul.f32 %v3002_v17, %v4309_v44  ;;  %v494_v23 = vmul.f32 %v3002_v17, %v4312_v36  ;;  %v495_v38 = vmul.f32 %v3002_v17, %v4315_v18  ;;  %v3003_v39 = vld [vmem:[#allocation3 + $0x5] ss:$0 sm:$0xff]  ;;  %v4475_v41 = vld [vmem:[%s4033_s29 + $0x10d] sm:$0xff] }
  0xa7   : > { %6225 = vst [vmem:[#allocation70_spill] sm:$0xff] %v4336_v26  ;;  %6226 = vst [vmem:[#allocation71_spill] sm:$0xff] %v4339_v22  ;;  %v496_v24 = vmul.f32 %v3002_v17, %v4318_v35  ;;  %v497_v53 = vmul.f32 %v3002_v17, %v4321_v57  ;;  %v498_v0 = vmul.f32 %v3002_v17, %v4324_v5  ;;  %v520_v35 = vld [vmem:[%s4033_s29 + $0xa] sm:$0xff] }
  0xa8   : > { %v499_v50 = vmul.f32 %v3002_v17, %v4327_v12  ;;  %v500_v32 = vmul.f32 %v3002_v17, %v4330_v10  ;;  %v501_v33 = vmul.f32 %v3002_v17, %v4333_v45  ;;  %v502_v44 = vmul.f32 %v3002_v17, %v4336_v26  ;;  %v521_v12 = vld [vmem:[%s4033_s29 + $0x12] sm:$0xff]  ;;  %v4358_v10 = vld [vmem:[%s4033_s29 + $0x2a] sm:$0xff] }
  0xa9   : > { %v503_v18 = vmul.f32 %v3002_v17, %v4339_v22  ;;  %v504_v36 = vadd.f32 %v488_v49, %v451_v1  ;;  %v505_v57 = vadd.f32 %v489_v55, %v452_v58  ;;  %v506_v25 = vadd.f32 %v490_v46, %v453_v54  ;;  %6227 = vst [vmem:[#allocation72_spill] sm:$0xff] %v4358_v10  ;;  %v4361_v45 = vld [vmem:[%s4033_s29 + $0x32] sm:$0xff]  ;;  %v4364_v49 = vld [vmem:[%s4033_s29 + $0x4a] sm:$0xff] }
  0xaa   : > { %v507_v2 = vadd.f32 %v491_v56, %v454_v37  ;;  %v508_v5 = vadd.f32 %v492_v60, %v455_v28  ;;  %6228 = vst [vmem:[#allocation73_spill] sm:$0xff] %v4361_v45  ;;  %v509_v26 = vadd.f32 %v493_v43, %v456_v63  ;;  %v510_v42 = vadd.f32 %v494_v23, %v457_v19  ;;  %v4367_v54 = vld [vmem:[%s4033_s29 + $0x52] sm:$0xff]  ;;  %v4370_v37 = vld [vmem:[%s4033_s29 + $0x6a] sm:$0xff] }
  0xab   : > { %v511_v17 = vadd.f32 %v495_v38, %v458_v52  ;;  %v512_v1 = vadd.f32 %v496_v24, %v459_v4  ;;  %6229 = vst [vmem:[#allocation74_spill] sm:$0xff] %v4364_v49  ;;  %6230 = vst [vmem:[#allocation75_spill] sm:$0xff] %v4367_v54  ;;  %v513_v58 = vadd.f32 %v497_v53, %v460_v11  ;;  %v4373_v63 = vld [vmem:[%s4033_s29 + $0x72] sm:$0xff]  ;;  %v4376_v19 = vld [vmem:[%s4033_s29 + $0x8a] sm:$0xff] }
  0xac   : > { %6231 = vst [vmem:[#allocation76_spill] sm:$0xff] %v4370_v37  ;;  %v514_v28 = vadd.f32 %v498_v0, %v461_v47  ;;  %v515_v55 = vadd.f32 %v499_v50, %v462_v40  ;;  %v516_v46 = vadd.f32 %v500_v32, %v463_v59  ;;  %6232 = vst [vmem:[#allocation77_spill] sm:$0xff] %v4373_v63  ;;  %v4379_v52 = vld [vmem:[%s4033_s29 + $0x92] sm:$0xff]  ;;  %v4382_v43 = vld [vmem:[%s4033_s29 + $0xaa] sm:$0xff] }
  0xad   : > { %6233 = vst [vmem:[#allocation78_spill] sm:$0xff] %v4376_v19  ;;  %6234 = vst [vmem:[#allocation79_spill] sm:$0xff] %v4379_v52  ;;  %v517_v4 = vadd.f32 %v501_v33, %v464_v48  ;;  %v518_v56 = vadd.f32 %v502_v44, %v465_v61  ;;  %v519_v60 = vadd.f32 %v503_v18, %v466_v3  ;;  %v4385_v23 = vld [vmem:[%s4033_s29 + $0xb2] sm:$0xff]  ;;  %v4388_v38 = vld [vmem:[%s4033_s29 + $0xca] sm:$0xff] }
  0xae   : > { %6235 = vst [vmem:[#allocation80_spill] sm:$0xff] %v4382_v43  ;;  %6236 = vst [vmem:[#allocation81_spill] sm:$0xff] %v4385_v23  ;;  %v541_v11 = vmul.f32 %v3003_v39, %v520_v35  ;;  %v4391_v24 = vld [vmem:[%s4033_s29 + $0xd2] sm:$0xff]  ;;  %v4394_v47 = vld [vmem:[%s4033_s29 + $0xea] sm:$0xff]  ;;  %v542_v59 = vmul.f32 %v3003_v39, %v521_v12  ;;  %v543_v53 = vmul.f32 %v3003_v39, %v4358_v10 }
  0xaf   : > { %6237 = vst [vmem:[#allocation82_spill] sm:$0xff] %v4388_v38  ;;  %6238 = vst [vmem:[#allocation83_spill] sm:$0xff] %v4391_v24  ;;  %v4397_v40 = vld [vmem:[%s4033_s29 + $0xf2] sm:$0xff]  ;;  %v544_v44 = vmul.f32 %v3003_v39, %v4361_v45  ;;  %v545_v18 = vmul.f32 %v3003_v39, %v4364_v49  ;;  %v546_v48 = vmul.f32 %v3003_v39, %v4367_v54  ;;  %v3004_v49 = vld [vmem:[#allocation3 + $0x6] ss:$0 sm:$0xff] }
  0xb0   : > { %6239 = vst [vmem:[#allocation84_spill] sm:$0xff] %v4394_v47  ;;  %6240 = vst [vmem:[#allocation85_spill] sm:$0xff] %v4397_v40  ;;  %v547_v61 = vmul.f32 %v3003_v39, %v4370_v37  ;;  %v548_v35 = vmul.f32 %v3003_v39, %v4373_v63  ;;  %v549_v3 = vmul.f32 %v3003_v39, %v4376_v19  ;;  %v573_v19 = vld [vmem:[%s4033_s29 + $0xb] sm:$0xff] }
  0xb1   : > { %v550_v0 = vmul.f32 %v3003_v39, %v4379_v52  ;;  %v551_v12 = vmul.f32 %v3003_v39, %v4382_v43  ;;  %v552_v50 = vmul.f32 %v3003_v39, %v4385_v23  ;;  %v553_v32 = vmul.f32 %v3003_v39, %v4388_v38  ;;  %v574_v23 = vld [vmem:[%s4033_s29 + $0x13] sm:$0xff]  ;;  %v4416_v38 = vld [vmem:[%s4033_s29 + $0x2b] sm:$0xff] }
  0xb2   : > { %v554_v33 = vmul.f32 %v3003_v39, %v4391_v24  ;;  %v555_v54 = vmul.f32 %v3003_v39, %v4394_v47  ;;  %v556_v63 = vmul.f32 %v3003_v39, %v4397_v40  ;;  %v557_v37 = vadd.f32 %v541_v11, %v504_v36  ;;  %6241 = vst [vmem:[#allocation86_spill] sm:$0xff] %v4416_v38  ;;  %v4419_v24 = vld [vmem:[%s4033_s29 + $0x33] sm:$0xff]  ;;  %v4422_v11 = vld [vmem:[%s4033_s29 + $0x4b] sm:$0xff] }
  0xb3   : > { %v558_v52 = vadd.f32 %v542_v59, %v505_v57  ;;  %v559_v45 = vadd.f32 %v543_v53, %v506_v25  ;;  %v560_v10 = vadd.f32 %v544_v44, %v507_v2  ;;  %v561_v43 = vadd.f32 %v545_v18, %v508_v5  ;;  %6242 = vst [vmem:[#allocation87_spill] sm:$0xff] %v4419_v24  ;;  %v4425_v25 = vld [vmem:[%s4033_s29 + $0x53] sm:$0xff]  ;;  %v4428_v2 = vld [vmem:[%s4033_s29 + $0x6b] sm:$0xff] }
  0xb4   : > { %v562_v47 = vadd.f32 %v546_v48, %v509_v26  ;;  %v563_v22 = vadd.f32 %v547_v61, %v510_v42  ;;  %v564_v39 = vadd.f32 %v548_v35, %v511_v17  ;;  %v565_v36 = vadd.f32 %v549_v3, %v512_v1  ;;  %6243 = vst [vmem:[#allocation88_spill] sm:$0xff] %v4422_v11  ;;  %v4431_v26 = vld [vmem:[%s4033_s29 + $0x73] sm:$0xff]  ;;  %v4434_v42 = vld [vmem:[%s4033_s29 + $0x8b] sm:$0xff] }
  0xb5   : > { %6244 = vst [vmem:[#allocation89_spill] sm:$0xff] %v4425_v25  ;;  %6245 = vst [vmem:[#allocation90_spill] sm:$0xff] %v4428_v2  ;;  %v566_v57 = vadd.f32 %v550_v0, %v513_v58  ;;  %v567_v5 = vadd.f32 %v551_v12, %v514_v28  ;;  %v568_v59 = vadd.f32 %v552_v50, %v515_v55  ;;  %v4437_v17 = vld [vmem:[%s4033_s29 + $0x93] sm:$0xff]  ;;  %v4440_v48 = vld [vmem:[%s4033_s29 + $0xab] sm:$0xff] }
  0xb6   : > { %v569_v53 = vadd.f32 %v553_v32, %v516_v46  ;;  %6246 = vst [vmem:[#allocation91_spill] sm:$0xff] %v4431_v26  ;;  %6247 = vst [vmem:[#allocation92_spill] sm:$0xff] %v4434_v42  ;;  %v570_v1 = vadd.f32 %v554_v33, %v517_v4  ;;  %v571_v44 = vadd.f32 %v555_v54, %v518_v56  ;;  %v4443_v61 = vld [vmem:[%s4033_s29 + $0xb3] sm:$0xff]  ;;  %v4446_v35 = vld [vmem:[%s4033_s29 + $0xcb] sm:$0xff] }
  0xb7   : > { %6248 = vst [vmem:[#allocation93_spill] sm:$0xff] %v4437_v17  ;;  %v572_v18 = vadd.f32 %v556_v63, %v519_v60  ;;  %6249 = vst [vmem:[#allocation94_spill] sm:$0xff] %v4440_v48  ;;  %v594_v58 = vmul.f32 %v3004_v49, %v573_v19  ;;  %v4449_v3 = vld [vmem:[%s4033_s29 + $0xd3] sm:$0xff]  ;;  %v4452_v28 = vld [vmem:[%s4033_s29 + $0xeb] sm:$0xff]  ;;  %v595_v46 = vmul.f32 %v3004_v49, %v574_v23 }
  0xb8   : > { %6250 = vst [vmem:[#allocation95_spill] sm:$0xff] %v4443_v61  ;;  %6251 = vst [vmem:[#allocation96_spill] sm:$0xff] %v4446_v35  ;;  %v4455_v55 = vld [vmem:[%s4033_s29 + $0xf3] sm:$0xff]  ;;  %v596_v0 = vmul.f32 %v3004_v49, %v4416_v38  ;;  %v597_v4 = vmul.f32 %v3004_v49, %v4419_v24  ;;  %v598_v54 = vmul.f32 %v3004_v49, %v4422_v11 }
  0xb9   : > { %6252 = vst [vmem:[#allocation97_spill] sm:$0xff] %v4449_v3  ;;  %6253 = vst [vmem:[#allocation98_spill] sm:$0xff] %v4452_v28  ;;  %v599_v63 = vmul.f32 %v3004_v49, %v4425_v25  ;;  %v600_v56 = vmul.f32 %v3004_v49, %v4428_v2  ;;  %v601_v60 = vmul.f32 %v3004_v49, %v4431_v26 }
  0xba   : > { %v602_v19 = vmul.f32 %v3004_v49, %v4434_v42  ;;  %v603_v12 = vmul.f32 %v3004_v49, %v4437_v17  ;;  %v604_v50 = vmul.f32 %v3004_v49, %v4440_v48  ;;  %v605_v23 = vmul.f32 %v3004_v49, %v4443_v61 }
  0xbb   : > { %v606_v32 = vmul.f32 %v3004_v49, %v4446_v35  ;;  %v607_v33 = vmul.f32 %v3004_v49, %v4449_v3  ;;  %v608_v11 = vmul.f32 %v3004_v49, %v4452_v28  ;;  %v609_v2 = vmul.f32 %v3004_v49, %v4455_v55  ;;  %v4472_v3 = vld [vmem:[%s4033_s29 + $0x105] sm:$0xff] }
  0xbc   : > { %v610_v25 = vadd.f32 %v594_v58, %v557_v37  ;;  %v611_v26 = vadd.f32 %v595_v46, %v558_v52  ;;  %v612_v24 = vadd.f32 %v596_v0, %v559_v45  ;;  %v613_v42 = vadd.f32 %v597_v4, %v560_v10  ;;  %v6265_v0 = vld [vmem:[#allocation25_spill] sm:$0xff] }
  0xbd   : > { %v614_v38 = vadd.f32 %v598_v54, %v561_v43  ;;  %v615_v17 = vadd.f32 %v599_v63, %v562_v47  ;;  %v616_v40 = vadd.f32 %v600_v56, %v563_v22  ;;  %v617_v48 = vadd.f32 %v601_v60, %v564_v39  ;;  %v6266_v54 = vld [vmem:[#allocation26_spill] sm:$0xff]  ;;  %v6267_v56 = vld [vmem:[#allocation27_spill] sm:$0xff] }
  0xbe   : > { %v618_v31 = vadd.f32 %v602_v19, %v565_v36  ;;  %v619_v61 = vadd.f32 %v603_v12, %v566_v57  ;;  %v620_v30 = vadd.f32 %v604_v50, %v567_v5  ;;  %v621_v35 = vadd.f32 %v605_v23, %v568_v59  ;;  %v6254_v36 = vld [vmem:[#allocation17_spill] sm:$0xff]  ;;  %v3040_v5 = vld [vmem:[#allocation3 + $0x8] ss:$0 sm:$0xff]  ;;  %v6268_v19 = vld [vmem:[#allocation28_spill] sm:$0xff] }
  0xbf   : > { %v622_v29 = vadd.f32 %v606_v32, %v569_v53  ;;  %v623_v28 = vadd.f32 %v607_v33, %v570_v1  ;;  %v624_v34 = vadd.f32 %v608_v11, %v571_v44  ;;  %v625_v49 = vadd.f32 %v609_v2, %v572_v18  ;;  %v6255_v11 = vld [vmem:[#allocation21_spill] sm:$0xff]  ;;  %v6259_v44 = vld [vmem:[#allocation18_spill] sm:$0xff] }
  0xc0   : > { %v657_v45 = vmul.f32 %v4031_v51, %v4061_v7  ;;  %v658_v10 = vmul.f32 %v4031_v51, %v4064_v8  ;;  %v659_v22 = vmul.f32 %v4031_v51, %v4067_v9  ;;  %v660_v37 = vmul.f32 %v4031_v51, %v4073_v14  ;;  %v6269_v50 = vld [vmem:[#allocation29_spill] sm:$0xff] }
  0xc1   : > { %v661_v52 = vmul.f32 %v4031_v51, %v4076_v15  ;;  %v662_v43 = vmul.f32 %v4031_v51, %v4079_v16  ;;  %v663_v47 = vmul.f32 %v4031_v51, %v4088_v21  ;;  %v664_v7 = vmul.f32 %v4031_v51, %v4472_v3 }
  0xc2   : > { %v665_v8 = vmul.f32 %v4031_v51, %v4475_v41  ;;  %v666_v9 = vadd.f32 %v4046_v62, %v610_v25  ;;  %v667_v39 = vadd.f32 %v4058_v6, %v611_v26  ;;  %v668_v14 = vadd.f32 %v4070_v13, %v612_v24  ;;  %v4503_v13 = vld [vmem:[%s4033_s29 + $0x106] sm:$0xff]  ;;  %v4506_v24 = vld [vmem:[%s4033_s29 + $0x10e] sm:$0xff] }
  0xc3   : > { %v669_v15 = vadd.f32 %v4085_v20, %v613_v42  ;;  %v670_v16 = vadd.f32 %v4096_v27, %v614_v38  ;;  %v671_v21 = vadd.f32 %v6254_v36, %v615_v17  ;;  %v672_v2 = vadd.f32 %v6255_v11, %v616_v40  ;;  %v6256_v20 = vld [vmem:[#allocation14_spill] sm:$0xff]  ;;  %v6257_v38 = vld [vmem:[#allocation15_spill] sm:$0xff]  ;;  %v6258_v17 = vld [vmem:[#allocation16_spill] sm:$0xff] }
  0xc4   : > { %v673_v57 = vadd.f32 %v657_v45, %v617_v48  ;;  %v674_v59 = vadd.f32 %v658_v10, %v618_v31  ;;  %v675_v51 = vadd.f32 %v659_v22, %v619_v61  ;;  %v676_v53 = vadd.f32 %v660_v37, %v620_v30  ;;  %v6260_v31 = vld [vmem:[#allocation19_spill] sm:$0xff]  ;;  %v6261_v30 = vld [vmem:[#allocation20_spill] sm:$0xff] }
  0xc5   : > { %v677_v62 = vadd.f32 %v661_v52, %v621_v35  ;;  %v678_v25 = vadd.f32 %v662_v43, %v622_v29  ;;  %v679_v6 = vadd.f32 %v663_v47, %v623_v28  ;;  %v680_v26 = vadd.f32 %v664_v7, %v624_v34  ;;  %v6262_v29 = vld [vmem:[#allocation22_spill] sm:$0xff]  ;;  %v6263_v34 = vld [vmem:[#allocation23_spill] sm:$0xff]  ;;  %v6264_v28 = vld [vmem:[#allocation24_spill] sm:$0xff] }
  0xc6   : > { %v681_v1 = vadd.f32 %v665_v8, %v625_v49  ;;  %v703_v27 = vmul.f32 %v3040_v5, %v6256_v20  ;;  %v704_v42 = vmul.f32 %v3040_v5, %v6257_v38  ;;  %v705_v40 = vmul.f32 %v3040_v5, %v6258_v17  ;;  %v3057_v7 = vld [vmem:[#allocation3 + $0x9] ss:$0 sm:$0xff] }
  0xc7   : > { %v706_v18 = vmul.f32 %v3040_v5, %v6259_v44  ;;  %v707_v48 = vmul.f32 %v3040_v5, %v6260_v31  ;;  %v708_v61 = vmul.f32 %v3040_v5, %v6261_v30  ;;  %v709_v35 = vmul.f32 %v3040_v5, %v6262_v29  ;;  %v6280_v30 = vld [vmem:[#allocation40_spill] sm:$0xff]  ;;  %v6281_v29 = vld [vmem:[#allocation41_spill] sm:$0xff] }
  0xc8   : > { %v710_v58 = vmul.f32 %v3040_v5, %v6263_v34  ;;  %v711_v46 = vmul.f32 %v3040_v5, %v6264_v28  ;;  %v712_v4 = vmul.f32 %v3040_v5, %v6265_v0  ;;  %v713_v63 = vmul.f32 %v3040_v5, %v6266_v54  ;;  %v6282_v34 = vld [vmem:[#allocation42_spill] sm:$0xff]  ;;  %v6283_v28 = vld [vmem:[#allocation43_spill] sm:$0xff] }
  0xc9   : > { %v714_v60 = vmul.f32 %v3040_v5, %v6267_v56  ;;  %v715_v12 = vmul.f32 %v3040_v5, %v6268_v19  ;;  %v716_v23 = vmul.f32 %v3040_v5, %v6269_v50  ;;  %v717_v32 = vmul.f32 %v3040_v5, %v4503_v13 }
  0xca   : > { %v718_v33 = vmul.f32 %v3040_v5, %v4506_v24  ;;  %v719_v49 = vadd.f32 %v703_v27, %v666_v9  ;;  %v720_v45 = vadd.f32 %v704_v42, %v667_v39  ;;  %v721_v10 = vadd.f32 %v705_v40, %v668_v14  ;;  %v4525_v5 = vld [vmem:[%s4033_s29 + $0x107] sm:$0xff]  ;;  %v4528_v9 = vld [vmem:[%s4033_s29 + $0x10f] sm:$0xff] }
  0xcb   : > { %v722_v22 = vadd.f32 %v706_v18, %v669_v15  ;;  %v723_v37 = vadd.f32 %v707_v48, %v670_v16  ;;  %v724_v52 = vadd.f32 %v708_v61, %v671_v21  ;;  %v725_v43 = vadd.f32 %v709_v35, %v672_v2  ;;  %v6270_v39 = vld [vmem:[#allocation30_spill] sm:$0xff]  ;;  %v6271_v15 = vld [vmem:[#allocation31_spill] sm:$0xff]  ;;  %v6272_v21 = vld [vmem:[#allocation32_spill] sm:$0xff] }
  0xcc   : > { %v726_v47 = vadd.f32 %v710_v58, %v673_v57  ;;  %v727_v8 = vadd.f32 %v711_v46, %v674_v59  ;;  %v728_v36 = vadd.f32 %v712_v4, %v675_v51  ;;  %v729_v11 = vadd.f32 %v713_v63, %v676_v53  ;;  %v6273_v57 = vld [vmem:[#allocation33_spill] sm:$0xff]  ;;  %v6274_v59 = vld [vmem:[#allocation34_spill] sm:$0xff]  ;;  %v6275_v53 = vld [vmem:[#allocation35_spill] sm:$0xff] }
  0xcd   : > { %v730_v20 = vadd.f32 %v714_v60, %v677_v62  ;;  %v731_v38 = vadd.f32 %v715_v12, %v678_v25  ;;  %v732_v17 = vadd.f32 %v716_v23, %v679_v6  ;;  %v733_v44 = vadd.f32 %v717_v32, %v680_v26  ;;  %v6276_v25 = vld [vmem:[#allocation36_spill] sm:$0xff]  ;;  %v6277_v26 = vld [vmem:[#allocation37_spill] sm:$0xff]  ;;  %v6278_v42 = vld [vmem:[#allocation38_spill] sm:$0xff] }
  0xce   : > { %v734_v31 = vadd.f32 %v718_v33, %v681_v1  ;;  %v756_v14 = vmul.f32 %v3057_v7, %v6270_v39  ;;  %v757_v16 = vmul.f32 %v3057_v7, %v6271_v15  ;;  %v758_v2 = vmul.f32 %v3057_v7, %v6272_v21  ;;  %v6279_v18 = vld [vmem:[#allocation39_spill] sm:$0xff] }
  0xcf   : > { %v759_v27 = vmul.f32 %v3057_v7, %v6273_v57  ;;  %v760_v51 = vmul.f32 %v3057_v7, %v6274_v59  ;;  %v761_v62 = vmul.f32 %v3057_v7, %v6275_v53  ;;  %v762_v6 = vmul.f32 %v3057_v7, %v6276_v25  ;;  %v3074_v32 = vld [vmem:[#allocation3 + $0xa] ss:$0 sm:$0xff] }
  0xd0   : > { %v763_v1 = vmul.f32 %v3057_v7, %v6277_v26  ;;  %v764_v40 = vmul.f32 %v3057_v7, %v6278_v42  ;;  %v765_v48 = vmul.f32 %v3057_v7, %v6279_v18  ;;  %v766_v61 = vmul.f32 %v3057_v7, %v6280_v30  ;;  %v6295_v26 = vld [vmem:[#allocation55_spill] sm:$0xff]  ;;  %v6296_v42 = vld [vmem:[#allocation56_spill] sm:$0xff]  ;;  %v6297_v18 = vld [vmem:[#allocation57_spill] sm:$0xff] }
  0xd1   : > { %v767_v35 = vmul.f32 %v3057_v7, %v6281_v29  ;;  %v768_v58 = vmul.f32 %v3057_v7, %v6282_v34  ;;  %v769_v46 = vmul.f32 %v3057_v7, %v6283_v28  ;;  %v770_v0 = vmul.f32 %v3057_v7, %v4525_v5 }
  0xd2   : > { %v771_v4 = vmul.f32 %v3057_v7, %v4528_v9  ;;  %v772_v54 = vadd.f32 %v756_v14, %v719_v49  ;;  %v773_v63 = vadd.f32 %v757_v16, %v720_v45  ;;  %v774_v56 = vadd.f32 %v758_v2, %v721_v10  ;;  %v4547_v7 = vld [vmem:[%s4033_s29 + $0x108] sm:$0xff]  ;;  %v4550_v49 = vld [vmem:[%s4033_s29 + $0x110] sm:$0xff] }
  0xd3   : > { %v775_v60 = vadd.f32 %v759_v27, %v722_v22  ;;  %v776_v19 = vadd.f32 %v760_v51, %v723_v37  ;;  %v777_v12 = vadd.f32 %v761_v62, %v724_v52  ;;  %v778_v50 = vadd.f32 %v762_v6, %v725_v43  ;;  %v6284_v45 = vld [vmem:[#allocation44_spill] sm:$0xff]  ;;  %v6285_v22 = vld [vmem:[#allocation45_spill] sm:$0xff]  ;;  %v6286_v52 = vld [vmem:[#allocation46_spill] sm:$0xff] }
  0xd4   : > { %v779_v23 = vadd.f32 %v763_v1, %v726_v47  ;;  %v780_v33 = vadd.f32 %v764_v40, %v727_v8  ;;  %v781_v39 = vadd.f32 %v765_v48, %v728_v36  ;;  %v782_v15 = vadd.f32 %v766_v61, %v729_v11  ;;  %v6287_v47 = vld [vmem:[#allocation47_spill] sm:$0xff]  ;;  %v6288_v8 = vld [vmem:[#allocation48_spill] sm:$0xff]  ;;  %v6289_v11 = vld [vmem:[#allocation49_spill] sm:$0xff] }
  0xd5   : > { %v783_v21 = vadd.f32 %v767_v35, %v730_v20  ;;  %v784_v57 = vadd.f32 %v768_v58, %v731_v38  ;;  %v785_v59 = vadd.f32 %v769_v46, %v732_v17  ;;  %v786_v53 = vadd.f32 %v770_v0, %v733_v44  ;;  %v6290_v38 = vld [vmem:[#allocation50_spill] sm:$0xff]  ;;  %v6291_v44 = vld [vmem:[#allocation51_spill] sm:$0xff]  ;;  %v6292_v16 = vld [vmem:[#allocation52_spill] sm:$0xff] }
  0xd6   : > { %v787_v25 = vadd.f32 %v771_v4, %v734_v31  ;;  %v809_v10 = vmul.f32 %v3074_v32, %v6284_v45  ;;  %v810_v37 = vmul.f32 %v3074_v32, %v6285_v22  ;;  %v811_v43 = vmul.f32 %v3074_v32, %v6286_v52  ;;  %v6293_v27 = vld [vmem:[#allocation53_spill] sm:$0xff]  ;;  %v6294_v62 = vld [vmem:[#allocation54_spill] sm:$0xff]  ;;  %v3091_v45 = vld [vmem:[#allocation3 + $0xb] ss:$0 sm:$0xff] }
  0xd7   : > { %v812_v14 = vmul.f32 %v3074_v32, %v6287_v47  ;;  %v813_v36 = vmul.f32 %v3074_v32, %v6288_v8  ;;  %v814_v20 = vmul.f32 %v3074_v32, %v6289_v11  ;;  %v815_v17 = vmul.f32 %v3074_v32, %v6290_v38 }
  0xd8   : > { %v816_v31 = vmul.f32 %v3074_v32, %v6291_v44  ;;  %v817_v2 = vmul.f32 %v3074_v32, %v6292_v16  ;;  %v818_v51 = vmul.f32 %v3074_v32, %v6293_v27  ;;  %v819_v6 = vmul.f32 %v3074_v32, %v6294_v62  ;;  %v6310_v27 = vld [vmem:[#allocation70_spill] sm:$0xff]  ;;  %v6311_v62 = vld [vmem:[#allocation71_spill] sm:$0xff] }
  0xd9   : > { %v820_v1 = vmul.f32 %v3074_v32, %v6295_v26  ;;  %v821_v40 = vmul.f32 %v3074_v32, %v6296_v42  ;;  %v822_v48 = vmul.f32 %v3074_v32, %v6297_v18  ;;  %v823_v30 = vmul.f32 %v3074_v32, %v4547_v7 }
  0xda   : > { %v824_v61 = vmul.f32 %v3074_v32, %v4550_v49  ;;  %v825_v29 = vadd.f32 %v809_v10, %v772_v54  ;;  %v826_v35 = vadd.f32 %v810_v37, %v773_v63  ;;  %v827_v34 = vadd.f32 %v811_v43, %v774_v56  ;;  %v4569_v32 = vld [vmem:[%s4033_s29 + $0x109] sm:$0xff]  ;;  %v4572_v54 = vld [vmem:[%s4033_s29 + $0x111] sm:$0xff]  ;;  %v6298_v63 = vld [vmem:[#allocation58_spill] sm:$0xff] }
  0xdb   : > { %v828_v58 = vadd.f32 %v812_v14, %v775_v60  ;;  %v829_v28 = vadd.f32 %v813_v36, %v776_v19  ;;  %v830_v46 = vadd.f32 %v814_v20, %v777_v12  ;;  %v831_v0 = vadd.f32 %v815_v17, %v778_v50  ;;  %v6299_v60 = vld [vmem:[#allocation59_spill] sm:$0xff]  ;;  %v6300_v12 = vld [vmem:[#allocation60_spill] sm:$0xff]  ;;  %v6306_v37 = vld [vmem:[#allocation66_spill] sm:$0xff] }
  0xdc   : > { %v832_v4 = vadd.f32 %v816_v31, %v779_v23  ;;  %v833_v22 = vadd.f32 %v817_v2, %v780_v33  ;;  %v834_v52 = vadd.f32 %v818_v51, %v781_v39  ;;  %v835_v47 = vadd.f32 %v819_v6, %v782_v15  ;;  %v6301_v23 = vld [vmem:[#allocation61_spill] sm:$0xff]  ;;  %v6302_v33 = vld [vmem:[#allocation62_spill] sm:$0xff]  ;;  %v6303_v15 = vld [vmem:[#allocation63_spill] sm:$0xff] }
  0xdd   : > { %v836_v8 = vadd.f32 %v820_v1, %v783_v21  ;;  %v837_v11 = vadd.f32 %v821_v40, %v784_v57  ;;  %v838_v38 = vadd.f32 %v822_v48, %v785_v59  ;;  %v839_v44 = vadd.f32 %v823_v30, %v786_v53  ;;  %v6304_v57 = vld [vmem:[#allocation64_spill] sm:$0xff]  ;;  %v6305_v53 = vld [vmem:[#allocation65_spill] sm:$0xff]  ;;  %v6307_v14 = vld [vmem:[#allocation67_spill] sm:$0xff] }
  0xde   : > { %v840_v16 = vadd.f32 %v824_v61, %v787_v25  ;;  %v862_v56 = vmul.f32 %v3091_v45, %v6298_v63  ;;  %v863_v19 = vmul.f32 %v3091_v45, %v6299_v60  ;;  %v864_v50 = vmul.f32 %v3091_v45, %v6300_v12  ;;  %v6308_v20 = vld [vmem:[#allocation68_spill] sm:$0xff]  ;;  %v6309_v31 = vld [vmem:[#allocation69_spill] sm:$0xff]  ;;  %v3108_v12 = vld [vmem:[#allocation3 + $0xc] ss:$0 sm:$0xff] }
  0xdf   : > { %v865_v10 = vmul.f32 %v3091_v45, %v6301_v23  ;;  %v866_v39 = vmul.f32 %v3091_v45, %v6302_v33  ;;  %v867_v21 = vmul.f32 %v3091_v45, %v6303_v15  ;;  %v868_v59 = vmul.f32 %v3091_v45, %v6304_v57 }
  0xe0   : > { %v869_v25 = vmul.f32 %v3091_v45, %v6305_v53  ;;  %v870_v43 = vmul.f32 %v3091_v45, %v6306_v37  ;;  %v871_v36 = vmul.f32 %v3091_v45, %v6307_v14  ;;  %v872_v17 = vmul.f32 %v3091_v45, %v6308_v20 }
  0xe1   : > { %v873_v2 = vmul.f32 %v3091_v45, %v6309_v31  ;;  %v874_v51 = vmul.f32 %v3091_v45, %v6310_v27  ;;  %v875_v6 = vmul.f32 %v3091_v45, %v6311_v62  ;;  %v876_v26 = vmul.f32 %v3091_v45, %v4569_v32  ;;  %v6325_v31 = vld [vmem:[#allocation85_spill] sm:$0xff] }
  0xe2   : > { %v877_v1 = vmul.f32 %v3091_v45, %v4572_v54  ;;  %v878_v42 = vadd.f32 %v862_v56, %v825_v29  ;;  %v879_v40 = vadd.f32 %v863_v19, %v826_v35  ;;  %v880_v18 = vadd.f32 %v864_v50, %v827_v34  ;;  %v4591_v45 = vld [vmem:[%s4033_s29 + $0x10a] sm:$0xff]  ;;  %v4594_v29 = vld [vmem:[%s4033_s29 + $0x112] sm:$0xff] }
  0xe3   : > { %v881_v48 = vadd.f32 %v865_v10, %v828_v58  ;;  %v882_v30 = vadd.f32 %v866_v39, %v829_v28  ;;  %v883_v61 = vadd.f32 %v867_v21, %v830_v46  ;;  %v884_v63 = vadd.f32 %v868_v59, %v831_v0  ;;  %v6312_v35 = vld [vmem:[#allocation72_spill] sm:$0xff]  ;;  %v6313_v58 = vld [vmem:[#allocation73_spill] sm:$0xff]  ;;  %v6314_v46 = vld [vmem:[#allocation74_spill] sm:$0xff] }
  0xe4   : > { %v885_v60 = vadd.f32 %v869_v25, %v832_v4  ;;  %v886_v23 = vadd.f32 %v870_v43, %v833_v22  ;;  %v887_v33 = vadd.f32 %v871_v36, %v834_v52  ;;  %v888_v15 = vadd.f32 %v872_v17, %v835_v47  ;;  %v6315_v4 = vld [vmem:[#allocation75_spill] sm:$0xff]  ;;  %v6316_v22 = vld [vmem:[#allocation76_spill] sm:$0xff]  ;;  %v6317_v47 = vld [vmem:[#allocation77_spill] sm:$0xff] }
  0xe5   : > { %v889_v57 = vadd.f32 %v873_v2, %v836_v8  ;;  %v890_v53 = vadd.f32 %v874_v51, %v837_v11  ;;  %v891_v37 = vadd.f32 %v875_v6, %v838_v38  ;;  %v892_v14 = vadd.f32 %v876_v26, %v839_v44  ;;  %v6318_v11 = vld [vmem:[#allocation78_spill] sm:$0xff]  ;;  %v6319_v44 = vld [vmem:[#allocation79_spill] sm:$0xff]  ;;  %v6320_v19 = vld [vmem:[#allocation80_spill] sm:$0xff] }
  0xe6   : > { %v893_v20 = vadd.f32 %v877_v1, %v840_v16  ;;  %v915_v34 = vmul.f32 %v3108_v12, %v6312_v35  ;;  %v916_v28 = vmul.f32 %v3108_v12, %v6313_v58  ;;  %v917_v0 = vmul.f32 %v3108_v12, %v6314_v46  ;;  %v6321_v10 = vld [vmem:[#allocation81_spill] sm:$0xff]  ;;  %v6322_v21 = vld [vmem:[#allocation82_spill] sm:$0xff]  ;;  %v6323_v25 = vld [vmem:[#allocation83_spill] sm:$0xff] }
  0xe7   : > { %v918_v56 = vmul.f32 %v3108_v12, %v6315_v4  ;;  %v919_v52 = vmul.f32 %v3108_v12, %v6316_v22  ;;  %v920_v8 = vmul.f32 %v3108_v12, %v6317_v47  ;;  %v921_v38 = vmul.f32 %v3108_v12, %v6318_v11  ;;  %v6324_v36 = vld [vmem:[#allocation84_spill] sm:$0xff]  ;;  %v3125_v22 = vld [vmem:[#allocation3 + $0xd] ss:$0 sm:$0xff] }
  0xe8   : > { %v922_v16 = vmul.f32 %v3108_v12, %v6319_v44  ;;  %v923_v50 = vmul.f32 %v3108_v12, %v6320_v19  ;;  %v924_v39 = vmul.f32 %v3108_v12, %v6321_v10  ;;  %v925_v59 = vmul.f32 %v3108_v12, %v6322_v21 }
  0xe9   : > { %v926_v43 = vmul.f32 %v3108_v12, %v6323_v25  ;;  %v927_v17 = vmul.f32 %v3108_v12, %v6324_v36  ;;  %v928_v2 = vmul.f32 %v3108_v12, %v6325_v31  ;;  %v929_v27 = vmul.f32 %v3108_v12, %v4591_v45 }
  0xea   : > { %v930_v51 = vmul.f32 %v3108_v12, %v4594_v29  ;;  %v931_v62 = vadd.f32 %v915_v34, %v878_v42  ;;  %v932_v6 = vadd.f32 %v916_v28, %v879_v40  ;;  %v933_v26 = vadd.f32 %v917_v0, %v880_v18  ;;  %v4613_v12 = vld [vmem:[%s4033_s29 + $0x10b] sm:$0xff]  ;;  %v4616_v42 = vld [vmem:[%s4033_s29 + $0x113] sm:$0xff]  ;;  %v6326_v40 = vld [vmem:[#allocation86_spill] sm:$0xff] }
  0xeb   : > { %v934_v1 = vadd.f32 %v918_v56, %v881_v48  ;;  %v935_v35 = vadd.f32 %v919_v52, %v882_v30  ;;  %v936_v58 = vadd.f32 %v920_v8, %v883_v61  ;;  %v937_v46 = vadd.f32 %v921_v38, %v884_v63  ;;  %v6327_v48 = vld [vmem:[#allocation87_spill] sm:$0xff]  ;;  %v6328_v61 = vld [vmem:[#allocation88_spill] sm:$0xff]  ;;  %v6334_v28 = vld [vmem:[#allocation94_spill] sm:$0xff] }
  0xec   : > { %v938_v4 = vadd.f32 %v922_v16, %v885_v60  ;;  %v939_v47 = vadd.f32 %v923_v50, %v886_v23  ;;  %v940_v11 = vadd.f32 %v924_v39, %v887_v33  ;;  %v941_v44 = vadd.f32 %v925_v59, %v888_v15  ;;  %v6329_v60 = vld [vmem:[#allocation89_spill] sm:$0xff]  ;;  %v6330_v33 = vld [vmem:[#allocation90_spill] sm:$0xff]  ;;  %v6335_v56 = vld [vmem:[#allocation95_spill] sm:$0xff] }
  0xed   : > { %v942_v19 = vadd.f32 %v926_v43, %v889_v57  ;;  %v943_v10 = vadd.f32 %v927_v17, %v890_v53  ;;  %v944_v21 = vadd.f32 %v928_v2, %v891_v37  ;;  %v945_v25 = vadd.f32 %v929_v27, %v892_v14  ;;  %v6331_v57 = vld [vmem:[#allocation91_spill] sm:$0xff]  ;;  %v6332_v37 = vld [vmem:[#allocation92_spill] sm:$0xff]  ;;  %v6337_v16 = vld [vmem:[#allocation97_spill] sm:$0xff] }
  0xee   : > { %v946_v36 = vadd.f32 %v930_v51, %v893_v20  ;;  %v968_v18 = vmul.f32 %v3125_v22, %v6326_v40  ;;  %v969_v30 = vmul.f32 %v3125_v22, %v6327_v48  ;;  %v970_v63 = vmul.f32 %v3125_v22, %v6328_v61  ;;  %v6333_v20 = vld [vmem:[#allocation93_spill] sm:$0xff]  ;;  %v6336_v8 = vld [vmem:[#allocation96_spill] sm:$0xff]  ;;  %v6338_v39 = vld [vmem:[#allocation98_spill] sm:$0xff] }
  0xef   : > { %v971_v23 = vmul.f32 %v3125_v22, %v6329_v60  ;;  %v972_v15 = vmul.f32 %v3125_v22, %v6330_v33  ;;  %v973_v53 = vmul.f32 %v3125_v22, %v6331_v57  ;;  %v974_v14 = vmul.f32 %v3125_v22, %v6332_v37  ;;  %v3128_v2 = vld [vmem:[%s4033_s29 + $0x45] sm:$0xff]  ;;  %v3129_v61 = vld [vmem:[%s4033_s29 + $0x4d] sm:$0xff] }
  0xf0   : > { %v975_v34 = vmul.f32 %v3125_v22, %v6333_v20  ;;  %v976_v0 = vmul.f32 %v3125_v22, %v6334_v28  ;;  %v977_v52 = vmul.f32 %v3125_v22, %v6335_v56  ;;  %v978_v38 = vmul.f32 %v3125_v22, %v6336_v8  ;;  %v4637_v60 = vld [vmem:[%s4033_s29 + $0x65] sm:$0xff]  ;;  %v4640_v33 = vld [vmem:[%s4033_s29 + $0x6d] sm:$0xff] }
  0xf1   : > { %v979_v50 = vmul.f32 %v3125_v22, %v6337_v16  ;;  %v980_v59 = vmul.f32 %v3125_v22, %v6338_v39  ;;  %v981_v43 = vmul.f32 %v3125_v22, %v4455_v55  ;;  %v982_v17 = vmul.f32 %v3125_v22, %v4613_v12 }
  0xf2   : > { %v983_v31 = vmul.f32 %v3125_v22, %v4616_v42  ;;  %v984_v27 = vadd.f32 %v968_v18, %v931_v62  ;;  %v985_v51 = vadd.f32 %v969_v30, %v932_v6  ;;  %v986_v40 = vadd.f32 %v970_v63, %v933_v26  ;;  %v4643_v22 = vld [vmem:[%s4033_s29 + $0x85] sm:$0xff]  ;;  %v4646_v62 = vld [vmem:[%s4033_s29 + $0x8d] sm:$0xff] }
  0xf3   : > { %v987_v48 = vadd.f32 %v971_v23, %v934_v1  ;;  %v988_v57 = vadd.f32 %v972_v15, %v935_v35  ;;  %v989_v55 = vadd.f32 %v973_v53, %v936_v58  ;;  %v990_v37 = vadd.f32 %v974_v14, %v937_v46  ;;  %v3144_v6 = vld [vmem:[#allocation3 + $0xe] ss:$0 sm:$0xff]  ;;  %v4649_v63 = vld [vmem:[%s4033_s29 + $0xa5] sm:$0xff] }
  0xf4   : > { %v991_v20 = vadd.f32 %v975_v34, %v938_v4  ;;  %v992_v26 = vadd.f32 %v976_v0, %v939_v47  ;;  %v993_v1 = vadd.f32 %v977_v52, %v940_v11  ;;  %v994_v18 = vadd.f32 %v978_v38, %v941_v44  ;;  %v4652_v35 = vld [vmem:[%s4033_s29 + $0xad] sm:$0xff]  ;;  %v4655_v58 = vld [vmem:[%s4033_s29 + $0xc5] sm:$0xff] }
  0xf5   : > { %v995_v30 = vadd.f32 %v979_v50, %v942_v19  ;;  %6339 = vst [vmem:[#allocation17_spill] sm:$0xff] %v4655_v58  ;;  %v996_v46 = vadd.f32 %v980_v59, %v943_v10  ;;  %v997_v4 = vadd.f32 %v981_v43, %v944_v21  ;;  %v998_v23 = vadd.f32 %v982_v17, %v945_v25  ;;  %v4658_v53 = vld [vmem:[%s4033_s29 + $0xcd] sm:$0xff]  ;;  %v4661_v14 = vld [vmem:[%s4033_s29 + $0xe5] sm:$0xff] }
  0xf6   : > { %v999_v15 = vadd.f32 %v983_v31, %v946_v36  ;;  %6340 = vst [vmem:[#allocation21_spill] sm:$0xff] %v4658_v53  ;;  %6341 = vst [vmem:[#allocation14_spill] sm:$0xff] %v4661_v14  ;;  %v4664_v34 = vld [vmem:[%s4033_s29 + $0xed] sm:$0xff]  ;;  %v4667_v47 = vld [vmem:[%s4033_s29 + $0x125] sm:$0xff]  ;;  %v1024_v44 = vmul.f32 %v3144_v6, %v3128_v2  ;;  %v1025_v19 = vmul.f32 %v3144_v6, %v3129_v61 }
  0xf7   : > { %6342 = vst [vmem:[#allocation15_spill] sm:$0xff] %v4664_v34  ;;  %6343 = vst [vmem:[#allocation16_spill] sm:$0xff] %v4667_v47  ;;  %v4670_v11 = vld [vmem:[%s4033_s29 + $0x12d] sm:$0xff]  ;;  %v1026_v28 = vmul.f32 %v3144_v6, %v4637_v60  ;;  %v1027_v10 = vmul.f32 %v3144_v6, %v4640_v33  ;;  %v1028_v21 = vmul.f32 %v3144_v6, %v4643_v22 }
  0xf8   : > { %v1029_v25 = vmul.f32 %v3144_v6, %v4646_v62  ;;  %v1030_v36 = vmul.f32 %v3144_v6, %v4649_v63  ;;  %v1031_v0 = vmul.f32 %v3144_v6, %v4652_v35  ;;  %v1032_v56 = vmul.f32 %v3144_v6, %v4655_v58  ;;  %v3145_v43 = vld [vmem:[%s4033_s29 + $0x46] sm:$0xff] }
  0xf9   : > { %v1033_v52 = vmul.f32 %v3144_v6, %v4658_v53  ;;  %v1034_v8 = vmul.f32 %v3144_v6, %v4661_v14  ;;  %v1035_v38 = vmul.f32 %v3144_v6, %v4664_v34  ;;  %v1036_v16 = vmul.f32 %v3144_v6, %v4472_v3  ;;  %v3146_v14 = vld [vmem:[%s4033_s29 + $0x4e] sm:$0xff]  ;;  %v4689_v34 = vld [vmem:[%s4033_s29 + $0x66] sm:$0xff] }
  0xfa   : > { %v1037_v50 = vmul.f32 %v3144_v6, %v4475_v41  ;;  %v1038_v39 = vmul.f32 %v3144_v6, %v4667_v47  ;;  %v1039_v59 = vmul.f32 %v3144_v6, %v4670_v11  ;;  %v1040_v17 = vadd.f32 %v1024_v44, %v984_v27  ;;  %v4692_v3 = vld [vmem:[%s4033_s29 + $0x6e] sm:$0xff]  ;;  %v4695_v6 = vld [vmem:[%s4033_s29 + $0x86] sm:$0xff] }
  0xfb   : > { %v1041_v31 = vadd.f32 %v1025_v19, %v985_v51  ;;  %v1042_v2 = vadd.f32 %v1026_v28, %v986_v40  ;;  %v1043_v61 = vadd.f32 %v1027_v10, %v987_v48  ;;  %6344 = vst [vmem:[#allocation18_spill] sm:$0xff] %v4692_v3  ;;  %v1044_v53 = vadd.f32 %v1028_v21, %v988_v57  ;;  %v4698_v27 = vld [vmem:[%s4033_s29 + $0x8e] sm:$0xff]  ;;  %v4701_v28 = vld [vmem:[%s4033_s29 + $0xa6] sm:$0xff] }
  0xfc   : > { %v1045_v41 = vadd.f32 %v1029_v25, %v989_v55  ;;  %v1046_v58 = vadd.f32 %v1030_v36, %v990_v37  ;;  %v1047_v47 = vadd.f32 %v1031_v0, %v991_v20  ;;  %6345 = vst [vmem:[#allocation19_spill] sm:$0xff] %v4695_v6  ;;  %6346 = vst [vmem:[#allocation20_spill] sm:$0xff] %v4698_v27  ;;  %v3161_v51 = vld [vmem:[#allocation3 + $0xf] ss:$0 sm:$0xff]  ;;  %v4707_v55 = vld [vmem:[%s4033_s29 + $0xc6] sm:$0xff] }
  0xfd   : > { %v1048_v40 = vadd.f32 %v1032_v56, %v992_v26  ;;  %v1049_v48 = vadd.f32 %v1033_v52, %v993_v1  ;;  %v1050_v44 = vadd.f32 %v1034_v8, %v994_v18  ;;  %v1051_v19 = vadd.f32 %v1035_v38, %v995_v30  ;;  %6347 = vst [vmem:[#allocation22_spill] sm:$0xff] %v4701_v28  ;;  %v4704_v57 = vld [vmem:[%s4033_s29 + $0xae] sm:$0xff]  ;;  %v4713_v36 = vld [vmem:[%s4033_s29 + $0xe6] sm:$0xff] }
  0xfe   : > { %6348 = vst [vmem:[#allocation23_spill] sm:$0xff] %v4704_v57  ;;  %6349 = vst [vmem:[#allocation24_spill] sm:$0xff] %v4707_v55  ;;  %v1052_v37 = vadd.f32 %v1036_v16, %v996_v46  ;;  %v1053_v20 = vadd.f32 %v1037_v50, %v997_v4  ;;  %v1054_v10 = vadd.f32 %v1038_v39, %v998_v23  ;;  %v4710_v25 = vld [vmem:[%s4033_s29 + $0xce] sm:$0xff]  ;;  %v4719_v26 = vld [vmem:[%s4033_s29 + $0x126] sm:$0xff] }
  0xff   : > { %v1055_v21 = vadd.f32 %v1039_v59, %v999_v15  ;;  %6350 = vst [vmem:[#allocation25_spill] sm:$0xff] %v4710_v25  ;;  %6351 = vst [vmem:[#allocation26_spill] sm:$0xff] %v4713_v36  ;;  %v4716_v0 = vld [vmem:[%s4033_s29 + $0xee] sm:$0xff]  ;;  %v1077_v18 = vmul.f32 %v3161_v51, %v3145_v43  ;;  %v1078_v30 = vmul.f32 %v3161_v51, %v3146_v14 }
 0x100   : > { %6352 = vst [vmem:[#allocation27_spill] sm:$0xff] %v4716_v0  ;;  %6353 = vst [vmem:[#allocation28_spill] sm:$0xff] %v4719_v26  ;;  %v4722_v1 = vld [vmem:[%s4033_s29 + $0x12e] sm:$0xff]  ;;  %v1079_v56 = vmul.f32 %v3161_v51, %v4689_v34  ;;  %v1080_v46 = vmul.f32 %v3161_v51, %v4692_v3  ;;  %v1081_v4 = vmul.f32 %v3161_v51, %v4695_v6 }
 0x101   : > { %v1082_v23 = vmul.f32 %v3161_v51, %v4698_v27  ;;  %v1083_v15 = vmul.f32 %v3161_v51, %v4701_v28  ;;  %v1084_v52 = vmul.f32 %v3161_v51, %v4704_v57  ;;  %v1085_v8 = vmul.f32 %v3161_v51, %v4707_v55  ;;  %v3162_v57 = vld [vmem:[%s4033_s29 + $0x47] sm:$0xff] }
 0x102   : > { %v1086_v38 = vmul.f32 %v3161_v51, %v4710_v25  ;;  %v1087_v14 = vmul.f32 %v3161_v51, %v4713_v36  ;;  %v1088_v16 = vmul.f32 %v3161_v51, %v4716_v0  ;;  %v1089_v50 = vmul.f32 %v3161_v51, %v4503_v13  ;;  %v3163_v36 = vld [vmem:[%s4033_s29 + $0x4f] sm:$0xff]  ;;  %v4741_v0 = vld [vmem:[%s4033_s29 + $0x67] sm:$0xff] }
 0x103   : > { %v1090_v39 = vmul.f32 %v3161_v51, %v4506_v24  ;;  %v1091_v59 = vmul.f32 %v3161_v51, %v4719_v26  ;;  %v1092_v43 = vmul.f32 %v3161_v51, %v4722_v1  ;;  %v1093_v28 = vadd.f32 %v1077_v18, %v1040_v17  ;;  %v4744_v13 = vld [vmem:[%s4033_s29 + $0x6f] sm:$0xff]  ;;  %v4747_v51 = vld [vmem:[%s4033_s29 + $0x87] sm:$0xff] }
 0x104   : > { %v1094_v27 = vadd.f32 %v1078_v30, %v1041_v31  ;;  %v1095_v55 = vadd.f32 %v1079_v56, %v1042_v2  ;;  %v1096_v25 = vadd.f32 %v1080_v46, %v1043_v61  ;;  %6354 = vst [vmem:[#allocation29_spill] sm:$0xff] %v4744_v13  ;;  %v1097_v6 = vadd.f32 %v1081_v4, %v1044_v53  ;;  %v4750_v17 = vld [vmem:[%s4033_s29 + $0x8f] sm:$0xff]  ;;  %v4753_v56 = vld [vmem:[%s4033_s29 + $0xa7] sm:$0xff] }
 0x105   : > { %v1098_v24 = vadd.f32 %v1082_v23, %v1045_v41  ;;  %v1099_v3 = vadd.f32 %v1083_v15, %v1046_v58  ;;  %v1100_v26 = vadd.f32 %v1084_v52, %v1047_v47  ;;  %6355 = vst [vmem:[#allocation30_spill] sm:$0xff] %v4747_v51  ;;  %6356 = vst [vmem:[#allocation31_spill] sm:$0xff] %v4750_v17  ;;  %v3178_v31 = vld [vmem:[#allocation3 + $0x10] ss:$0 sm:$0xff]  ;;  %v4759_v58 = vld [vmem:[%s4033_s29 + $0xc7] sm:$0xff] }
 0x106   : > { %v1101_v2 = vadd.f32 %v1085_v8, %v1048_v40  ;;  %v1102_v61 = vadd.f32 %v1086_v38, %v1049_v48  ;;  %v1103_v18 = vadd.f32 %v1087_v14, %v1050_v44  ;;  %v1104_v30 = vadd.f32 %v1088_v16, %v1051_v19  ;;  %6357 = vst [vmem:[#allocation32_spill] sm:$0xff] %v4753_v56  ;;  %v4756_v53 = vld [vmem:[%s4033_s29 + $0xaf] sm:$0xff]  ;;  %v4765_v15 = vld [vmem:[%s4033_s29 + $0xe7] sm:$0xff] }
 0x107   : > { %6358 = vst [vmem:[#allocation33_spill] sm:$0xff] %v4756_v53  ;;  %6359 = vst [vmem:[#allocation34_spill] sm:$0xff] %v4759_v58  ;;  %v1105_v47 = vadd.f32 %v1089_v50, %v1052_v37  ;;  %v1106_v41 = vadd.f32 %v1090_v39, %v1053_v20  ;;  %v1107_v46 = vadd.f32 %v1091_v59, %v1054_v10  ;;  %v4762_v23 = vld [vmem:[%s4033_s29 + $0xcf] sm:$0xff]  ;;  %v4771_v40 = vld [vmem:[%s4033_s29 + $0x127] sm:$0xff] }
 0x108   : > { %v1108_v4 = vadd.f32 %v1092_v43, %v1055_v21  ;;  %6360 = vst [vmem:[#allocation35_spill] sm:$0xff] %v4762_v23  ;;  %6361 = vst [vmem:[#allocation36_spill] sm:$0xff] %v4765_v15  ;;  %v4768_v52 = vld [vmem:[%s4033_s29 + $0xef] sm:$0xff]  ;;  %v1130_v44 = vmul.f32 %v3178_v31, %v3162_v57  ;;  %v1131_v19 = vmul.f32 %v3178_v31, %v3163_v36 }
 0x109   : > { %6362 = vst [vmem:[#allocation37_spill] sm:$0xff] %v4768_v52  ;;  %6363 = vst [vmem:[#allocation38_spill] sm:$0xff] %v4771_v40  ;;  %v4774_v48 = vld [vmem:[%s4033_s29 + $0x12f] sm:$0xff]  ;;  %v1132_v8 = vmul.f32 %v3178_v31, %v4741_v0  ;;  %v1133_v37 = vmul.f32 %v3178_v31, %v4744_v13  ;;  %v1134_v20 = vmul.f32 %v3178_v31, %v4747_v51 }
 0x10a   : > { %v1135_v10 = vmul.f32 %v3178_v31, %v4750_v17  ;;  %v1136_v21 = vmul.f32 %v3178_v31, %v4753_v56  ;;  %v1137_v38 = vmul.f32 %v3178_v31, %v4756_v53  ;;  %v1138_v14 = vmul.f32 %v3178_v31, %v4759_v58  ;;  %v3179_v53 = vld [vmem:[%s4033_s29 + $0x48] sm:$0xff] }
 0x10b   : > { %v1139_v57 = vmul.f32 %v3178_v31, %v4762_v23  ;;  %v1140_v36 = vmul.f32 %v3178_v31, %v4765_v15  ;;  %v1141_v16 = vmul.f32 %v3178_v31, %v4768_v52  ;;  %v1142_v50 = vmul.f32 %v3178_v31, %v4525_v5  ;;  %v3180_v15 = vld [vmem:[%s4033_s29 + $0x50] sm:$0xff]  ;;  %v4793_v52 = vld [vmem:[%s4033_s29 + $0x68] sm:$0xff] }
 0x10c   : > { %v1143_v39 = vmul.f32 %v3178_v31, %v4528_v9  ;;  %v1144_v59 = vmul.f32 %v3178_v31, %v4771_v40  ;;  %v1145_v43 = vmul.f32 %v3178_v31, %v4774_v48  ;;  %v1146_v56 = vadd.f32 %v1130_v44, %v1093_v28  ;;  %v4796_v5 = vld [vmem:[%s4033_s29 + $0x70] sm:$0xff]  ;;  %v4799_v31 = vld [vmem:[%s4033_s29 + $0x88] sm:$0xff] }
 0x10d   : > { %v1147_v17 = vadd.f32 %v1131_v19, %v1094_v27  ;;  %v1148_v58 = vadd.f32 %v1132_v8, %v1095_v55  ;;  %v1149_v23 = vadd.f32 %v1133_v37, %v1096_v25  ;;  %6364 = vst [vmem:[#allocation39_spill] sm:$0xff] %v4796_v5  ;;  %v1150_v51 = vadd.f32 %v1134_v20, %v1097_v6  ;;  %v4802_v27 = vld [vmem:[%s4033_s29 + $0x90] sm:$0xff]  ;;  %v4805_v8 = vld [vmem:[%s4033_s29 + $0xa8] sm:$0xff] }
 0x10e   : > { %v1151_v9 = vadd.f32 %v1135_v10, %v1098_v24  ;;  %v1152_v13 = vadd.f32 %v1136_v21, %v1099_v3  ;;  %v1153_v40 = vadd.f32 %v1137_v38, %v1100_v26  ;;  %6365 = vst [vmem:[#allocation40_spill] sm:$0xff] %v4799_v31  ;;  %6366 = vst [vmem:[#allocation41_spill] sm:$0xff] %v4802_v27  ;;  %v3195_v28 = vld [vmem:[#allocation3 + $0x11] ss:$0 sm:$0xff]  ;;  %v4811_v3 = vld [vmem:[%s4033_s29 + $0xc8] sm:$0xff] }
 0x10f   : > { %v1154_v55 = vadd.f32 %v1138_v14, %v1101_v2  ;;  %v1155_v25 = vadd.f32 %v1139_v57, %v1102_v61  ;;  %v1156_v44 = vadd.f32 %v1140_v36, %v1103_v18  ;;  %v1157_v19 = vadd.f32 %v1141_v16, %v1104_v30  ;;  %6367 = vst [vmem:[#allocation42_spill] sm:$0xff] %v4805_v8  ;;  %v4808_v6 = vld [vmem:[%s4033_s29 + $0xb0] sm:$0xff]  ;;  %v4817_v21 = vld [vmem:[%s4033_s29 + $0xe8] sm:$0xff] }
 0x110   : > { %6368 = vst [vmem:[#allocation43_spill] sm:$0xff] %v4808_v6  ;;  %6369 = vst [vmem:[#allocation44_spill] sm:$0xff] %v4811_v3  ;;  %v1158_v26 = vadd.f32 %v1142_v50, %v1105_v47  ;;  %v1159_v24 = vadd.f32 %v1143_v39, %v1106_v41  ;;  %v1160_v37 = vadd.f32 %v1144_v59, %v1107_v46  ;;  %v4814_v10 = vld [vmem:[%s4033_s29 + $0xd0] sm:$0xff]  ;;  %v4823_v2 = vld [vmem:[%s4033_s29 + $0x128] sm:$0xff] }
 0x111   : > { %v1161_v20 = vadd.f32 %v1145_v43, %v1108_v4  ;;  %6370 = vst [vmem:[#allocation45_spill] sm:$0xff] %v4814_v10  ;;  %6371 = vst [vmem:[#allocation46_spill] sm:$0xff] %v4817_v21  ;;  %v4820_v38 = vld [vmem:[%s4033_s29 + $0xf0] sm:$0xff]  ;;  %v1183_v18 = vmul.f32 %v3195_v28, %v3179_v53  ;;  %v1184_v30 = vmul.f32 %v3195_v28, %v3180_v15 }
 0x112   : > { %6372 = vst [vmem:[#allocation47_spill] sm:$0xff] %v4820_v38  ;;  %6373 = vst [vmem:[#allocation48_spill] sm:$0xff] %v4823_v2  ;;  %v4826_v61 = vld [vmem:[%s4033_s29 + $0x130] sm:$0xff]  ;;  %v1185_v14 = vmul.f32 %v3195_v28, %v4793_v52  ;;  %v1186_v47 = vmul.f32 %v3195_v28, %v4796_v5  ;;  %v1187_v41 = vmul.f32 %v3195_v28, %v4799_v31 }
 0x113   : > { %v1188_v46 = vmul.f32 %v3195_v28, %v4802_v27  ;;  %v1189_v4 = vmul.f32 %v3195_v28, %v4805_v8  ;;  %v1190_v57 = vmul.f32 %v3195_v28, %v4808_v6  ;;  %v1191_v36 = vmul.f32 %v3195_v28, %v4811_v3  ;;  %v3196_v6 = vld [vmem:[%s4033_s29 + $0x49] sm:$0xff] }
 0x114   : > { %v1192_v53 = vmul.f32 %v3195_v28, %v4814_v10  ;;  %v1193_v15 = vmul.f32 %v3195_v28, %v4817_v21  ;;  %v1194_v16 = vmul.f32 %v3195_v28, %v4820_v38  ;;  %v1195_v50 = vmul.f32 %v3195_v28, %v4547_v7  ;;  %v3197_v21 = vld [vmem:[%s4033_s29 + $0x51] sm:$0xff]  ;;  %v4845_v38 = vld [vmem:[%s4033_s29 + $0x69] sm:$0xff] }
 0x115   : > { %v1196_v39 = vmul.f32 %v3195_v28, %v4550_v49  ;;  %v1197_v59 = vmul.f32 %v3195_v28, %v4823_v2  ;;  %v1198_v43 = vmul.f32 %v3195_v28, %v4826_v61  ;;  %v1199_v8 = vadd.f32 %v1183_v18, %v1146_v56  ;;  %v4848_v7 = vld [vmem:[%s4033_s29 + $0x71] sm:$0xff]  ;;  %v4851_v28 = vld [vmem:[%s4033_s29 + $0x89] sm:$0xff] }
 0x116   : > { %v1200_v27 = vadd.f32 %v1184_v30, %v1147_v17  ;;  %v1201_v3 = vadd.f32 %v1185_v14, %v1148_v58  ;;  %v1202_v10 = vadd.f32 %v1186_v47, %v1149_v23  ;;  %6374 = vst [vmem:[#allocation49_spill] sm:$0xff] %v4848_v7  ;;  %v1203_v31 = vadd.f32 %v1187_v41, %v1150_v51  ;;  %v4854_v17 = vld [vmem:[%s4033_s29 + $0x91] sm:$0xff]  ;;  %v4857_v14 = vld [vmem:[%s4033_s29 + $0xa9] sm:$0xff] }
 0x117   : > { %v1204_v49 = vadd.f32 %v1188_v46, %v1151_v9  ;;  %v1205_v5 = vadd.f32 %v1189_v4, %v1152_v13  ;;  %v1206_v2 = vadd.f32 %v1190_v57, %v1153_v40  ;;  %6375 = vst [vmem:[#allocation50_spill] sm:$0xff] %v4851_v28  ;;  %6376 = vst [vmem:[#allocation51_spill] sm:$0xff] %v4854_v17  ;;  %v3212_v56 = vld [vmem:[#allocation3 + $0x12] ss:$0 sm:$0xff]  ;;  %v4863_v13 = vld [vmem:[%s4033_s29 + $0xc9] sm:$0xff] }
 0x118   : > { %v1207_v58 = vadd.f32 %v1191_v36, %v1154_v55  ;;  %v1208_v23 = vadd.f32 %v1192_v53, %v1155_v25  ;;  %v1209_v18 = vadd.f32 %v1193_v15, %v1156_v44  ;;  %v1210_v30 = vadd.f32 %v1194_v16, %v1157_v19  ;;  %6377 = vst [vmem:[#allocation52_spill] sm:$0xff] %v4857_v14  ;;  %v4860_v51 = vld [vmem:[%s4033_s29 + $0xb1] sm:$0xff]  ;;  %v4869_v4 = vld [vmem:[%s4033_s29 + $0xe9] sm:$0xff] }
 0x119   : > { %6378 = vst [vmem:[#allocation53_spill] sm:$0xff] %v4860_v51  ;;  %6379 = vst [vmem:[#allocation54_spill] sm:$0xff] %v4863_v13  ;;  %v1211_v40 = vadd.f32 %v1195_v50, %v1158_v26  ;;  %v1212_v9 = vadd.f32 %v1196_v39, %v1159_v24  ;;  %v1213_v47 = vadd.f32 %v1197_v59, %v1160_v37  ;;  %v4866_v46 = vld [vmem:[%s4033_s29 + $0xd1] sm:$0xff]  ;;  %v4875_v55 = vld [vmem:[%s4033_s29 + $0x129] sm:$0xff] }
 0x11a   : > { %v1214_v41 = vadd.f32 %v1198_v43, %v1161_v20  ;;  %6380 = vst [vmem:[#allocation55_spill] sm:$0xff] %v4866_v46  ;;  %6381 = vst [vmem:[#allocation56_spill] sm:$0xff] %v4869_v4  ;;  %v4872_v57 = vld [vmem:[%s4033_s29 + $0xf1] sm:$0xff]  ;;  %v1236_v44 = vmul.f32 %v3212_v56, %v3196_v6  ;;  %v1237_v19 = vmul.f32 %v3212_v56, %v3197_v21 }
 0x11b   : > { %6382 = vst [vmem:[#allocation57_spill] sm:$0xff] %v4872_v57  ;;  %6383 = vst [vmem:[#allocation58_spill] sm:$0xff] %v4875_v55  ;;  %v4878_v25 = vld [vmem:[%s4033_s29 + $0x131] sm:$0xff]  ;;  %v1238_v36 = vmul.f32 %v3212_v56, %v4845_v38  ;;  %v1239_v26 = vmul.f32 %v3212_v56, %v4848_v7  ;;  %v1240_v24 = vmul.f32 %v3212_v56, %v4851_v28 }
 0x11c   : > { %v1241_v37 = vmul.f32 %v3212_v56, %v4854_v17  ;;  %v1242_v20 = vmul.f32 %v3212_v56, %v4857_v14  ;;  %v1243_v53 = vmul.f32 %v3212_v56, %v4860_v51  ;;  %v1244_v15 = vmul.f32 %v3212_v56, %v4863_v13  ;;  %v3213_v51 = vld [vmem:[%s4033_s29 + $0x4a] sm:$0xff] }
 0x11d   : > { %v1245_v6 = vmul.f32 %v3212_v56, %v4866_v46  ;;  %v1246_v21 = vmul.f32 %v3212_v56, %v4869_v4  ;;  %v1247_v16 = vmul.f32 %v3212_v56, %v4872_v57  ;;  %v1248_v50 = vmul.f32 %v3212_v56, %v4569_v32  ;;  %v3214_v4 = vld [vmem:[%s4033_s29 + $0x52] sm:$0xff]  ;;  %v4897_v57 = vld [vmem:[%s4033_s29 + $0x6a] sm:$0xff] }
 0x11e   : > { %v1249_v39 = vmul.f32 %v3212_v56, %v4572_v54  ;;  %v1250_v59 = vmul.f32 %v3212_v56, %v4875_v55  ;;  %v1251_v43 = vmul.f32 %v3212_v56, %v4878_v25  ;;  %v1252_v14 = vadd.f32 %v1236_v44, %v1199_v8  ;;  %6384 = vst [vmem:[#allocation59_spill] sm:$0xff] %v4897_v57  ;;  %v4900_v32 = vld [vmem:[%s4033_s29 + $0x72] sm:$0xff]  ;;  %v4903_v56 = vld [vmem:[%s4033_s29 + $0x8a] sm:$0xff] }
 0x11f   : > { %v1253_v17 = vadd.f32 %v1237_v19, %v1200_v27  ;;  %v1254_v13 = vadd.f32 %v1238_v36, %v1201_v3  ;;  %v1255_v46 = vadd.f32 %v1239_v26, %v1202_v10  ;;  %6385 = vst [vmem:[#allocation60_spill] sm:$0xff] %v4900_v32  ;;  %v1256_v28 = vadd.f32 %v1240_v24, %v1203_v31  ;;  %v4906_v27 = vld [vmem:[%s4033_s29 + $0x92] sm:$0xff]  ;;  %v4909_v36 = vld [vmem:[%s4033_s29 + $0xaa] sm:$0xff] }
 0x120   : > { %v1257_v54 = vadd.f32 %v1241_v37, %v1204_v49  ;;  %v1258_v7 = vadd.f32 %v1242_v20, %v1205_v5  ;;  %v1259_v55 = vadd.f32 %v1243_v53, %v1206_v2  ;;  %6386 = vst [vmem:[#allocation61_spill] sm:$0xff] %v4903_v56  ;;  %6387 = vst [vmem:[#allocation62_spill] sm:$0xff] %v4906_v27  ;;  %v3229_v8 = vld [vmem:[#allocation3 + $0x13] ss:$0 sm:$0xff]  ;;  %v4915_v5 = vld [vmem:[%s4033_s29 + $0xca] sm:$0xff] }
 0x121   : > { %v1260_v3 = vadd.f32 %v1244_v15, %v1207_v58  ;;  %v1261_v10 = vadd.f32 %v1245_v6, %v1208_v23  ;;  %v1262_v44 = vadd.f32 %v1246_v21, %v1209_v18  ;;  %v1263_v19 = vadd.f32 %v1247_v16, %v1210_v30  ;;  %6388 = vst [vmem:[#allocation63_spill] sm:$0xff] %v4909_v36  ;;  %v4912_v31 = vld [vmem:[%s4033_s29 + $0xb2] sm:$0xff]  ;;  %v4921_v20 = vld [vmem:[%s4033_s29 + $0xea] sm:$0xff] }
 0x122   : > { %6389 = vst [vmem:[#allocation64_spill] sm:$0xff] %v4912_v31  ;;  %6390 = vst [vmem:[#allocation65_spill] sm:$0xff] %v4915_v5  ;;  %v1264_v2 = vadd.f32 %v1248_v50, %v1211_v40  ;;  %v1265_v49 = vadd.f32 %v1249_v39, %v1212_v9  ;;  %v1266_v26 = vadd.f32 %v1250_v59, %v1213_v47  ;;  %v4918_v37 = vld [vmem:[%s4033_s29 + $0xd2] sm:$0xff]  ;;  %v4927_v58 = vld [vmem:[%s4033_s29 + $0x12a] sm:$0xff] }
 0x123   : > { %v1267_v24 = vadd.f32 %v1251_v43, %v1214_v41  ;;  %6391 = vst [vmem:[#allocation66_spill] sm:$0xff] %v4918_v37  ;;  %6392 = vst [vmem:[#allocation67_spill] sm:$0xff] %v4921_v20  ;;  %v4924_v53 = vld [vmem:[%s4033_s29 + $0xf2] sm:$0xff]  ;;  %v1289_v18 = vmul.f32 %v3229_v8, %v3213_v51  ;;  %v1290_v30 = vmul.f32 %v3229_v8, %v3214_v4 }
 0x124   : > { %6393 = vst [vmem:[#allocation68_spill] sm:$0xff] %v4924_v53  ;;  %6394 = vst [vmem:[#allocation69_spill] sm:$0xff] %v4927_v58  ;;  %v4930_v23 = vld [vmem:[%s4033_s29 + $0x132] sm:$0xff]  ;;  %v1291_v15 = vmul.f32 %v3229_v8, %v4897_v57  ;;  %v1292_v40 = vmul.f32 %v3229_v8, %v4900_v32  ;;  %v1293_v9 = vmul.f32 %v3229_v8, %v4903_v56 }
 0x125   : > { %6395 = vst [vmem:[#allocation70_spill] sm:$0xff] %v4930_v23  ;;  %v1294_v47 = vmul.f32 %v3229_v8, %v4906_v27  ;;  %v1295_v41 = vmul.f32 %v3229_v8, %v4909_v36  ;;  %v1296_v6 = vmul.f32 %v3229_v8, %v4912_v31  ;;  %v1297_v21 = vmul.f32 %v3229_v8, %v4915_v5  ;;  %v3230_v31 = vld [vmem:[%s4033_s29 + $0x4b] sm:$0xff] }
 0x126   : > { %v1298_v51 = vmul.f32 %v3229_v8, %v4918_v37  ;;  %v1299_v4 = vmul.f32 %v3229_v8, %v4921_v20  ;;  %v1300_v16 = vmul.f32 %v3229_v8, %v4924_v53  ;;  %v1301_v50 = vmul.f32 %v3229_v8, %v4591_v45  ;;  %v3231_v20 = vld [vmem:[%s4033_s29 + $0x53] sm:$0xff]  ;;  %v4949_v53 = vld [vmem:[%s4033_s29 + $0x6b] sm:$0xff] }
 0x127   : > { %v1302_v39 = vmul.f32 %v3229_v8, %v4594_v29  ;;  %v1303_v59 = vmul.f32 %v3229_v8, %v4927_v58  ;;  %v1304_v43 = vmul.f32 %v3229_v8, %v4930_v23  ;;  %v1305_v36 = vadd.f32 %v1289_v18, %v1252_v14  ;;  %6396 = vst [vmem:[#allocation71_spill] sm:$0xff] %v4949_v53  ;;  %v4952_v45 = vld [vmem:[%s4033_s29 + $0x73] sm:$0xff]  ;;  %v4955_v8 = vld [vmem:[%s4033_s29 + $0x8b] sm:$0xff] }
 0x128   : > { %v1306_v27 = vadd.f32 %v1290_v30, %v1253_v17  ;;  %v1307_v5 = vadd.f32 %v1291_v15, %v1254_v13  ;;  %v1308_v37 = vadd.f32 %v1292_v40, %v1255_v46  ;;  %6397 = vst [vmem:[#allocation72_spill] sm:$0xff] %v4952_v45  ;;  %v1309_v56 = vadd.f32 %v1293_v9, %v1256_v28  ;;  %v4958_v17 = vld [vmem:[%s4033_s29 + $0x93] sm:$0xff]  ;;  %v4961_v15 = vld [vmem:[%s4033_s29 + $0xab] sm:$0xff] }
 0x129   : > { %v1310_v29 = vadd.f32 %v1294_v47, %v1257_v54  ;;  %v1311_v32 = vadd.f32 %v1295_v41, %v1258_v7  ;;  %v1312_v58 = vadd.f32 %v1296_v6, %v1259_v55  ;;  %6398 = vst [vmem:[#allocation73_spill] sm:$0xff] %v4955_v8  ;;  %6399 = vst [vmem:[#allocation74_spill] sm:$0xff] %v4958_v17  ;;  %v3246_v14 = vld [vmem:[#allocation3 + $0x14] ss:$0 sm:$0xff]  ;;  %v4967_v7 = vld [vmem:[%s4033_s29 + $0xcb] sm:$0xff] }
 0x12a   : > { %v1313_v13 = vadd.f32 %v1297_v21, %v1260_v3  ;;  %v1314_v46 = vadd.f32 %v1298_v51, %v1261_v10  ;;  %v1315_v18 = vadd.f32 %v1299_v4, %v1262_v44  ;;  %v1316_v30 = vadd.f32 %v1300_v16, %v1263_v19  ;;  %6400 = vst [vmem:[#allocation75_spill] sm:$0xff] %v4961_v15  ;;  %v4964_v28 = vld [vmem:[%s4033_s29 + $0xb3] sm:$0xff]  ;;  %v4973_v41 = vld [vmem:[%s4033_s29 + $0xeb] sm:$0xff] }
 0x12b   : > { %6401 = vst [vmem:[#allocation76_spill] sm:$0xff] %v4964_v28  ;;  %6402 = vst [vmem:[#allocation77_spill] sm:$0xff] %v4967_v7  ;;  %v1317_v55 = vadd.f32 %v1301_v50, %v1264_v2  ;;  %v1318_v54 = vadd.f32 %v1302_v39, %v1265_v49  ;;  %v1319_v40 = vadd.f32 %v1303_v59, %v1266_v26  ;;  %v4970_v47 = vld [vmem:[%s4033_s29 + $0xd3] sm:$0xff]  ;;  %v4979_v3 = vld [vmem:[%s4033_s29 + $0x12b] sm:$0xff] }
 0x12c   : > { %v1320_v9 = vadd.f32 %v1304_v43, %v1267_v24  ;;  %6403 = vst [vmem:[#allocation78_spill] sm:$0xff] %v4970_v47  ;;  %6404 = vst [vmem:[#allocation79_spill] sm:$0xff] %v4973_v41  ;;  %v4976_v6 = vld [vmem:[%s4033_s29 + $0xf3] sm:$0xff]  ;;  %v1342_v44 = vmul.f32 %v3246_v14, %v3230_v31  ;;  %v1343_v19 = vmul.f32 %v3246_v14, %v3231_v20 }
 0x12d   : > { %6405 = vst [vmem:[#allocation80_spill] sm:$0xff] %v4976_v6  ;;  %6406 = vst [vmem:[#allocation81_spill] sm:$0xff] %v4979_v3  ;;  %v4982_v10 = vld [vmem:[%s4033_s29 + $0x133] sm:$0xff]  ;;  %v1344_v21 = vmul.f32 %v3246_v14, %v4949_v53  ;;  %v1345_v51 = vmul.f32 %v3246_v14, %v4952_v45  ;;  %v1346_v2 = vmul.f32 %v3246_v14, %v4955_v8 }
 0x12e   : > { %v1347_v49 = vmul.f32 %v3246_v14, %v4958_v17  ;;  %v1348_v26 = vmul.f32 %v3246_v14, %v4961_v15  ;;  %v1349_v24 = vmul.f32 %v3246_v14, %v4964_v28  ;;  %v1350_v4 = vmul.f32 %v3246_v14, %v4967_v7  ;;  %v3265_v45 = vld [vmem:[#allocation3 + $0x15] ss:$0 sm:$0xff] }
 0x12f   : > { %v1351_v16 = vmul.f32 %v3246_v14, %v4970_v47  ;;  %v1352_v50 = vmul.f32 %v3246_v14, %v4973_v41  ;;  %v1353_v31 = vmul.f32 %v3246_v14, %v4976_v6  ;;  %v1354_v20 = vmul.f32 %v3246_v14, %v4613_v12 }
 0x130   : > { %v1355_v39 = vmul.f32 %v3246_v14, %v4616_v42  ;;  %v1356_v59 = vmul.f32 %v3246_v14, %v4979_v3  ;;  %v1357_v43 = vmul.f32 %v3246_v14, %v4982_v10  ;;  %v1358_v17 = vadd.f32 %v1342_v44, %v1305_v36 }
 0x131   : > { %v1359_v15 = vadd.f32 %v1343_v19, %v1306_v27  ;;  %v1360_v28 = vadd.f32 %v1344_v21, %v1307_v5  ;;  %v1361_v7 = vadd.f32 %v1345_v51, %v1308_v37  ;;  %v1362_v47 = vadd.f32 %v1346_v2, %v1309_v56  ;;  %v4999_v27 = vld [vmem:[%s4033_s29 + $0x105] sm:$0xff]  ;;  %v5002_v5 = vld [vmem:[%s4033_s29 + $0x10d] sm:$0xff] }
 0x132   : > { %v1363_v41 = vadd.f32 %v1347_v49, %v1310_v29  ;;  %v1364_v8 = vadd.f32 %v1348_v26, %v1311_v32  ;;  %v1365_v6 = vadd.f32 %v1349_v24, %v1312_v58  ;;  %v1366_v12 = vadd.f32 %v1350_v4, %v1313_v13  ;;  %v5005_v37 = vld [vmem:[%s4033_s29 + $0x145] sm:$0xff]  ;;  %v5008_v56 = vld [vmem:[%s4033_s29 + $0x14d] sm:$0xff] }
 0x133   : > { %v1367_v53 = vadd.f32 %v1351_v16, %v1314_v46  ;;  %v1368_v42 = vadd.f32 %v1352_v50, %v1315_v18  ;;  %v1369_v23 = vadd.f32 %v1353_v31, %v1316_v30  ;;  %v1370_v3 = vadd.f32 %v1354_v20, %v1317_v55  ;;  %v6407_v30 = vld [vmem:[#allocation17_spill] sm:$0xff]  ;;  %v6410_v19 = vld [vmem:[#allocation15_spill] sm:$0xff]  ;;  %v6411_v51 = vld [vmem:[#allocation16_spill] sm:$0xff] }
 0x134   : > { %v1371_v57 = vadd.f32 %v1355_v39, %v1318_v54  ;;  %v1372_v14 = vadd.f32 %v1356_v59, %v1319_v40  ;;  %v1373_v36 = vadd.f32 %v1357_v43, %v1320_v9  ;;  %v1398_v32 = vmul.f32 %v3265_v45, %v4637_v60  ;;  %v6408_v54 = vld [vmem:[#allocation21_spill] sm:$0xff]  ;;  %v6409_v9 = vld [vmem:[#allocation14_spill] sm:$0xff]  ;;  %v3282_v20 = vld [vmem:[#allocation3 + $0x16] ss:$0 sm:$0xff] }
 0x135   : > { %v1399_v58 = vmul.f32 %v3265_v45, %v4640_v33  ;;  %v1400_v29 = vmul.f32 %v3265_v45, %v4643_v22  ;;  %v1401_v13 = vmul.f32 %v3265_v45, %v4646_v62  ;;  %v1402_v46 = vmul.f32 %v3265_v45, %v4649_v63 }
 0x136   : > { %v1403_v18 = vmul.f32 %v3265_v45, %v4652_v35  ;;  %v1404_v55 = vmul.f32 %v3265_v45, %v6407_v30  ;;  %v1405_v40 = vmul.f32 %v3265_v45, %v6408_v54  ;;  %v1406_v44 = vmul.f32 %v3265_v45, %v6409_v9 }
 0x137   : > { %v1407_v21 = vmul.f32 %v3265_v45, %v6410_v19  ;;  %v1408_v60 = vmul.f32 %v3265_v45, %v4999_v27  ;;  %v1409_v33 = vmul.f32 %v3265_v45, %v5002_v5  ;;  %v1410_v22 = vmul.f32 %v3265_v45, %v6411_v51 }
 0x138   : > { %v1411_v62 = vmul.f32 %v3265_v45, %v4670_v11  ;;  %v1412_v63 = vmul.f32 %v3265_v45, %v5005_v37  ;;  %v1413_v35 = vmul.f32 %v3265_v45, %v5008_v56  ;;  %v1414_v2 = vadd.f32 %v1398_v32, %v1358_v17  ;;  %v6417_v32 = vld [vmem:[#allocation24_spill] sm:$0xff] }
 0x139   : > { %v1415_v49 = vadd.f32 %v1399_v58, %v1359_v15  ;;  %v1416_v26 = vadd.f32 %v1400_v29, %v1360_v28  ;;  %v1417_v24 = vadd.f32 %v1401_v13, %v1361_v7  ;;  %v1418_v4 = vadd.f32 %v1402_v46, %v1362_v47  ;;  %v5027_v15 = vld [vmem:[%s4033_s29 + $0x106] sm:$0xff]  ;;  %v5030_v28 = vld [vmem:[%s4033_s29 + $0x10e] sm:$0xff]  ;;  %v6418_v29 = vld [vmem:[#allocation25_spill] sm:$0xff] }
 0x13a   : > { %v1419_v16 = vadd.f32 %v1403_v18, %v1363_v41  ;;  %v1420_v50 = vadd.f32 %v1404_v55, %v1364_v8  ;;  %v1421_v31 = vadd.f32 %v1405_v40, %v1365_v6  ;;  %v1422_v39 = vadd.f32 %v1406_v44, %v1366_v12  ;;  %v5033_v7 = vld [vmem:[%s4033_s29 + $0x146] sm:$0xff]  ;;  %v5036_v47 = vld [vmem:[%s4033_s29 + $0x14e] sm:$0xff] }
 0x13b   : > { %v1423_v59 = vadd.f32 %v1407_v21, %v1367_v53  ;;  %v1424_v11 = vadd.f32 %v1408_v60, %v1368_v42  ;;  %v1425_v43 = vadd.f32 %v1409_v33, %v1369_v23  ;;  %v1426_v30 = vadd.f32 %v1410_v22, %v1370_v3  ;;  %v6412_v41 = vld [vmem:[#allocation18_spill] sm:$0xff]  ;;  %v6413_v12 = vld [vmem:[#allocation19_spill] sm:$0xff]  ;;  %v6414_v42 = vld [vmem:[#allocation20_spill] sm:$0xff] }
 0x13c   : > { %v1427_v54 = vadd.f32 %v1411_v62, %v1371_v57  ;;  %v1428_v45 = vadd.f32 %v1412_v63, %v1372_v14  ;;  %v1429_v17 = vadd.f32 %v1413_v35, %v1373_v36  ;;  %v1451_v8 = vmul.f32 %v3282_v20, %v4689_v34  ;;  %v6415_v3 = vld [vmem:[#allocation22_spill] sm:$0xff]  ;;  %v6416_v14 = vld [vmem:[#allocation23_spill] sm:$0xff]  ;;  %v6421_v44 = vld [vmem:[#allocation28_spill] sm:$0xff] }
 0x13d   : > { %v1452_v6 = vmul.f32 %v3282_v20, %v6412_v41  ;;  %v1453_v53 = vmul.f32 %v3282_v20, %v6413_v12  ;;  %v1454_v23 = vmul.f32 %v3282_v20, %v6414_v42  ;;  %v1455_v57 = vmul.f32 %v3282_v20, %v6415_v3  ;;  %v6419_v46 = vld [vmem:[#allocation26_spill] sm:$0xff]  ;;  %v6420_v55 = vld [vmem:[#allocation27_spill] sm:$0xff]  ;;  %v3299_v3 = vld [vmem:[#allocation3 + $0x17] ss:$0 sm:$0xff] }
 0x13e   : > { %v1456_v36 = vmul.f32 %v3282_v20, %v6416_v14  ;;  %v1457_v58 = vmul.f32 %v3282_v20, %v6417_v32  ;;  %v1458_v13 = vmul.f32 %v3282_v20, %v6418_v29  ;;  %v1459_v18 = vmul.f32 %v3282_v20, %v6419_v46 }
 0x13f   : > { %v1460_v40 = vmul.f32 %v3282_v20, %v6420_v55  ;;  %v1461_v34 = vmul.f32 %v3282_v20, %v5027_v15  ;;  %v1462_v9 = vmul.f32 %v3282_v20, %v5030_v28  ;;  %v1463_v19 = vmul.f32 %v3282_v20, %v6421_v44 }
 0x140   : > { %v1464_v21 = vmul.f32 %v3282_v20, %v4722_v1  ;;  %v1465_v60 = vmul.f32 %v3282_v20, %v5033_v7  ;;  %v1466_v33 = vmul.f32 %v3282_v20, %v5036_v47  ;;  %v1467_v51 = vadd.f32 %v1451_v8, %v1414_v2  ;;  %v6428_v8 = vld [vmem:[#allocation34_spill] sm:$0xff] }
 0x141   : > { %v1468_v22 = vadd.f32 %v1452_v6, %v1415_v49  ;;  %v1469_v62 = vadd.f32 %v1453_v53, %v1416_v26  ;;  %v1470_v63 = vadd.f32 %v1454_v23, %v1417_v24  ;;  %v1471_v35 = vadd.f32 %v1455_v57, %v1418_v4  ;;  %v5055_v49 = vld [vmem:[%s4033_s29 + $0x107] sm:$0xff]  ;;  %v5058_v26 = vld [vmem:[%s4033_s29 + $0x10f] sm:$0xff] }
 0x142   : > { %v1472_v41 = vadd.f32 %v1456_v36, %v1419_v16  ;;  %v1473_v12 = vadd.f32 %v1457_v58, %v1420_v50  ;;  %v1474_v42 = vadd.f32 %v1458_v13, %v1421_v31  ;;  %v1475_v14 = vadd.f32 %v1459_v18, %v1422_v39  ;;  %v5061_v24 = vld [vmem:[%s4033_s29 + $0x147] sm:$0xff]  ;;  %v5064_v4 = vld [vmem:[%s4033_s29 + $0x14f] sm:$0xff]  ;;  %v6423_v50 = vld [vmem:[#allocation29_spill] sm:$0xff] }
 0x143   : > { %v1476_v32 = vadd.f32 %v1460_v40, %v1423_v59  ;;  %v1477_v1 = vadd.f32 %v1461_v34, %v1424_v11  ;;  %v1478_v29 = vadd.f32 %v1462_v9, %v1425_v43  ;;  %v1479_v46 = vadd.f32 %v1463_v19, %v1426_v30  ;;  %6422 = vst [vmem:[#allocation82_spill] sm:$0xff] %v5061_v24  ;;  %v6424_v39 = vld [vmem:[#allocation30_spill] sm:$0xff]  ;;  %v6425_v11 = vld [vmem:[#allocation31_spill] sm:$0xff]  ;;  %v6426_v30 = vld [vmem:[#allocation32_spill] sm:$0xff] }
 0x144   : > { %v1480_v55 = vadd.f32 %v1464_v21, %v1427_v54  ;;  %v1481_v20 = vadd.f32 %v1465_v60, %v1428_v45  ;;  %v1482_v2 = vadd.f32 %v1466_v33, %v1429_v17  ;;  %v1504_v16 = vmul.f32 %v3299_v3, %v4741_v0  ;;  %v6427_v45 = vld [vmem:[#allocation33_spill] sm:$0xff]  ;;  %v6429_v53 = vld [vmem:[#allocation35_spill] sm:$0xff]  ;;  %v6430_v57 = vld [vmem:[#allocation36_spill] sm:$0xff] }
 0x145   : > { %v1505_v31 = vmul.f32 %v3299_v3, %v6423_v50  ;;  %v1506_v59 = vmul.f32 %v3299_v3, %v6424_v39  ;;  %v1507_v43 = vmul.f32 %v3299_v3, %v6425_v11  ;;  %v1508_v54 = vmul.f32 %v3299_v3, %v6426_v30  ;;  %v6431_v58 = vld [vmem:[#allocation37_spill] sm:$0xff]  ;;  %v6432_v40 = vld [vmem:[#allocation38_spill] sm:$0xff] }
 0x146   : > { %v1509_v17 = vmul.f32 %v3299_v3, %v6427_v45  ;;  %v1510_v6 = vmul.f32 %v3299_v3, %v6428_v8  ;;  %v1511_v23 = vmul.f32 %v3299_v3, %v6429_v53  ;;  %v1512_v36 = vmul.f32 %v3299_v3, %v6430_v57  ;;  %v3316_v8 = vld [vmem:[#allocation3 + $0x18] ss:$0 sm:$0xff] }
 0x147   : > { %v1513_v13 = vmul.f32 %v3299_v3, %v6431_v58  ;;  %v1514_v0 = vmul.f32 %v3299_v3, %v5055_v49  ;;  %v1515_v18 = vmul.f32 %v3299_v3, %v5058_v26  ;;  %v1516_v34 = vmul.f32 %v3299_v3, %v6432_v40 }
 0x148   : > { %v1517_v9 = vmul.f32 %v3299_v3, %v4774_v48  ;;  %v1518_v44 = vmul.f32 %v3299_v3, %v5061_v24  ;;  %v1519_v19 = vmul.f32 %v3299_v3, %v5064_v4  ;;  %v1520_v21 = vadd.f32 %v1504_v16, %v1467_v51  ;;  %v6440_v16 = vld [vmem:[#allocation44_spill] sm:$0xff] }
 0x149   : > { %v1521_v60 = vadd.f32 %v1505_v31, %v1468_v22  ;;  %v1522_v33 = vadd.f32 %v1506_v59, %v1469_v62  ;;  %v1523_v50 = vadd.f32 %v1507_v43, %v1470_v63  ;;  %v1524_v39 = vadd.f32 %v1508_v54, %v1471_v35  ;;  %v5083_v22 = vld [vmem:[%s4033_s29 + $0x108] sm:$0xff]  ;;  %v5086_v62 = vld [vmem:[%s4033_s29 + $0x110] sm:$0xff]  ;;  %v6441_v59 = vld [vmem:[#allocation45_spill] sm:$0xff] }
 0x14a   : > { %v1525_v11 = vadd.f32 %v1509_v17, %v1472_v41  ;;  %v1526_v30 = vadd.f32 %v1510_v6, %v1473_v12  ;;  %v1527_v45 = vadd.f32 %v1511_v23, %v1474_v42  ;;  %v1528_v53 = vadd.f32 %v1512_v36, %v1475_v14  ;;  %6433 = vst [vmem:[#allocation83_spill] sm:$0xff] %v5086_v62  ;;  %v5089_v63 = vld [vmem:[%s4033_s29 + $0x148] sm:$0xff]  ;;  %v5092_v35 = vld [vmem:[%s4033_s29 + $0x150] sm:$0xff]  ;;  %v6442_v54 = vld [vmem:[#allocation46_spill] sm:$0xff] }
 0x14b   : > { %v1529_v57 = vadd.f32 %v1513_v13, %v1476_v32  ;;  %v1530_v48 = vadd.f32 %v1514_v0, %v1477_v1  ;;  %v1531_v58 = vadd.f32 %v1515_v18, %v1478_v29  ;;  %v1532_v40 = vadd.f32 %v1516_v34, %v1479_v46  ;;  %6434 = vst [vmem:[#allocation84_spill] sm:$0xff] %v5089_v63  ;;  %v6435_v12 = vld [vmem:[#allocation39_spill] sm:$0xff]  ;;  %v6436_v14 = vld [vmem:[#allocation40_spill] sm:$0xff]  ;;  %v6437_v1 = vld [vmem:[#allocation41_spill] sm:$0xff] }
 0x14c   : > { %v1533_v24 = vadd.f32 %v1517_v9, %v1480_v55  ;;  %v1534_v3 = vadd.f32 %v1518_v44, %v1481_v20  ;;  %v1535_v51 = vadd.f32 %v1519_v19, %v1482_v2  ;;  %v1557_v41 = vmul.f32 %v3316_v8, %v4793_v52  ;;  %v6438_v46 = vld [vmem:[#allocation42_spill] sm:$0xff]  ;;  %v6439_v20 = vld [vmem:[#allocation43_spill] sm:$0xff]  ;;  %v6444_v13 = vld [vmem:[#allocation48_spill] sm:$0xff] }
 0x14d   : > { %v1558_v42 = vmul.f32 %v3316_v8, %v6435_v12  ;;  %v1559_v32 = vmul.f32 %v3316_v8, %v6436_v14  ;;  %v1560_v29 = vmul.f32 %v3316_v8, %v6437_v1  ;;  %v1561_v55 = vmul.f32 %v3316_v8, %v6438_v46  ;;  %v6443_v6 = vld [vmem:[#allocation47_spill] sm:$0xff] }
 0x14e   : > { %v1562_v2 = vmul.f32 %v3316_v8, %v6439_v20  ;;  %v1563_v31 = vmul.f32 %v3316_v8, %v6440_v16  ;;  %v1564_v43 = vmul.f32 %v3316_v8, %v6441_v59  ;;  %v1565_v17 = vmul.f32 %v3316_v8, %v6442_v54  ;;  %v3333_v59 = vld [vmem:[#allocation3 + $0x19] ss:$0 sm:$0xff] }
 0x14f   : > { %v1566_v23 = vmul.f32 %v3316_v8, %v6443_v6  ;;  %v1567_v52 = vmul.f32 %v3316_v8, %v5083_v22  ;;  %v1568_v36 = vmul.f32 %v3316_v8, %v5086_v62  ;;  %v1569_v0 = vmul.f32 %v3316_v8, %v6444_v13 }
 0x150   : > { %v1570_v18 = vmul.f32 %v3316_v8, %v4826_v61  ;;  %v1571_v34 = vmul.f32 %v3316_v8, %v5089_v63  ;;  %v1572_v9 = vmul.f32 %v3316_v8, %v5092_v35  ;;  %v1573_v44 = vadd.f32 %v1557_v41, %v1520_v21  ;;  %v6453_v41 = vld [vmem:[#allocation54_spill] sm:$0xff] }
 0x151   : > { %v1574_v19 = vadd.f32 %v1558_v42, %v1521_v60  ;;  %v1575_v12 = vadd.f32 %v1559_v32, %v1522_v33  ;;  %v1576_v14 = vadd.f32 %v1560_v29, %v1523_v50  ;;  %v1577_v1 = vadd.f32 %v1561_v55, %v1524_v39  ;;  %v5111_v60 = vld [vmem:[%s4033_s29 + $0x109] sm:$0xff]  ;;  %v5114_v33 = vld [vmem:[%s4033_s29 + $0x111] sm:$0xff] }
 0x152   : > { %v1578_v46 = vadd.f32 %v1562_v2, %v1525_v11  ;;  %v1579_v20 = vadd.f32 %v1563_v31, %v1526_v30  ;;  %v1580_v16 = vadd.f32 %v1564_v43, %v1527_v45  ;;  %v1581_v54 = vadd.f32 %v1565_v17, %v1528_v53  ;;  %6445 = vst [vmem:[#allocation85_spill] sm:$0xff] %v5114_v33  ;;  %v5117_v50 = vld [vmem:[%s4033_s29 + $0x149] sm:$0xff]  ;;  %v5120_v39 = vld [vmem:[%s4033_s29 + $0x151] sm:$0xff]  ;;  %v6449_v53 = vld [vmem:[#allocation50_spill] sm:$0xff] }
 0x153   : > { %v1582_v6 = vadd.f32 %v1566_v23, %v1529_v57  ;;  %v1583_v61 = vadd.f32 %v1567_v52, %v1530_v48  ;;  %v1584_v13 = vadd.f32 %v1568_v36, %v1531_v58  ;;  %v1585_v63 = vadd.f32 %v1569_v0, %v1532_v40  ;;  %6446 = vst [vmem:[#allocation86_spill] sm:$0xff] %v5117_v50  ;;  %v6448_v30 = vld [vmem:[#allocation49_spill] sm:$0xff]  ;;  %v6450_v48 = vld [vmem:[#allocation51_spill] sm:$0xff]  ;;  %v6451_v40 = vld [vmem:[#allocation52_spill] sm:$0xff] }
 0x154   : > { %v1586_v62 = vadd.f32 %v1570_v18, %v1533_v24  ;;  %v1587_v8 = vadd.f32 %v1571_v34, %v1534_v3  ;;  %v1588_v21 = vadd.f32 %v1572_v9, %v1535_v51  ;;  %6447 = vst [vmem:[#allocation87_spill] sm:$0xff] %v5120_v39  ;;  %v1610_v11 = vmul.f32 %v3333_v59, %v4845_v38  ;;  %v6452_v3 = vld [vmem:[#allocation53_spill] sm:$0xff]  ;;  %v6454_v32 = vld [vmem:[#allocation55_spill] sm:$0xff]  ;;  %v6455_v55 = vld [vmem:[#allocation56_spill] sm:$0xff] }
 0x155   : > { %v1611_v45 = vmul.f32 %v3333_v59, %v6448_v30  ;;  %v1612_v57 = vmul.f32 %v3333_v59, %v6449_v53  ;;  %v1613_v58 = vmul.f32 %v3333_v59, %v6450_v48  ;;  %v1614_v24 = vmul.f32 %v3333_v59, %v6451_v40  ;;  %v6456_v31 = vld [vmem:[#allocation57_spill] sm:$0xff]  ;;  %v6457_v23 = vld [vmem:[#allocation58_spill] sm:$0xff] }
 0x156   : > { %v1615_v51 = vmul.f32 %v3333_v59, %v6452_v3  ;;  %v1616_v42 = vmul.f32 %v3333_v59, %v6453_v41  ;;  %v1617_v29 = vmul.f32 %v3333_v59, %v6454_v32  ;;  %v1618_v2 = vmul.f32 %v3333_v59, %v6455_v55  ;;  %v3350_v32 = vld [vmem:[#allocation3 + $0x1a] ss:$0 sm:$0xff] }
 0x157   : > { %v1619_v43 = vmul.f32 %v3333_v59, %v6456_v31  ;;  %v1620_v38 = vmul.f32 %v3333_v59, %v5111_v60  ;;  %v1621_v17 = vmul.f32 %v3333_v59, %v5114_v33  ;;  %v1622_v52 = vmul.f32 %v3333_v59, %v6457_v23 }
 0x158   : > { %v1623_v36 = vmul.f32 %v3333_v59, %v4878_v25  ;;  %v1624_v0 = vmul.f32 %v3333_v59, %v5117_v50  ;;  %v1625_v18 = vmul.f32 %v3333_v59, %v5120_v39  ;;  %v1626_v34 = vadd.f32 %v1610_v11, %v1573_v44 }
 0x159   : > { %v1627_v9 = vadd.f32 %v1611_v45, %v1574_v19  ;;  %v1628_v30 = vadd.f32 %v1612_v57, %v1575_v12  ;;  %v1629_v53 = vadd.f32 %v1613_v58, %v1576_v14  ;;  %v1630_v48 = vadd.f32 %v1614_v24, %v1577_v1  ;;  %v5139_v19 = vld [vmem:[%s4033_s29 + $0x10a] sm:$0xff]  ;;  %v5142_v12 = vld [vmem:[%s4033_s29 + $0x112] sm:$0xff]  ;;  %v6468_v58 = vld [vmem:[#allocation66_spill] sm:$0xff] }
 0x15a   : > { %v1631_v40 = vadd.f32 %v1615_v51, %v1578_v46  ;;  %v1632_v3 = vadd.f32 %v1616_v42, %v1579_v20  ;;  %v1633_v41 = vadd.f32 %v1617_v29, %v1580_v16  ;;  %v1634_v55 = vadd.f32 %v1618_v2, %v1581_v54  ;;  %6458 = vst [vmem:[#allocation88_spill] sm:$0xff] %v5139_v19  ;;  %v5145_v14 = vld [vmem:[%s4033_s29 + $0x14a] sm:$0xff]  ;;  %v5148_v1 = vld [vmem:[%s4033_s29 + $0x152] sm:$0xff] }
 0x15b   : > { %v1635_v31 = vadd.f32 %v1619_v43, %v1582_v6  ;;  %v1636_v25 = vadd.f32 %v1620_v38, %v1583_v61  ;;  %v1637_v23 = vadd.f32 %v1621_v17, %v1584_v13  ;;  %v1638_v50 = vadd.f32 %v1622_v52, %v1585_v63  ;;  %6459 = vst [vmem:[#allocation89_spill] sm:$0xff] %v5142_v12  ;;  %v6461_v46 = vld [vmem:[#allocation59_spill] sm:$0xff]  ;;  %v6462_v16 = vld [vmem:[#allocation60_spill] sm:$0xff]  ;;  %v6463_v54 = vld [vmem:[#allocation61_spill] sm:$0xff] }
 0x15c   : > { %v1639_v33 = vadd.f32 %v1623_v36, %v1586_v62  ;;  %v1640_v59 = vadd.f32 %v1624_v0, %v1587_v8  ;;  %v1641_v44 = vadd.f32 %v1625_v18, %v1588_v21  ;;  %6460 = vst [vmem:[#allocation90_spill] sm:$0xff] %v5145_v14  ;;  %v1663_v20 = vmul.f32 %v3350_v32, %v6461_v46  ;;  %v6464_v61 = vld [vmem:[#allocation62_spill] sm:$0xff]  ;;  %v6465_v63 = vld [vmem:[#allocation63_spill] sm:$0xff]  ;;  %v6466_v8 = vld [vmem:[#allocation64_spill] sm:$0xff] }
 0x15d   : > { %v1664_v11 = vmul.f32 %v3350_v32, %v6462_v16  ;;  %v1665_v6 = vmul.f32 %v3350_v32, %v6463_v54  ;;  %v1666_v13 = vmul.f32 %v3350_v32, %v6464_v61  ;;  %v1667_v62 = vmul.f32 %v3350_v32, %v6465_v63  ;;  %v6467_v45 = vld [vmem:[#allocation65_spill] sm:$0xff]  ;;  %v6469_v51 = vld [vmem:[#allocation67_spill] sm:$0xff]  ;;  %v6470_v29 = vld [vmem:[#allocation68_spill] sm:$0xff] }
 0x15e   : > { %v1668_v21 = vmul.f32 %v3350_v32, %v6466_v8  ;;  %v1669_v57 = vmul.f32 %v3350_v32, %v6467_v45  ;;  %v1670_v24 = vmul.f32 %v3350_v32, %v6468_v58  ;;  %v1671_v42 = vmul.f32 %v3350_v32, %v6469_v51  ;;  %v6471_v17 = vld [vmem:[#allocation69_spill] sm:$0xff]  ;;  %v6472_v36 = vld [vmem:[#allocation70_spill] sm:$0xff] }
 0x15f   : > { %v1672_v2 = vmul.f32 %v3350_v32, %v6470_v29  ;;  %v1673_v43 = vmul.f32 %v3350_v32, %v5139_v19  ;;  %v1674_v38 = vmul.f32 %v3350_v32, %v5142_v12  ;;  %v1675_v52 = vmul.f32 %v3350_v32, %v6471_v17  ;;  %v3367_v29 = vld [vmem:[#allocation3 + $0x1b] ss:$0 sm:$0xff] }
 0x160   : > { %v1676_v0 = vmul.f32 %v3350_v32, %v6472_v36  ;;  %v1677_v18 = vmul.f32 %v3350_v32, %v5145_v14  ;;  %v1678_v46 = vmul.f32 %v3350_v32, %v5148_v1  ;;  %v1679_v16 = vadd.f32 %v1663_v20, %v1626_v34 }
 0x161   : > { %v1680_v54 = vadd.f32 %v1664_v11, %v1627_v9  ;;  %v1681_v61 = vadd.f32 %v1665_v6, %v1628_v30  ;;  %v1682_v63 = vadd.f32 %v1666_v13, %v1629_v53  ;;  %v1683_v8 = vadd.f32 %v1667_v62, %v1630_v48  ;;  %v5167_v9 = vld [vmem:[%s4033_s29 + $0x10b] sm:$0xff]  ;;  %v5170_v30 = vld [vmem:[%s4033_s29 + $0x113] sm:$0xff]  ;;  %v6480_v13 = vld [vmem:[#allocation78_spill] sm:$0xff] }
 0x162   : > { %v1684_v45 = vadd.f32 %v1668_v21, %v1631_v40  ;;  %v1685_v58 = vadd.f32 %v1669_v57, %v1632_v3  ;;  %v1686_v51 = vadd.f32 %v1670_v24, %v1633_v41  ;;  %v1687_v17 = vadd.f32 %v1671_v42, %v1634_v55  ;;  %v5173_v53 = vld [vmem:[%s4033_s29 + $0x14b] sm:$0xff]  ;;  %v5176_v48 = vld [vmem:[%s4033_s29 + $0x153] sm:$0xff] }
 0x163   : > { %v1688_v12 = vadd.f32 %v1672_v2, %v1635_v31  ;;  %v1689_v36 = vadd.f32 %v1673_v43, %v1636_v25  ;;  %v1690_v19 = vadd.f32 %v1674_v38, %v1637_v23  ;;  %v1691_v14 = vadd.f32 %v1675_v52, %v1638_v50  ;;  %v6473_v40 = vld [vmem:[#allocation71_spill] sm:$0xff]  ;;  %v6474_v41 = vld [vmem:[#allocation72_spill] sm:$0xff]  ;;  %v6475_v55 = vld [vmem:[#allocation73_spill] sm:$0xff] }
 0x164   : > { %v1692_v39 = vadd.f32 %v1676_v0, %v1639_v33  ;;  %v1693_v32 = vadd.f32 %v1677_v18, %v1640_v59  ;;  %v1694_v34 = vadd.f32 %v1678_v46, %v1641_v44  ;;  %v1716_v3 = vmul.f32 %v3367_v29, %v6473_v40  ;;  %v6476_v25 = vld [vmem:[#allocation74_spill] sm:$0xff]  ;;  %v6477_v50 = vld [vmem:[#allocation75_spill] sm:$0xff]  ;;  %v6478_v59 = vld [vmem:[#allocation76_spill] sm:$0xff] }
 0x165   : > { %v1717_v20 = vmul.f32 %v3367_v29, %v6474_v41  ;;  %v1718_v31 = vmul.f32 %v3367_v29, %v6475_v55  ;;  %v1719_v23 = vmul.f32 %v3367_v29, %v6476_v25  ;;  %v1720_v33 = vmul.f32 %v3367_v29, %v6477_v50  ;;  %v6479_v11 = vld [vmem:[#allocation77_spill] sm:$0xff]  ;;  %v6481_v21 = vld [vmem:[#allocation79_spill] sm:$0xff]  ;;  %v6482_v24 = vld [vmem:[#allocation80_spill] sm:$0xff] }
 0x166   : > { %v1721_v44 = vmul.f32 %v3367_v29, %v6478_v59  ;;  %v1722_v6 = vmul.f32 %v3367_v29, %v6479_v11  ;;  %v1723_v62 = vmul.f32 %v3367_v29, %v6480_v13  ;;  %v1724_v57 = vmul.f32 %v3367_v29, %v6481_v21  ;;  %v6483_v38 = vld [vmem:[#allocation81_spill] sm:$0xff]  ;;  %v3370_v50 = vld [vmem:[%s4033_s29 + $0x85] sm:$0xff]  ;;  %v3371_v59 = vld [vmem:[%s4033_s29 + $0x8d] sm:$0xff] }
 0x167   : > { %v1725_v42 = vmul.f32 %v3367_v29, %v6482_v24  ;;  %v1726_v2 = vmul.f32 %v3367_v29, %v5167_v9  ;;  %v1727_v43 = vmul.f32 %v3367_v29, %v5170_v30  ;;  %v1728_v52 = vmul.f32 %v3367_v29, %v6483_v38  ;;  %v5197_v11 = vld [vmem:[%s4033_s29 + $0xa5] sm:$0xff]  ;;  %v5200_v38 = vld [vmem:[%s4033_s29 + $0xad] sm:$0xff] }
 0x168   : > { %v1729_v0 = vmul.f32 %v3367_v29, %v4982_v10  ;;  %v1730_v18 = vmul.f32 %v3367_v29, %v5173_v53  ;;  %v1731_v46 = vmul.f32 %v3367_v29, %v5176_v48  ;;  %v1732_v40 = vadd.f32 %v1716_v3, %v1679_v16  ;;  %v5203_v16 = vld [vmem:[%s4033_s29 + $0xc5] sm:$0xff] }
 0x169   : > { %v1733_v41 = vadd.f32 %v1717_v20, %v1680_v54  ;;  %v1734_v55 = vadd.f32 %v1718_v31, %v1681_v61  ;;  %v1735_v25 = vadd.f32 %v1719_v23, %v1682_v63  ;;  %v1736_v13 = vadd.f32 %v1720_v33, %v1683_v8  ;;  %v3386_v54 = vld [vmem:[#allocation3 + $0x1c] ss:$0 sm:$0xff]  ;;  %v5206_v20 = vld [vmem:[%s4033_s29 + $0xcd] sm:$0xff]  ;;  %v5209_v31 = vld [vmem:[%s4033_s29 + $0xe5] sm:$0xff] }
 0x16a   : > { %v1737_v21 = vadd.f32 %v1721_v44, %v1684_v45  ;;  %v1738_v24 = vadd.f32 %v1722_v6, %v1685_v58  ;;  %v1739_v10 = vadd.f32 %v1723_v62, %v1686_v51  ;;  %v1740_v61 = vadd.f32 %v1724_v57, %v1687_v17  ;;  %6484 = vst [vmem:[#allocation91_spill] sm:$0xff] %v5206_v20  ;;  %v5212_v8 = vld [vmem:[%s4033_s29 + $0xed] sm:$0xff]  ;;  %v5215_v33 = vld [vmem:[%s4033_s29 + $0x125] sm:$0xff] }
 0x16b   : > { %v1741_v63 = vadd.f32 %v1725_v42, %v1688_v12  ;;  %v1742_v29 = vadd.f32 %v1726_v2, %v1689_v36  ;;  %v1743_v3 = vadd.f32 %v1727_v43, %v1690_v19  ;;  %6485 = vst [vmem:[#allocation92_spill] sm:$0xff] %v5209_v31  ;;  %6486 = vst [vmem:[#allocation93_spill] sm:$0xff] %v5212_v8  ;;  %v5218_v44 = vld [vmem:[%s4033_s29 + $0x12d] sm:$0xff]  ;;  %v5221_v6 = vld [vmem:[%s4033_s29 + $0x165] sm:$0xff] }
 0x16c   : > { %v1744_v45 = vadd.f32 %v1728_v52, %v1691_v14  ;;  %v1745_v58 = vadd.f32 %v1729_v0, %v1692_v39  ;;  %v1746_v51 = vadd.f32 %v1730_v18, %v1693_v32  ;;  %v1747_v23 = vadd.f32 %v1731_v46, %v1694_v34  ;;  %6487 = vst [vmem:[#allocation94_spill] sm:$0xff] %v5215_v33  ;;  %v5224_v17 = vld [vmem:[%s4033_s29 + $0x16d] sm:$0xff] }
 0x16d   : > { %6488 = vst [vmem:[#allocation95_spill] sm:$0xff] %v5218_v44  ;;  %6489 = vst [vmem:[#allocation96_spill] sm:$0xff] %v5221_v6  ;;  %v1772_v12 = vmul.f32 %v3386_v54, %v3370_v50  ;;  %v1773_v19 = vmul.f32 %v3386_v54, %v3371_v59  ;;  %v1774_v36 = vmul.f32 %v3386_v54, %v5197_v11 }
 0x16e   : > { %v1775_v62 = vmul.f32 %v3386_v54, %v5200_v38  ;;  %v1776_v57 = vmul.f32 %v3386_v54, %v5203_v16  ;;  %v1777_v39 = vmul.f32 %v3386_v54, %v5206_v20  ;;  %v1778_v14 = vmul.f32 %v3386_v54, %v5209_v31 }
 0x16f   : > { %v1779_v32 = vmul.f32 %v3386_v54, %v5212_v8  ;;  %v1780_v34 = vmul.f32 %v3386_v54, %v4999_v27  ;;  %v1781_v42 = vmul.f32 %v3386_v54, %v5002_v5  ;;  %v1782_v2 = vmul.f32 %v3386_v54, %v5215_v33  ;;  %v3387_v5 = vld [vmem:[%s4033_s29 + $0x86] sm:$0xff]  ;;  %v3388_v33 = vld [vmem:[%s4033_s29 + $0x8e] sm:$0xff] }
 0x170   : > { %v1783_v43 = vmul.f32 %v3386_v54, %v5218_v44  ;;  %v1784_v52 = vmul.f32 %v3386_v54, %v5005_v37  ;;  %v1785_v0 = vmul.f32 %v3386_v54, %v5008_v56  ;;  %v1786_v18 = vmul.f32 %v3386_v54, %v5221_v6  ;;  %v5243_v44 = vld [vmem:[%s4033_s29 + $0xa6] sm:$0xff]  ;;  %v5246_v6 = vld [vmem:[%s4033_s29 + $0xae] sm:$0xff] }
 0x171   : > { %v1787_v46 = vmul.f32 %v3386_v54, %v5224_v17  ;;  %v1788_v50 = vadd.f32 %v1772_v12, %v1732_v40  ;;  %v1789_v59 = vadd.f32 %v1773_v19, %v1733_v41  ;;  %v1790_v8 = vadd.f32 %v1774_v36, %v1734_v55  ;;  %v5249_v40 = vld [vmem:[%s4033_s29 + $0xc6] sm:$0xff]  ;;  %v3403_v41 = vld [vmem:[#allocation3 + $0x1d] ss:$0 sm:$0xff]  ;;  %v5252_v19 = vld [vmem:[%s4033_s29 + $0xce] sm:$0xff] }
 0x172   : > { %v1791_v27 = vadd.f32 %v1775_v62, %v1735_v25  ;;  %v1792_v31 = vadd.f32 %v1776_v57, %v1736_v13  ;;  %v1793_v37 = vadd.f32 %v1777_v39, %v1737_v21  ;;  %v1794_v20 = vadd.f32 %v1778_v14, %v1738_v24  ;;  %6490 = vst [vmem:[#allocation97_spill] sm:$0xff] %v5252_v19  ;;  %v5255_v36 = vld [vmem:[%s4033_s29 + $0xe6] sm:$0xff]  ;;  %v5258_v13 = vld [vmem:[%s4033_s29 + $0xee] sm:$0xff] }
 0x173   : > { %v1795_v56 = vadd.f32 %v1779_v32, %v1739_v10  ;;  %v1796_v55 = vadd.f32 %v1780_v34, %v1740_v61  ;;  %v1797_v25 = vadd.f32 %v1781_v42, %v1741_v63  ;;  %v1798_v54 = vadd.f32 %v1782_v2, %v1742_v29  ;;  %6491 = vst [vmem:[#allocation98_spill] sm:$0xff] %v5255_v36  ;;  %v5261_v57 = vld [vmem:[%s4033_s29 + $0x126] sm:$0xff]  ;;  %v5264_v39 = vld [vmem:[%s4033_s29 + $0x12e] sm:$0xff] }
 0x174   : > { %v1799_v12 = vadd.f32 %v1783_v43, %v1743_v3  ;;  %6492 = vst [vmem:[#allocation17_spill] sm:$0xff] %v5258_v13  ;;  %v1800_v21 = vadd.f32 %v1784_v52, %v1744_v45  ;;  %v1801_v24 = vadd.f32 %v1785_v0, %v1745_v58  ;;  %v1802_v10 = vadd.f32 %v1786_v18, %v1746_v51  ;;  %v5267_v14 = vld [vmem:[%s4033_s29 + $0x166] sm:$0xff]  ;;  %v5270_v61 = vld [vmem:[%s4033_s29 + $0x16e] sm:$0xff] }
 0x175   : > { %v1803_v62 = vadd.f32 %v1787_v46, %v1747_v23  ;;  %6493 = vst [vmem:[#allocation21_spill] sm:$0xff] %v5261_v57  ;;  %6494 = vst [vmem:[#allocation14_spill] sm:$0xff] %v5264_v39  ;;  %v1825_v63 = vmul.f32 %v3403_v41, %v3387_v5  ;;  %v1826_v29 = vmul.f32 %v3403_v41, %v3388_v33 }
 0x176   : > { %6495 = vst [vmem:[#allocation15_spill] sm:$0xff] %v5267_v14  ;;  %v1827_v3 = vmul.f32 %v3403_v41, %v5243_v44  ;;  %v1828_v32 = vmul.f32 %v3403_v41, %v5246_v6  ;;  %v1829_v34 = vmul.f32 %v3403_v41, %v5249_v40  ;;  %v1830_v45 = vmul.f32 %v3403_v41, %v5252_v19 }
 0x177   : > { %v1831_v58 = vmul.f32 %v3403_v41, %v5255_v36  ;;  %v1832_v51 = vmul.f32 %v3403_v41, %v5258_v13  ;;  %v1833_v23 = vmul.f32 %v3403_v41, %v5027_v15  ;;  %v1834_v42 = vmul.f32 %v3403_v41, %v5030_v28  ;;  %v3404_v28 = vld [vmem:[%s4033_s29 + $0x87] sm:$0xff] }
 0x178   : > { %v1835_v33 = vmul.f32 %v3403_v41, %v5261_v57  ;;  %v1836_v2 = vmul.f32 %v3403_v41, %v5264_v39  ;;  %v1837_v43 = vmul.f32 %v3403_v41, %v5033_v7  ;;  %v1838_v52 = vmul.f32 %v3403_v41, %v5036_v47  ;;  %v3405_v57 = vld [vmem:[%s4033_s29 + $0x8f] sm:$0xff]  ;;  %v5289_v39 = vld [vmem:[%s4033_s29 + $0xa7] sm:$0xff] }
 0x179   : > { %v1839_v0 = vmul.f32 %v3403_v41, %v5267_v14  ;;  %v1840_v18 = vmul.f32 %v3403_v41, %v5270_v61  ;;  %v1841_v46 = vadd.f32 %v1825_v63, %v1788_v50  ;;  %v1842_v5 = vadd.f32 %v1826_v29, %v1789_v59  ;;  %v5292_v14 = vld [vmem:[%s4033_s29 + $0xaf] sm:$0xff]  ;;  %v5295_v50 = vld [vmem:[%s4033_s29 + $0xc7] sm:$0xff] }
 0x17a   : > { %v1843_v13 = vadd.f32 %v1827_v3, %v1790_v8  ;;  %v1844_v15 = vadd.f32 %v1828_v32, %v1791_v27  ;;  %v1845_v36 = vadd.f32 %v1829_v34, %v1792_v31  ;;  %v1846_v7 = vadd.f32 %v1830_v45, %v1793_v37  ;;  %6496 = vst [vmem:[#allocation16_spill] sm:$0xff] %v5295_v50  ;;  %v3420_v8 = vld [vmem:[#allocation3 + $0x1e] ss:$0 sm:$0xff]  ;;  %v5298_v29 = vld [vmem:[%s4033_s29 + $0xcf] sm:$0xff]  ;;  %v5301_v3 = vld [vmem:[%s4033_s29 + $0xe7] sm:$0xff] }
 0x17b   : > { %v1847_v19 = vadd.f32 %v1831_v58, %v1794_v20  ;;  %v1848_v47 = vadd.f32 %v1832_v51, %v1795_v56  ;;  %v1849_v59 = vadd.f32 %v1833_v23, %v1796_v55  ;;  %v1850_v27 = vadd.f32 %v1834_v42, %v1797_v25  ;;  %6497 = vst [vmem:[#allocation18_spill] sm:$0xff] %v5298_v29  ;;  %v5304_v31 = vld [vmem:[%s4033_s29 + $0xef] sm:$0xff]  ;;  %v5307_v34 = vld [vmem:[%s4033_s29 + $0x127] sm:$0xff] }
 0x17c   : > { %v1851_v41 = vadd.f32 %v1835_v33, %v1798_v54  ;;  %v1852_v63 = vadd.f32 %v1836_v2, %v1799_v12  ;;  %6498 = vst [vmem:[#allocation19_spill] sm:$0xff] %v5301_v3  ;;  %6499 = vst [vmem:[#allocation20_spill] sm:$0xff] %v5304_v31  ;;  %v1853_v20 = vadd.f32 %v1837_v43, %v1800_v21  ;;  %v5310_v45 = vld [vmem:[%s4033_s29 + $0x12f] sm:$0xff]  ;;  %v5313_v58 = vld [vmem:[%s4033_s29 + $0x167] sm:$0xff] }
 0x17d   : > { %v1854_v37 = vadd.f32 %v1838_v52, %v1801_v24  ;;  %v1855_v56 = vadd.f32 %v1839_v0, %v1802_v10  ;;  %v1856_v32 = vadd.f32 %v1840_v18, %v1803_v62  ;;  %6500 = vst [vmem:[#allocation22_spill] sm:$0xff] %v5307_v34  ;;  %6501 = vst [vmem:[#allocation23_spill] sm:$0xff] %v5310_v45  ;;  %v5316_v55 = vld [vmem:[%s4033_s29 + $0x16f] sm:$0xff]  ;;  %v6503_v2 = vld [vmem:[#allocation82_spill] sm:$0xff] }
 0x17e   : > { %6502 = vst [vmem:[#allocation24_spill] sm:$0xff] %v5313_v58  ;;  %v1878_v25 = vmul.f32 %v3420_v8, %v3404_v28  ;;  %v1879_v54 = vmul.f32 %v3420_v8, %v3405_v57  ;;  %v1880_v12 = vmul.f32 %v3420_v8, %v5289_v39  ;;  %v1881_v51 = vmul.f32 %v3420_v8, %v5292_v14 }
 0x17f   : > { %v1882_v23 = vmul.f32 %v3420_v8, %v5295_v50  ;;  %v1883_v21 = vmul.f32 %v3420_v8, %v5298_v29  ;;  %v1884_v24 = vmul.f32 %v3420_v8, %v5301_v3  ;;  %v1885_v10 = vmul.f32 %v3420_v8, %v5304_v31 }
 0x180   : > { %v1886_v62 = vmul.f32 %v3420_v8, %v5055_v49  ;;  %v1887_v42 = vmul.f32 %v3420_v8, %v5058_v26  ;;  %v1888_v57 = vmul.f32 %v3420_v8, %v5307_v34  ;;  %v1889_v33 = vmul.f32 %v3420_v8, %v5310_v45  ;;  %v3421_v26 = vld [vmem:[%s4033_s29 + $0x88] sm:$0xff]  ;;  %v3422_v34 = vld [vmem:[%s4033_s29 + $0x90] sm:$0xff] }
 0x181   : > { %v1890_v43 = vmul.f32 %v3420_v8, %v6503_v2  ;;  %v1891_v52 = vmul.f32 %v3420_v8, %v5064_v4  ;;  %v1892_v0 = vmul.f32 %v3420_v8, %v5313_v58  ;;  %v1893_v18 = vmul.f32 %v3420_v8, %v5316_v55  ;;  %v5335_v45 = vld [vmem:[%s4033_s29 + $0xa8] sm:$0xff]  ;;  %v5338_v58 = vld [vmem:[%s4033_s29 + $0xb0] sm:$0xff] }
 0x182   : > { %v1894_v28 = vadd.f32 %v1878_v25, %v1841_v46  ;;  %v1895_v31 = vadd.f32 %v1879_v54, %v1842_v5  ;;  %v1896_v3 = vadd.f32 %v1880_v12, %v1843_v13  ;;  %v1897_v49 = vadd.f32 %v1881_v51, %v1844_v15  ;;  %6504 = vst [vmem:[#allocation25_spill] sm:$0xff] %v5338_v58  ;;  %v5341_v46 = vld [vmem:[%s4033_s29 + $0xc8] sm:$0xff]  ;;  %v3437_v13 = vld [vmem:[#allocation3 + $0x1f] ss:$0 sm:$0xff]  ;;  %v5344_v54 = vld [vmem:[%s4033_s29 + $0xd0] sm:$0xff] }
 0x183   : > { %v1898_v29 = vadd.f32 %v1882_v23, %v1845_v36  ;;  %v1899_v2 = vadd.f32 %v1883_v21, %v1846_v7  ;;  %v1900_v50 = vadd.f32 %v1884_v24, %v1847_v19  ;;  %v1901_v4 = vadd.f32 %v1885_v10, %v1848_v47  ;;  %6505 = vst [vmem:[#allocation26_spill] sm:$0xff] %v5341_v46  ;;  %v5347_v12 = vld [vmem:[%s4033_s29 + $0xe8] sm:$0xff]  ;;  %v5350_v36 = vld [vmem:[%s4033_s29 + $0xf0] sm:$0xff] }
 0x184   : > { %v1902_v5 = vadd.f32 %v1886_v62, %v1849_v59  ;;  %v1903_v15 = vadd.f32 %v1887_v42, %v1850_v27  ;;  %v1904_v8 = vadd.f32 %v1888_v57, %v1851_v41  ;;  %v1905_v25 = vadd.f32 %v1889_v33, %v1852_v63  ;;  %6506 = vst [vmem:[#allocation27_spill] sm:$0xff] %v5344_v54  ;;  %v5353_v23 = vld [vmem:[%s4033_s29 + $0x128] sm:$0xff]  ;;  %v5356_v21 = vld [vmem:[%s4033_s29 + $0x130] sm:$0xff] }
 0x185   : > { %6507 = vst [vmem:[#allocation28_spill] sm:$0xff] %v5347_v12  ;;  %6508 = vst [vmem:[#allocation29_spill] sm:$0xff] %v5350_v36  ;;  %v1906_v19 = vadd.f32 %v1890_v43, %v1853_v20  ;;  %v1907_v7 = vadd.f32 %v1891_v52, %v1854_v37  ;;  %v1908_v47 = vadd.f32 %v1892_v0, %v1855_v56  ;;  %v5359_v24 = vld [vmem:[%s4033_s29 + $0x168] sm:$0xff]  ;;  %v5362_v59 = vld [vmem:[%s4033_s29 + $0x170] sm:$0xff] }
 0x186   : > { %v1909_v51 = vadd.f32 %v1893_v18, %v1856_v32  ;;  %6509 = vst [vmem:[#allocation30_spill] sm:$0xff] %v5353_v23  ;;  %6510 = vst [vmem:[#allocation31_spill] sm:$0xff] %v5356_v21  ;;  %v1931_v27 = vmul.f32 %v3437_v13, %v3421_v26  ;;  %v1932_v41 = vmul.f32 %v3437_v13, %v3422_v34  ;;  %v6512_v42 = vld [vmem:[#allocation83_spill] sm:$0xff]  ;;  %v6513_v43 = vld [vmem:[#allocation84_spill] sm:$0xff] }
 0x187   : > { %6511 = vst [vmem:[#allocation32_spill] sm:$0xff] %v5359_v24  ;;  %v1933_v63 = vmul.f32 %v3437_v13, %v5335_v45  ;;  %v1934_v10 = vmul.f32 %v3437_v13, %v5338_v58  ;;  %v1935_v62 = vmul.f32 %v3437_v13, %v5341_v46  ;;  %v1936_v20 = vmul.f32 %v3437_v13, %v5344_v54 }
 0x188   : > { %v1937_v37 = vmul.f32 %v3437_v13, %v5347_v12  ;;  %v1938_v56 = vmul.f32 %v3437_v13, %v5350_v36  ;;  %v1939_v32 = vmul.f32 %v3437_v13, %v5083_v22  ;;  %v1940_v57 = vmul.f32 %v3437_v13, %v6512_v42  ;;  %v3438_v42 = vld [vmem:[%s4033_s29 + $0x89] sm:$0xff] }
 0x189   : > { %v1941_v34 = vmul.f32 %v3437_v13, %v5353_v23  ;;  %v1942_v33 = vmul.f32 %v3437_v13, %v5356_v21  ;;  %v1943_v52 = vmul.f32 %v3437_v13, %v6513_v43  ;;  %v1944_v0 = vmul.f32 %v3437_v13, %v5092_v35  ;;  %v3439_v23 = vld [vmem:[%s4033_s29 + $0x91] sm:$0xff]  ;;  %v5381_v21 = vld [vmem:[%s4033_s29 + $0xa9] sm:$0xff] }
 0x18a   : > { %v1945_v18 = vmul.f32 %v3437_v13, %v5359_v24  ;;  %v1946_v26 = vmul.f32 %v3437_v13, %v5362_v59  ;;  %v1947_v12 = vadd.f32 %v1931_v27, %v1894_v28  ;;  %v1948_v36 = vadd.f32 %v1932_v41, %v1895_v31  ;;  %6514 = vst [vmem:[#allocation33_spill] sm:$0xff] %v5381_v21  ;;  %v5384_v24 = vld [vmem:[%s4033_s29 + $0xb1] sm:$0xff]  ;;  %v5387_v28 = vld [vmem:[%s4033_s29 + $0xc9] sm:$0xff] }
 0x18b   : > { %v1949_v54 = vadd.f32 %v1933_v63, %v1896_v3  ;;  %v1950_v22 = vadd.f32 %v1934_v10, %v1897_v49  ;;  %v1951_v46 = vadd.f32 %v1935_v62, %v1898_v29  ;;  %v1952_v43 = vadd.f32 %v1936_v20, %v1899_v2  ;;  %6515 = vst [vmem:[#allocation34_spill] sm:$0xff] %v5384_v24  ;;  %v3454_v3 = vld [vmem:[#allocation3 + $0x20] ss:$0 sm:$0xff]  ;;  %v5390_v41 = vld [vmem:[%s4033_s29 + $0xd1] sm:$0xff]  ;;  %v5393_v63 = vld [vmem:[%s4033_s29 + $0xe9] sm:$0xff] }
 0x18c   : > { %v1953_v58 = vadd.f32 %v1937_v37, %v1900_v50  ;;  %v1954_v35 = vadd.f32 %v1938_v56, %v1901_v4  ;;  %6516 = vst [vmem:[#allocation35_spill] sm:$0xff] %v5387_v28  ;;  %v1955_v31 = vadd.f32 %v1939_v32, %v1902_v5  ;;  %v1956_v49 = vadd.f32 %v1940_v57, %v1903_v15  ;;  %v5396_v29 = vld [vmem:[%s4033_s29 + $0xf1] sm:$0xff]  ;;  %v5399_v62 = vld [vmem:[%s4033_s29 + $0x129] sm:$0xff] }
 0x18d   : > { %v1957_v13 = vadd.f32 %v1941_v34, %v1904_v8  ;;  %v1958_v27 = vadd.f32 %v1942_v33, %v1905_v25  ;;  %6517 = vst [vmem:[#allocation36_spill] sm:$0xff] %v5390_v41  ;;  %6518 = vst [vmem:[#allocation37_spill] sm:$0xff] %v5393_v63  ;;  %v1959_v50 = vadd.f32 %v1943_v52, %v1906_v19  ;;  %v5402_v20 = vld [vmem:[%s4033_s29 + $0x131] sm:$0xff]  ;;  %v5405_v37 = vld [vmem:[%s4033_s29 + $0x169] sm:$0xff] }
 0x18e   : > { %6519 = vst [vmem:[#allocation38_spill] sm:$0xff] %v5396_v29  ;;  %v1960_v2 = vadd.f32 %v1944_v0, %v1907_v7  ;;  %v1961_v4 = vadd.f32 %v1945_v18, %v1908_v47  ;;  %v1962_v10 = vadd.f32 %v1946_v26, %v1909_v51  ;;  %6520 = vst [vmem:[#allocation39_spill] sm:$0xff] %v5399_v62  ;;  %v5408_v5 = vld [vmem:[%s4033_s29 + $0x171] sm:$0xff]  ;;  %v6524_v52 = vld [vmem:[#allocation86_spill] sm:$0xff] }
 0x18f   : > { %6521 = vst [vmem:[#allocation40_spill] sm:$0xff] %v5402_v20  ;;  %6522 = vst [vmem:[#allocation41_spill] sm:$0xff] %v5405_v37  ;;  %v1984_v15 = vmul.f32 %v3454_v3, %v3438_v42  ;;  %v1985_v8 = vmul.f32 %v3454_v3, %v3439_v23  ;;  %v1986_v25 = vmul.f32 %v3454_v3, %v5381_v21  ;;  %v6523_v57 = vld [vmem:[#allocation85_spill] sm:$0xff]  ;;  %v6525_v18 = vld [vmem:[#allocation87_spill] sm:$0xff] }
 0x190   : > { %v1987_v56 = vmul.f32 %v3454_v3, %v5384_v24  ;;  %v1988_v32 = vmul.f32 %v3454_v3, %v5387_v28  ;;  %v1989_v19 = vmul.f32 %v3454_v3, %v5390_v41  ;;  %v1990_v7 = vmul.f32 %v3454_v3, %v5393_v63 }
 0x191   : > { %v1991_v47 = vmul.f32 %v3454_v3, %v5396_v29  ;;  %v1992_v51 = vmul.f32 %v3454_v3, %v5111_v60  ;;  %v1993_v34 = vmul.f32 %v3454_v3, %v6523_v57  ;;  %v1994_v23 = vmul.f32 %v3454_v3, %v5399_v62  ;;  %v3455_v57 = vld [vmem:[%s4033_s29 + $0x8a] sm:$0xff]  ;;  %v3456_v62 = vld [vmem:[%s4033_s29 + $0x92] sm:$0xff] }
 0x192   : > { %v1995_v33 = vmul.f32 %v3454_v3, %v5402_v20  ;;  %v1996_v0 = vmul.f32 %v3454_v3, %v6524_v52  ;;  %v1997_v26 = vmul.f32 %v3454_v3, %v6525_v18  ;;  %v1998_v42 = vmul.f32 %v3454_v3, %v5405_v37  ;;  %v5427_v20 = vld [vmem:[%s4033_s29 + $0xaa] sm:$0xff]  ;;  %v5430_v37 = vld [vmem:[%s4033_s29 + $0xb2] sm:$0xff] }
 0x193   : > { %v1999_v63 = vmul.f32 %v3454_v3, %v5408_v5  ;;  %v2000_v41 = vadd.f32 %v1984_v15, %v1947_v12  ;;  %v2001_v29 = vadd.f32 %v1985_v8, %v1948_v36  ;;  %v2002_v28 = vadd.f32 %v1986_v25, %v1949_v54  ;;  %6526 = vst [vmem:[#allocation42_spill] sm:$0xff] %v5427_v20  ;;  %v5433_v12 = vld [vmem:[%s4033_s29 + $0xca] sm:$0xff]  ;;  %v3471_v54 = vld [vmem:[#allocation3 + $0x21] ss:$0 sm:$0xff]  ;;  %v5436_v8 = vld [vmem:[%s4033_s29 + $0xd2] sm:$0xff] }
 0x194   : > { %v2003_v60 = vadd.f32 %v1987_v56, %v1950_v22  ;;  %v2004_v24 = vadd.f32 %v1988_v32, %v1951_v46  ;;  %v2005_v52 = vadd.f32 %v1989_v19, %v1952_v43  ;;  %v2006_v21 = vadd.f32 %v1990_v7, %v1953_v58  ;;  %6527 = vst [vmem:[#allocation43_spill] sm:$0xff] %v5430_v37  ;;  %v5439_v25 = vld [vmem:[%s4033_s29 + $0xea] sm:$0xff]  ;;  %v5442_v46 = vld [vmem:[%s4033_s29 + $0xf2] sm:$0xff] }
 0x195   : > { %v2007_v18 = vadd.f32 %v1991_v47, %v1954_v35  ;;  %6528 = vst [vmem:[#allocation44_spill] sm:$0xff] %v5433_v12  ;;  %v2008_v36 = vadd.f32 %v1992_v51, %v1955_v31  ;;  %v2009_v22 = vadd.f32 %v1993_v34, %v1956_v49  ;;  %v2010_v3 = vadd.f32 %v1994_v23, %v1957_v13  ;;  %v5445_v32 = vld [vmem:[%s4033_s29 + $0x12a] sm:$0xff]  ;;  %v5448_v19 = vld [vmem:[%s4033_s29 + $0x132] sm:$0xff] }
 0x196   : > { %v2011_v15 = vadd.f32 %v1995_v33, %v1958_v27  ;;  %6529 = vst [vmem:[#allocation45_spill] sm:$0xff] %v5436_v8  ;;  %6530 = vst [vmem:[#allocation46_spill] sm:$0xff] %v5439_v25  ;;  %v2012_v58 = vadd.f32 %v1996_v0, %v1959_v50  ;;  %v2013_v43 = vadd.f32 %v1997_v26, %v1960_v2  ;;  %v5451_v7 = vld [vmem:[%s4033_s29 + $0x16a] sm:$0xff]  ;;  %v5454_v31 = vld [vmem:[%s4033_s29 + $0x172] sm:$0xff] }
 0x197   : > { %6531 = vst [vmem:[#allocation47_spill] sm:$0xff] %v5442_v46  ;;  %v2014_v35 = vadd.f32 %v1998_v42, %v1961_v4  ;;  %v2015_v56 = vadd.f32 %v1999_v63, %v1962_v10  ;;  %6532 = vst [vmem:[#allocation48_spill] sm:$0xff] %v5445_v32  ;;  %v2037_v49 = vmul.f32 %v3471_v54, %v3455_v57  ;;  %v6535_v4 = vld [vmem:[#allocation88_spill] sm:$0xff]  ;;  %v6536_v34 = vld [vmem:[#allocation89_spill] sm:$0xff] }
 0x198   : > { %6533 = vst [vmem:[#allocation49_spill] sm:$0xff] %v5448_v19  ;;  %6534 = vst [vmem:[#allocation50_spill] sm:$0xff] %v5451_v7  ;;  %v2038_v13 = vmul.f32 %v3471_v54, %v3456_v62  ;;  %v2039_v27 = vmul.f32 %v3471_v54, %v5427_v20  ;;  %v2040_v47 = vmul.f32 %v3471_v54, %v5430_v37  ;;  %v6537_v0 = vld [vmem:[#allocation90_spill] sm:$0xff] }
 0x199   : > { %v2041_v51 = vmul.f32 %v3471_v54, %v5433_v12  ;;  %v2042_v50 = vmul.f32 %v3471_v54, %v5436_v8  ;;  %v2043_v63 = vmul.f32 %v3471_v54, %v5439_v25  ;;  %v2044_v2 = vmul.f32 %v3471_v54, %v5442_v46 }
 0x19a   : > { %v2045_v10 = vmul.f32 %v3471_v54, %v6535_v4  ;;  %v2046_v23 = vmul.f32 %v3471_v54, %v6536_v34  ;;  %v2047_v62 = vmul.f32 %v3471_v54, %v5445_v32  ;;  %v2048_v33 = vmul.f32 %v3471_v54, %v5448_v19  ;;  %v3472_v34 = vld [vmem:[%s4033_s29 + $0x8b] sm:$0xff]  ;;  %v3473_v32 = vld [vmem:[%s4033_s29 + $0x93] sm:$0xff] }
 0x19b   : > { %v2049_v26 = vmul.f32 %v3471_v54, %v6537_v0  ;;  %v2050_v42 = vmul.f32 %v3471_v54, %v5148_v1  ;;  %v2051_v57 = vmul.f32 %v3471_v54, %v5451_v7  ;;  %v2052_v25 = vmul.f32 %v3471_v54, %v5454_v31  ;;  %v5473_v19 = vld [vmem:[%s4033_s29 + $0xab] sm:$0xff]  ;;  %v5476_v7 = vld [vmem:[%s4033_s29 + $0xb3] sm:$0xff] }
 0x19c   : > { %v2053_v8 = vadd.f32 %v2037_v49, %v2000_v41  ;;  %v2054_v46 = vadd.f32 %v2038_v13, %v2001_v29  ;;  %v2055_v12 = vadd.f32 %v2039_v27, %v2002_v28  ;;  %v2056_v4 = vadd.f32 %v2040_v47, %v2003_v60  ;;  %6538 = vst [vmem:[#allocation51_spill] sm:$0xff] %v5476_v7  ;;  %v5479_v41 = vld [vmem:[%s4033_s29 + $0xcb] sm:$0xff]  ;;  %v3488_v28 = vld [vmem:[#allocation3 + $0x22] ss:$0 sm:$0xff]  ;;  %v5482_v13 = vld [vmem:[%s4033_s29 + $0xd3] sm:$0xff] }
 0x19d   : > { %v2057_v37 = vadd.f32 %v2041_v51, %v2004_v24  ;;  %v2058_v0 = vadd.f32 %v2042_v50, %v2005_v52  ;;  %v2059_v20 = vadd.f32 %v2043_v63, %v2006_v21  ;;  %v2060_v1 = vadd.f32 %v2044_v2, %v2007_v18  ;;  %6539 = vst [vmem:[#allocation52_spill] sm:$0xff] %v5479_v41  ;;  %v5485_v27 = vld [vmem:[%s4033_s29 + $0xeb] sm:$0xff]  ;;  %v5488_v24 = vld [vmem:[%s4033_s29 + $0xf3] sm:$0xff] }
 0x19e   : > { %v2061_v29 = vadd.f32 %v2045_v10, %v2008_v36  ;;  %v2062_v60 = vadd.f32 %v2046_v23, %v2009_v22  ;;  %v2063_v54 = vadd.f32 %v2047_v62, %v2010_v3  ;;  %v2064_v49 = vadd.f32 %v2048_v33, %v2011_v15  ;;  %6540 = vst [vmem:[#allocation53_spill] sm:$0xff] %v5482_v13  ;;  %v5491_v51 = vld [vmem:[%s4033_s29 + $0x12b] sm:$0xff]  ;;  %v5494_v50 = vld [vmem:[%s4033_s29 + $0x133] sm:$0xff] }
 0x19f   : > { %6541 = vst [vmem:[#allocation54_spill] sm:$0xff] %v5485_v27  ;;  %6542 = vst [vmem:[#allocation55_spill] sm:$0xff] %v5488_v24  ;;  %v2065_v21 = vadd.f32 %v2049_v26, %v2012_v58  ;;  %v2066_v52 = vadd.f32 %v2050_v42, %v2013_v43  ;;  %v2067_v18 = vadd.f32 %v2051_v57, %v2014_v35  ;;  %v5497_v63 = vld [vmem:[%s4033_s29 + $0x16b] sm:$0xff]  ;;  %v5500_v36 = vld [vmem:[%s4033_s29 + $0x173] sm:$0xff] }
 0x1a0   : > { %v2068_v47 = vadd.f32 %v2052_v25, %v2015_v56  ;;  %6543 = vst [vmem:[#allocation56_spill] sm:$0xff] %v5491_v51  ;;  %6544 = vst [vmem:[#allocation57_spill] sm:$0xff] %v5494_v50  ;;  %v2090_v22 = vmul.f32 %v3488_v28, %v3472_v34  ;;  %v2091_v3 = vmul.f32 %v3488_v28, %v3473_v32 }
 0x1a1   : > { %6545 = vst [vmem:[#allocation58_spill] sm:$0xff] %v5497_v63  ;;  %v2092_v15 = vmul.f32 %v3488_v28, %v5473_v19  ;;  %v2093_v2 = vmul.f32 %v3488_v28, %v5476_v7  ;;  %v2094_v10 = vmul.f32 %v3488_v28, %v5479_v41  ;;  %v2095_v58 = vmul.f32 %v3488_v28, %v5482_v13  ;;  %v5517_v7 = vld [vmem:[%s4033_s29 + $0x105] sm:$0xff] }
 0x1a2   : > { %v2096_v25 = vmul.f32 %v3488_v28, %v5485_v27  ;;  %v2097_v43 = vmul.f32 %v3488_v28, %v5488_v24  ;;  %v2098_v35 = vmul.f32 %v3488_v28, %v5167_v9  ;;  %v2099_v56 = vmul.f32 %v3488_v28, %v5170_v30  ;;  %v3507_v27 = vld [vmem:[#allocation3 + $0x23] ss:$0 sm:$0xff] }
 0x1a3   : > { %v2100_v23 = vmul.f32 %v3488_v28, %v5491_v51  ;;  %v2101_v32 = vmul.f32 %v3488_v28, %v5494_v50  ;;  %v2102_v62 = vmul.f32 %v3488_v28, %v5173_v53  ;;  %v2103_v33 = vmul.f32 %v3488_v28, %v5176_v48 }
 0x1a4   : > { %v2104_v26 = vmul.f32 %v3488_v28, %v5497_v63  ;;  %v2105_v42 = vmul.f32 %v3488_v28, %v5500_v36  ;;  %v2106_v57 = vadd.f32 %v2090_v22, %v2053_v8  ;;  %v2107_v34 = vadd.f32 %v2091_v3, %v2054_v46  ;;  %v5520_v28 = vld [vmem:[%s4033_s29 + $0x10d] sm:$0xff] }
 0x1a5   : > { %v2108_v24 = vadd.f32 %v2092_v15, %v2055_v12  ;;  %v2109_v9 = vadd.f32 %v2093_v2, %v2056_v4  ;;  %v2110_v30 = vadd.f32 %v2094_v10, %v2057_v37  ;;  %v2111_v51 = vadd.f32 %v2095_v58, %v2058_v0  ;;  %v5523_v37 = vld [vmem:[%s4033_s29 + $0x145] sm:$0xff]  ;;  %v5526_v0 = vld [vmem:[%s4033_s29 + $0x14d] sm:$0xff] }
 0x1a6   : > { %v2112_v50 = vadd.f32 %v2096_v25, %v2059_v20  ;;  %v2113_v53 = vadd.f32 %v2097_v43, %v2060_v1  ;;  %v2114_v48 = vadd.f32 %v2098_v35, %v2061_v29  ;;  %v2115_v13 = vadd.f32 %v2099_v56, %v2062_v60  ;;  %6546 = vst [vmem:[#allocation59_spill] sm:$0xff] %v5526_v0  ;;  %v5529_v20 = vld [vmem:[%s4033_s29 + $0x185] sm:$0xff]  ;;  %v5532_v1 = vld [vmem:[%s4033_s29 + $0x18d] sm:$0xff] }
 0x1a7   : > { %v2116_v41 = vadd.f32 %v2100_v23, %v2063_v54  ;;  %v2117_v63 = vadd.f32 %v2101_v32, %v2064_v49  ;;  %v2118_v8 = vadd.f32 %v2102_v62, %v2065_v21  ;;  %v2119_v12 = vadd.f32 %v2103_v33, %v2066_v52  ;;  %6547 = vst [vmem:[#allocation60_spill] sm:$0xff] %v5529_v20  ;;  %v6548_v49 = vld [vmem:[#allocation91_spill] sm:$0xff]  ;;  %v6549_v21 = vld [vmem:[#allocation92_spill] sm:$0xff]  ;;  %v6551_v2 = vld [vmem:[#allocation94_spill] sm:$0xff] }
 0x1a8   : > { %v2120_v46 = vadd.f32 %v2104_v26, %v2067_v18  ;;  %v2121_v4 = vadd.f32 %v2105_v42, %v2068_v47  ;;  %v2146_v29 = vmul.f32 %v3507_v27, %v5197_v11  ;;  %v2147_v60 = vmul.f32 %v3507_v27, %v5200_v38  ;;  %v6550_v18 = vld [vmem:[#allocation93_spill] sm:$0xff]  ;;  %v6552_v58 = vld [vmem:[#allocation95_spill] sm:$0xff]  ;;  %v6553_v43 = vld [vmem:[#allocation96_spill] sm:$0xff] }
 0x1a9   : > { %v2148_v54 = vmul.f32 %v3507_v27, %v5203_v16  ;;  %v2149_v22 = vmul.f32 %v3507_v27, %v6548_v49  ;;  %v2150_v52 = vmul.f32 %v3507_v27, %v6549_v21  ;;  %v2151_v47 = vmul.f32 %v3507_v27, %v6550_v18 }
 0x1aa   : > { %v2152_v3 = vmul.f32 %v3507_v27, %v5517_v7  ;;  %v2153_v15 = vmul.f32 %v3507_v27, %v5520_v28  ;;  %v2154_v10 = vmul.f32 %v3507_v27, %v6551_v2  ;;  %v2155_v25 = vmul.f32 %v3507_v27, %v6552_v58  ;;  %v3524_v2 = vld [vmem:[#allocation3 + $0x24] ss:$0 sm:$0xff] }
 0x1ab   : > { %v2156_v11 = vmul.f32 %v3507_v27, %v5523_v37  ;;  %v2157_v38 = vmul.f32 %v3507_v27, %v5526_v0  ;;  %v2158_v16 = vmul.f32 %v3507_v27, %v6553_v43  ;;  %v2159_v35 = vmul.f32 %v3507_v27, %v5224_v17  ;;  %v5551_v0 = vld [vmem:[%s4033_s29 + $0x106] sm:$0xff] }
 0x1ac   : > { %v2160_v56 = vmul.f32 %v3507_v27, %v5529_v20  ;;  %v2161_v23 = vmul.f32 %v3507_v27, %v5532_v1  ;;  %v2162_v32 = vadd.f32 %v2146_v29, %v2106_v57  ;;  %v2163_v62 = vadd.f32 %v2147_v60, %v2107_v34  ;;  %v5554_v27 = vld [vmem:[%s4033_s29 + $0x10e] sm:$0xff] }
 0x1ad   : > { %v2164_v33 = vadd.f32 %v2148_v54, %v2108_v24  ;;  %v2165_v26 = vadd.f32 %v2149_v22, %v2109_v9  ;;  %v2166_v42 = vadd.f32 %v2150_v52, %v2110_v30  ;;  %v2167_v49 = vadd.f32 %v2151_v47, %v2111_v51  ;;  %v5557_v30 = vld [vmem:[%s4033_s29 + $0x146] sm:$0xff]  ;;  %v5560_v51 = vld [vmem:[%s4033_s29 + $0x14e] sm:$0xff]  ;;  %v6559_v22 = vld [vmem:[#allocation21_spill] sm:$0xff] }
 0x1ae   : > { %v2168_v21 = vadd.f32 %v2152_v3, %v2112_v50  ;;  %v2169_v18 = vadd.f32 %v2153_v15, %v2113_v53  ;;  %v2170_v17 = vadd.f32 %v2154_v10, %v2114_v48  ;;  %v2171_v58 = vadd.f32 %v2155_v25, %v2115_v13  ;;  %6554 = vst [vmem:[#allocation61_spill] sm:$0xff] %v5560_v51  ;;  %v5563_v50 = vld [vmem:[%s4033_s29 + $0x186] sm:$0xff]  ;;  %v5566_v53 = vld [vmem:[%s4033_s29 + $0x18e] sm:$0xff]  ;;  %v6556_v48 = vld [vmem:[#allocation97_spill] sm:$0xff] }
 0x1af   : > { %v2172_v43 = vadd.f32 %v2156_v11, %v2116_v41  ;;  %v2173_v20 = vadd.f32 %v2157_v38, %v2117_v63  ;;  %v2174_v57 = vadd.f32 %v2158_v16, %v2118_v8  ;;  %v2175_v24 = vadd.f32 %v2159_v35, %v2119_v12  ;;  %6555 = vst [vmem:[#allocation62_spill] sm:$0xff] %v5563_v50  ;;  %v6557_v8 = vld [vmem:[#allocation98_spill] sm:$0xff]  ;;  %v6561_v15 = vld [vmem:[#allocation15_spill] sm:$0xff] }
 0x1b0   : > { %v2176_v34 = vadd.f32 %v2160_v56, %v2120_v46  ;;  %v2177_v9 = vadd.f32 %v2161_v23, %v2121_v4  ;;  %v2199_v13 = vmul.f32 %v3524_v2, %v5243_v44  ;;  %v2200_v41 = vmul.f32 %v3524_v2, %v5246_v6  ;;  %v6558_v46 = vld [vmem:[#allocation17_spill] sm:$0xff]  ;;  %v6560_v47 = vld [vmem:[#allocation14_spill] sm:$0xff] }
 0x1b1   : > { %v2201_v63 = vmul.f32 %v3524_v2, %v5249_v40  ;;  %v2202_v29 = vmul.f32 %v3524_v2, %v6556_v48  ;;  %v2203_v12 = vmul.f32 %v3524_v2, %v6557_v8  ;;  %v2204_v4 = vmul.f32 %v3524_v2, %v6558_v46 }
 0x1b2   : > { %v2205_v60 = vmul.f32 %v3524_v2, %v5551_v0  ;;  %v2206_v54 = vmul.f32 %v3524_v2, %v5554_v27  ;;  %v2207_v52 = vmul.f32 %v3524_v2, %v6559_v22  ;;  %v2208_v3 = vmul.f32 %v3524_v2, %v6560_v47  ;;  %v3541_v22 = vld [vmem:[#allocation3 + $0x25] ss:$0 sm:$0xff] }
 0x1b3   : > { %v2209_v44 = vmul.f32 %v3524_v2, %v5557_v30  ;;  %v2210_v6 = vmul.f32 %v3524_v2, %v5560_v51  ;;  %v2211_v40 = vmul.f32 %v3524_v2, %v6561_v15  ;;  %v2212_v10 = vmul.f32 %v3524_v2, %v5270_v61  ;;  %v5585_v51 = vld [vmem:[%s4033_s29 + $0x107] sm:$0xff] }
 0x1b4   : > { %v2213_v25 = vmul.f32 %v3524_v2, %v5563_v50  ;;  %v2214_v11 = vmul.f32 %v3524_v2, %v5566_v53  ;;  %v2215_v38 = vadd.f32 %v2199_v13, %v2162_v32  ;;  %v2216_v16 = vadd.f32 %v2200_v41, %v2163_v62  ;;  %v5588_v2 = vld [vmem:[%s4033_s29 + $0x10f] sm:$0xff]  ;;  %v6566_v13 = vld [vmem:[#allocation18_spill] sm:$0xff] }
 0x1b5   : > { %v2217_v35 = vadd.f32 %v2201_v63, %v2164_v33  ;;  %v2218_v56 = vadd.f32 %v2202_v29, %v2165_v26  ;;  %v2219_v23 = vadd.f32 %v2203_v12, %v2166_v42  ;;  %v2220_v48 = vadd.f32 %v2204_v4, %v2167_v49  ;;  %v5591_v42 = vld [vmem:[%s4033_s29 + $0x147] sm:$0xff]  ;;  %v5594_v49 = vld [vmem:[%s4033_s29 + $0x14f] sm:$0xff] }
 0x1b6   : > { %v2221_v8 = vadd.f32 %v2205_v60, %v2168_v21  ;;  %v2222_v46 = vadd.f32 %v2206_v54, %v2169_v18  ;;  %v2223_v61 = vadd.f32 %v2207_v52, %v2170_v17  ;;  %v2224_v47 = vadd.f32 %v2208_v3, %v2171_v58  ;;  %6562 = vst [vmem:[#allocation63_spill] sm:$0xff] %v5591_v42  ;;  %v5597_v21 = vld [vmem:[%s4033_s29 + $0x187] sm:$0xff]  ;;  %v5600_v18 = vld [vmem:[%s4033_s29 + $0x18f] sm:$0xff] }
 0x1b7   : > { %v2225_v15 = vadd.f32 %v2209_v44, %v2172_v43  ;;  %v2226_v50 = vadd.f32 %v2210_v6, %v2173_v20  ;;  %v2227_v32 = vadd.f32 %v2211_v40, %v2174_v57  ;;  %v2228_v62 = vadd.f32 %v2212_v10, %v2175_v24  ;;  %6563 = vst [vmem:[#allocation64_spill] sm:$0xff] %v5594_v49  ;;  %v6565_v58 = vld [vmem:[#allocation16_spill] sm:$0xff]  ;;  %v6567_v57 = vld [vmem:[#allocation19_spill] sm:$0xff]  ;;  %v6569_v12 = vld [vmem:[#allocation22_spill] sm:$0xff] }
 0x1b8   : > { %v2229_v33 = vadd.f32 %v2213_v25, %v2176_v34  ;;  %v2230_v26 = vadd.f32 %v2214_v11, %v2177_v9  ;;  %6564 = vst [vmem:[#allocation65_spill] sm:$0xff] %v5597_v21  ;;  %v2252_v17 = vmul.f32 %v3541_v22, %v5289_v39  ;;  %v2253_v20 = vmul.f32 %v3541_v22, %v5292_v14  ;;  %v6568_v34 = vld [vmem:[#allocation20_spill] sm:$0xff]  ;;  %v6570_v60 = vld [vmem:[#allocation23_spill] sm:$0xff] }
 0x1b9   : > { %v2254_v43 = vmul.f32 %v3541_v22, %v6565_v58  ;;  %v2255_v41 = vmul.f32 %v3541_v22, %v6566_v13  ;;  %v2256_v24 = vmul.f32 %v3541_v22, %v6567_v57  ;;  %v2257_v9 = vmul.f32 %v3541_v22, %v6568_v34  ;;  %v6571_v52 = vld [vmem:[#allocation24_spill] sm:$0xff] }
 0x1ba   : > { %v2258_v63 = vmul.f32 %v3541_v22, %v5585_v51  ;;  %v2259_v29 = vmul.f32 %v3541_v22, %v5588_v2  ;;  %v2260_v4 = vmul.f32 %v3541_v22, %v6569_v12  ;;  %v2261_v54 = vmul.f32 %v3541_v22, %v6570_v60  ;;  %v3558_v60 = vld [vmem:[#allocation3 + $0x26] ss:$0 sm:$0xff] }
 0x1bb   : > { %v2262_v39 = vmul.f32 %v3541_v22, %v5591_v42  ;;  %v2263_v14 = vmul.f32 %v3541_v22, %v5594_v49  ;;  %v2264_v3 = vmul.f32 %v3541_v22, %v6571_v52  ;;  %v2265_v44 = vmul.f32 %v3541_v22, %v5316_v55  ;;  %v5619_v42 = vld [vmem:[%s4033_s29 + $0x108] sm:$0xff] }
 0x1bc   : > { %v2266_v6 = vmul.f32 %v3541_v22, %v5597_v21  ;;  %v2267_v40 = vmul.f32 %v3541_v22, %v5600_v18  ;;  %v2268_v10 = vadd.f32 %v2252_v17, %v2215_v38  ;;  %v2269_v25 = vadd.f32 %v2253_v20, %v2216_v16  ;;  %v5622_v22 = vld [vmem:[%s4033_s29 + $0x110] sm:$0xff]  ;;  %v6578_v20 = vld [vmem:[#allocation27_spill] sm:$0xff] }
 0x1bd   : > { %v2270_v11 = vadd.f32 %v2254_v43, %v2217_v35  ;;  %v2271_v58 = vadd.f32 %v2255_v41, %v2218_v56  ;;  %v2272_v13 = vadd.f32 %v2256_v24, %v2219_v23  ;;  %v2273_v57 = vadd.f32 %v2257_v9, %v2220_v48  ;;  %6572 = vst [vmem:[#allocation66_spill] sm:$0xff] %v5622_v22  ;;  %v5625_v23 = vld [vmem:[%s4033_s29 + $0x148] sm:$0xff]  ;;  %v5628_v48 = vld [vmem:[%s4033_s29 + $0x150] sm:$0xff]  ;;  %v6581_v9 = vld [vmem:[#allocation30_spill] sm:$0xff] }
 0x1be   : > { %v2274_v34 = vadd.f32 %v2258_v63, %v2221_v8  ;;  %v2275_v12 = vadd.f32 %v2259_v29, %v2222_v46  ;;  %v2276_v55 = vadd.f32 %v2260_v4, %v2223_v61  ;;  %v2277_v52 = vadd.f32 %v2261_v54, %v2224_v47  ;;  %6573 = vst [vmem:[#allocation67_spill] sm:$0xff] %v5625_v23  ;;  %v5631_v8 = vld [vmem:[%s4033_s29 + $0x188] sm:$0xff]  ;;  %v5634_v46 = vld [vmem:[%s4033_s29 + $0x190] sm:$0xff]  ;;  %v6576_v47 = vld [vmem:[#allocation25_spill] sm:$0xff] }
 0x1bf   : > { %v2278_v49 = vadd.f32 %v2262_v39, %v2225_v15  ;;  %v2279_v21 = vadd.f32 %v2263_v14, %v2226_v50  ;;  %v2280_v38 = vadd.f32 %v2264_v3, %v2227_v32  ;;  %v2281_v16 = vadd.f32 %v2265_v44, %v2228_v62  ;;  %6574 = vst [vmem:[#allocation68_spill] sm:$0xff] %v5628_v48  ;;  %v6577_v15 = vld [vmem:[#allocation26_spill] sm:$0xff]  ;;  %v6579_v32 = vld [vmem:[#allocation28_spill] sm:$0xff]  ;;  %v6582_v29 = vld [vmem:[#allocation31_spill] sm:$0xff] }
 0x1c0   : > { %v2282_v35 = vadd.f32 %v2266_v6, %v2229_v33  ;;  %v2283_v56 = vadd.f32 %v2267_v40, %v2230_v26  ;;  %6575 = vst [vmem:[#allocation69_spill] sm:$0xff] %v5631_v8  ;;  %v2305_v61 = vmul.f32 %v3558_v60, %v5335_v45  ;;  %v2306_v50 = vmul.f32 %v3558_v60, %v6576_v47  ;;  %v6580_v33 = vld [vmem:[#allocation29_spill] sm:$0xff]  ;;  %v6583_v39 = vld [vmem:[#allocation32_spill] sm:$0xff] }
 0x1c1   : > { %v2307_v17 = vmul.f32 %v3558_v60, %v6577_v15  ;;  %v2308_v43 = vmul.f32 %v3558_v60, %v6578_v20  ;;  %v2309_v62 = vmul.f32 %v3558_v60, %v6579_v32  ;;  %v2310_v26 = vmul.f32 %v3558_v60, %v6580_v33 }
 0x1c2   : > { %v2311_v41 = vmul.f32 %v3558_v60, %v5619_v42  ;;  %v2312_v24 = vmul.f32 %v3558_v60, %v5622_v22  ;;  %v2313_v63 = vmul.f32 %v3558_v60, %v6581_v9  ;;  %v2314_v4 = vmul.f32 %v3558_v60, %v6582_v29  ;;  %v5653_v22 = vld [vmem:[%s4033_s29 + $0x109] sm:$0xff] }
 0x1c3   : > { %v2315_v45 = vmul.f32 %v3558_v60, %v5625_v23  ;;  %v2316_v54 = vmul.f32 %v3558_v60, %v5628_v48  ;;  %v2317_v14 = vmul.f32 %v3558_v60, %v6583_v39  ;;  %v2318_v3 = vmul.f32 %v3558_v60, %v5362_v59  ;;  %v3575_v39 = vld [vmem:[#allocation3 + $0x27] ss:$0 sm:$0xff]  ;;  %6584 = vst [vmem:[#allocation70_spill] sm:$0xff] %v5653_v22 }
 0x1c4   : > { %v2319_v44 = vmul.f32 %v3558_v60, %v5631_v8  ;;  %v2320_v6 = vmul.f32 %v3558_v60, %v5634_v46  ;;  %v2321_v40 = vadd.f32 %v2305_v61, %v2268_v10  ;;  %v2322_v47 = vadd.f32 %v2306_v50, %v2269_v25  ;;  %v5656_v60 = vld [vmem:[%s4033_s29 + $0x111] sm:$0xff]  ;;  %v6591_v61 = vld [vmem:[#allocation35_spill] sm:$0xff] }
 0x1c5   : > { %v2323_v15 = vadd.f32 %v2307_v17, %v2270_v11  ;;  %v2324_v20 = vadd.f32 %v2308_v43, %v2271_v58  ;;  %v2325_v32 = vadd.f32 %v2309_v62, %v2272_v13  ;;  %v2326_v33 = vadd.f32 %v2310_v26, %v2273_v57  ;;  %6585 = vst [vmem:[#allocation71_spill] sm:$0xff] %v5656_v60  ;;  %v5659_v13 = vld [vmem:[%s4033_s29 + $0x149] sm:$0xff]  ;;  %v5662_v57 = vld [vmem:[%s4033_s29 + $0x151] sm:$0xff] }
 0x1c6   : > { %v2327_v9 = vadd.f32 %v2311_v41, %v2274_v34  ;;  %v2328_v29 = vadd.f32 %v2312_v24, %v2275_v12  ;;  %v2329_v59 = vadd.f32 %v2313_v63, %v2276_v55  ;;  %v2330_v48 = vadd.f32 %v2314_v4, %v2277_v52  ;;  %6586 = vst [vmem:[#allocation72_spill] sm:$0xff] %v5659_v13  ;;  %v5665_v34 = vld [vmem:[%s4033_s29 + $0x189] sm:$0xff]  ;;  %v5668_v12 = vld [vmem:[%s4033_s29 + $0x191] sm:$0xff] }
 0x1c7   : > { %v2331_v23 = vadd.f32 %v2315_v45, %v2278_v49  ;;  %v2332_v8 = vadd.f32 %v2316_v54, %v2279_v21  ;;  %v2333_v10 = vadd.f32 %v2317_v14, %v2280_v38  ;;  %v2334_v25 = vadd.f32 %v2318_v3, %v2281_v16  ;;  %6587 = vst [vmem:[#allocation73_spill] sm:$0xff] %v5662_v57  ;;  %v6589_v55 = vld [vmem:[#allocation33_spill] sm:$0xff]  ;;  %v6590_v49 = vld [vmem:[#allocation34_spill] sm:$0xff]  ;;  %v6592_v17 = vld [vmem:[#allocation36_spill] sm:$0xff] }
 0x1c8   : > { %v2335_v11 = vadd.f32 %v2319_v44, %v2282_v35  ;;  %v2336_v58 = vadd.f32 %v2320_v6, %v2283_v56  ;;  %6588 = vst [vmem:[#allocation74_spill] sm:$0xff] %v5665_v34  ;;  %v2358_v52 = vmul.f32 %v3575_v39, %v6589_v55  ;;  %v2359_v21 = vmul.f32 %v3575_v39, %v6590_v49  ;;  %v6593_v38 = vld [vmem:[#allocation37_spill] sm:$0xff]  ;;  %v6594_v35 = vld [vmem:[#allocation38_spill] sm:$0xff]  ;;  %v6595_v41 = vld [vmem:[#allocation39_spill] sm:$0xff] }
 0x1c9   : > { %v2360_v50 = vmul.f32 %v3575_v39, %v6591_v61  ;;  %v2361_v43 = vmul.f32 %v3575_v39, %v6592_v17  ;;  %v2362_v16 = vmul.f32 %v3575_v39, %v6593_v38  ;;  %v2363_v56 = vmul.f32 %v3575_v39, %v6594_v35  ;;  %v6596_v63 = vld [vmem:[#allocation40_spill] sm:$0xff]  ;;  %v6597_v14 = vld [vmem:[#allocation41_spill] sm:$0xff] }
 0x1ca   : > { %v2364_v62 = vmul.f32 %v3575_v39, %v5653_v22  ;;  %v2365_v26 = vmul.f32 %v3575_v39, %v5656_v60  ;;  %v2366_v24 = vmul.f32 %v3575_v39, %v6595_v41  ;;  %v2367_v4 = vmul.f32 %v3575_v39, %v6596_v63  ;;  %v5687_v22 = vld [vmem:[%s4033_s29 + $0x10a] sm:$0xff] }
 0x1cb   : > { %v2368_v45 = vmul.f32 %v3575_v39, %v5659_v13  ;;  %v2369_v54 = vmul.f32 %v3575_v39, %v5662_v57  ;;  %v2370_v3 = vmul.f32 %v3575_v39, %v6597_v14  ;;  %v2371_v44 = vmul.f32 %v3575_v39, %v5408_v5  ;;  %v3592_v57 = vld [vmem:[#allocation3 + $0x28] ss:$0 sm:$0xff]  ;;  %6598 = vst [vmem:[#allocation75_spill] sm:$0xff] %v5687_v22 }
 0x1cc   : > { %v2372_v6 = vmul.f32 %v3575_v39, %v5665_v34  ;;  %v2373_v55 = vmul.f32 %v3575_v39, %v5668_v12  ;;  %v2374_v49 = vadd.f32 %v2358_v52, %v2321_v40  ;;  %v2375_v61 = vadd.f32 %v2359_v21, %v2322_v47  ;;  %v5690_v39 = vld [vmem:[%s4033_s29 + $0x112] sm:$0xff] }
 0x1cd   : > { %v2376_v17 = vadd.f32 %v2360_v50, %v2323_v15  ;;  %v2377_v38 = vadd.f32 %v2361_v43, %v2324_v20  ;;  %v2378_v35 = vadd.f32 %v2362_v16, %v2325_v32  ;;  %v2379_v41 = vadd.f32 %v2363_v56, %v2326_v33  ;;  %6599 = vst [vmem:[#allocation76_spill] sm:$0xff] %v5690_v39  ;;  %v5693_v32 = vld [vmem:[%s4033_s29 + $0x14a] sm:$0xff]  ;;  %v5696_v33 = vld [vmem:[%s4033_s29 + $0x152] sm:$0xff] }
 0x1ce   : > { %v2380_v63 = vadd.f32 %v2364_v62, %v2327_v9  ;;  %v2381_v14 = vadd.f32 %v2365_v26, %v2328_v29  ;;  %v2382_v5 = vadd.f32 %v2366_v24, %v2329_v59  ;;  %v2383_v13 = vadd.f32 %v2367_v4, %v2330_v48  ;;  %6600 = vst [vmem:[#allocation77_spill] sm:$0xff] %v5693_v32  ;;  %v5699_v9 = vld [vmem:[%s4033_s29 + $0x18a] sm:$0xff]  ;;  %v5702_v29 = vld [vmem:[%s4033_s29 + $0x192] sm:$0xff]  ;;  %v6603_v59 = vld [vmem:[#allocation42_spill] sm:$0xff] }
 0x1cf   : > { %v2384_v60 = vadd.f32 %v2368_v45, %v2331_v23  ;;  %v2385_v34 = vadd.f32 %v2369_v54, %v2332_v8  ;;  %v2386_v40 = vadd.f32 %v2370_v3, %v2333_v10  ;;  %v2387_v47 = vadd.f32 %v2371_v44, %v2334_v25  ;;  %6601 = vst [vmem:[#allocation78_spill] sm:$0xff] %v5696_v33  ;;  %v6604_v23 = vld [vmem:[#allocation43_spill] sm:$0xff]  ;;  %v6605_v52 = vld [vmem:[#allocation44_spill] sm:$0xff]  ;;  %v6606_v50 = vld [vmem:[#allocation45_spill] sm:$0xff] }
 0x1d0   : > { %v2388_v15 = vadd.f32 %v2372_v6, %v2335_v11  ;;  %v2389_v20 = vadd.f32 %v2373_v55, %v2336_v58  ;;  %6602 = vst [vmem:[#allocation79_spill] sm:$0xff] %v5699_v9  ;;  %v2411_v48 = vmul.f32 %v3592_v57, %v6603_v59  ;;  %v2412_v8 = vmul.f32 %v3592_v57, %v6604_v23  ;;  %v6607_v10 = vld [vmem:[#allocation46_spill] sm:$0xff]  ;;  %v6608_v11 = vld [vmem:[#allocation47_spill] sm:$0xff]  ;;  %v6609_v62 = vld [vmem:[#allocation48_spill] sm:$0xff] }
 0x1d1   : > { %v2413_v21 = vmul.f32 %v3592_v57, %v6605_v52  ;;  %v2414_v43 = vmul.f32 %v3592_v57, %v6606_v50  ;;  %v2415_v25 = vmul.f32 %v3592_v57, %v6607_v10  ;;  %v2416_v58 = vmul.f32 %v3592_v57, %v6608_v11  ;;  %v6610_v24 = vld [vmem:[#allocation49_spill] sm:$0xff]  ;;  %v6611_v3 = vld [vmem:[#allocation50_spill] sm:$0xff] }
 0x1d2   : > { %v2417_v16 = vmul.f32 %v3592_v57, %v5687_v22  ;;  %v2418_v56 = vmul.f32 %v3592_v57, %v5690_v39  ;;  %v2419_v26 = vmul.f32 %v3592_v57, %v6609_v62  ;;  %v2420_v4 = vmul.f32 %v3592_v57, %v6610_v24  ;;  %v5721_v22 = vld [vmem:[%s4033_s29 + $0x10b] sm:$0xff] }
 0x1d3   : > { %v2421_v45 = vmul.f32 %v3592_v57, %v5693_v32  ;;  %v2422_v54 = vmul.f32 %v3592_v57, %v5696_v33  ;;  %v2423_v44 = vmul.f32 %v3592_v57, %v6611_v3  ;;  %v2424_v6 = vmul.f32 %v3592_v57, %v5454_v31  ;;  %v3609_v33 = vld [vmem:[#allocation3 + $0x29] ss:$0 sm:$0xff] }
 0x1d4   : > { %v2425_v55 = vmul.f32 %v3592_v57, %v5699_v9  ;;  %v2426_v59 = vmul.f32 %v3592_v57, %v5702_v29  ;;  %v2427_v23 = vadd.f32 %v2411_v48, %v2374_v49  ;;  %v2428_v52 = vadd.f32 %v2412_v8, %v2375_v61  ;;  %v5724_v57 = vld [vmem:[%s4033_s29 + $0x113] sm:$0xff] }
 0x1d5   : > { %v2429_v50 = vadd.f32 %v2413_v21, %v2376_v17  ;;  %v2430_v10 = vadd.f32 %v2414_v43, %v2377_v38  ;;  %v2431_v11 = vadd.f32 %v2415_v25, %v2378_v35  ;;  %v2432_v62 = vadd.f32 %v2416_v58, %v2379_v41  ;;  %6612 = vst [vmem:[#allocation80_spill] sm:$0xff] %v5724_v57  ;;  %v5727_v35 = vld [vmem:[%s4033_s29 + $0x14b] sm:$0xff]  ;;  %v5730_v41 = vld [vmem:[%s4033_s29 + $0x153] sm:$0xff] }
 0x1d6   : > { %v2433_v24 = vadd.f32 %v2417_v16, %v2380_v63  ;;  %v2434_v3 = vadd.f32 %v2418_v56, %v2381_v14  ;;  %v2435_v31 = vadd.f32 %v2419_v26, %v2382_v5  ;;  %v2436_v32 = vadd.f32 %v2420_v4, %v2383_v13  ;;  %6613 = vst [vmem:[#allocation81_spill] sm:$0xff] %v5727_v35  ;;  %v5733_v63 = vld [vmem:[%s4033_s29 + $0x18b] sm:$0xff]  ;;  %v5736_v14 = vld [vmem:[%s4033_s29 + $0x193] sm:$0xff] }
 0x1d7   : > { %v2437_v39 = vadd.f32 %v2421_v45, %v2384_v60  ;;  %v2438_v9 = vadd.f32 %v2422_v54, %v2385_v34  ;;  %v2439_v49 = vadd.f32 %v2423_v44, %v2386_v40  ;;  %v2440_v61 = vadd.f32 %v2424_v6, %v2387_v47  ;;  %6614 = vst [vmem:[#allocation82_spill] sm:$0xff] %v5730_v41  ;;  %v6617_v60 = vld [vmem:[#allocation51_spill] sm:$0xff]  ;;  %v6618_v5 = vld [vmem:[#allocation52_spill] sm:$0xff]  ;;  %v6619_v8 = vld [vmem:[#allocation53_spill] sm:$0xff] }
 0x1d8   : > { %v2441_v17 = vadd.f32 %v2425_v55, %v2388_v15  ;;  %v2442_v38 = vadd.f32 %v2426_v59, %v2389_v20  ;;  %6615 = vst [vmem:[#allocation83_spill] sm:$0xff] %v5733_v63  ;;  %6616 = vst [vmem:[#allocation84_spill] sm:$0xff] %v5736_v14  ;;  %v2464_v13 = vmul.f32 %v3609_v33, %v5473_v19  ;;  %v6620_v40 = vld [vmem:[#allocation54_spill] sm:$0xff]  ;;  %v6621_v15 = vld [vmem:[#allocation55_spill] sm:$0xff] }
 0x1d9   : > { %v2465_v34 = vmul.f32 %v3609_v33, %v6617_v60  ;;  %v2466_v48 = vmul.f32 %v3609_v33, %v6618_v5  ;;  %v2467_v21 = vmul.f32 %v3609_v33, %v6619_v8  ;;  %v2468_v47 = vmul.f32 %v3609_v33, %v6620_v40  ;;  %v6622_v58 = vld [vmem:[#allocation56_spill] sm:$0xff]  ;;  %v6623_v56 = vld [vmem:[#allocation57_spill] sm:$0xff]  ;;  %v6624_v45 = vld [vmem:[#allocation58_spill] sm:$0xff] }
 0x1da   : > { %v2469_v20 = vmul.f32 %v3609_v33, %v6621_v15  ;;  %v2470_v43 = vmul.f32 %v3609_v33, %v5721_v22  ;;  %v2471_v25 = vmul.f32 %v3609_v33, %v5724_v57  ;;  %v2472_v16 = vmul.f32 %v3609_v33, %v6622_v58  ;;  %v3612_v40 = vld [vmem:[%s4033_s29 + $0xc5] sm:$0xff]  ;;  %v3613_v15 = vld [vmem:[%s4033_s29 + $0xcd] sm:$0xff] }
 0x1db   : > { %v2473_v19 = vmul.f32 %v3609_v33, %v6623_v56  ;;  %v2474_v26 = vmul.f32 %v3609_v33, %v5727_v35  ;;  %v2475_v4 = vmul.f32 %v3609_v33, %v5730_v41  ;;  %v2476_v54 = vmul.f32 %v3609_v33, %v6624_v45  ;;  %v3628_v35 = vld [vmem:[#allocation3 + $0x2a] ss:$0 sm:$0xff] }
 0x1dc   : > { %v2477_v44 = vmul.f32 %v3609_v33, %v5500_v36  ;;  %v2478_v6 = vmul.f32 %v3609_v33, %v5733_v63  ;;  %v2479_v55 = vmul.f32 %v3609_v33, %v5736_v14  ;;  %v2480_v59 = vadd.f32 %v2464_v13, %v2427_v23  ;;  %v3614_v36 = vld [vmem:[%s4033_s29 + $0xe5] sm:$0xff]  ;;  %v3615_v63 = vld [vmem:[%s4033_s29 + $0xed] sm:$0xff] }
 0x1dd   : > { %v2481_v60 = vadd.f32 %v2465_v34, %v2428_v52  ;;  %v2482_v5 = vadd.f32 %v2466_v48, %v2429_v50  ;;  %v2483_v8 = vadd.f32 %v2467_v21, %v2430_v10  ;;  %v2484_v58 = vadd.f32 %v2468_v47, %v2431_v11  ;;  %v3618_v50 = vld [vmem:[%s4033_s29 + $0x125] sm:$0xff]  ;;  %v3619_v34 = vld [vmem:[%s4033_s29 + $0x12d] sm:$0xff] }
 0x1de   : > { %v2485_v56 = vadd.f32 %v2469_v20, %v2432_v62  ;;  %v2486_v41 = vadd.f32 %v2470_v43, %v2433_v24  ;;  %v2487_v45 = vadd.f32 %v2471_v25, %v2434_v3  ;;  %v2488_v33 = vadd.f32 %v2472_v16, %v2435_v31  ;;  %v3622_v62 = vld [vmem:[%s4033_s29 + $0x165] sm:$0xff]  ;;  %v3623_v47 = vld [vmem:[%s4033_s29 + $0x16d] sm:$0xff] }
 0x1df   : > { %v2489_v23 = vadd.f32 %v2473_v19, %v2436_v32  ;;  %v2490_v52 = vadd.f32 %v2474_v26, %v2437_v39  ;;  %v2491_v13 = vadd.f32 %v2475_v4, %v2438_v9  ;;  %v2492_v10 = vadd.f32 %v2476_v54, %v2439_v49  ;;  %v3626_v24 = vld [vmem:[%s4033_s29 + $0x1a5] sm:$0xff]  ;;  %v3627_v20 = vld [vmem:[%s4033_s29 + $0x1ad] sm:$0xff] }
 0x1e0   : > { %v2493_v48 = vadd.f32 %v2477_v44, %v2440_v61  ;;  %v2494_v21 = vadd.f32 %v2478_v6, %v2441_v17  ;;  %v2495_v11 = vadd.f32 %v2479_v55, %v2442_v38  ;;  %v2520_v3 = vmul.f32 %v3628_v35, %v3612_v40  ;;  %v6625_v49 = vld [vmem:[#allocation59_spill] sm:$0xff]  ;;  %v6626_v16 = vld [vmem:[#allocation60_spill] sm:$0xff] }
 0x1e1   : > { %v2521_v43 = vmul.f32 %v3628_v35, %v3613_v15  ;;  %v2522_v25 = vmul.f32 %v3628_v35, %v3614_v36  ;;  %v2523_v14 = vmul.f32 %v3628_v35, %v3615_v63  ;;  %v2524_v57 = vmul.f32 %v3628_v35, %v5517_v7  ;;  %v3629_v6 = vld [vmem:[%s4033_s29 + $0xc6] sm:$0xff] }
 0x1e2   : > { %v2525_v39 = vmul.f32 %v3628_v35, %v5520_v28  ;;  %v2526_v32 = vmul.f32 %v3628_v35, %v3618_v50  ;;  %v2527_v9 = vmul.f32 %v3628_v35, %v3619_v34  ;;  %v2528_v31 = vmul.f32 %v3628_v35, %v5523_v37  ;;  %v3630_v37 = vld [vmem:[%s4033_s29 + $0xce] sm:$0xff]  ;;  %v3631_v50 = vld [vmem:[%s4033_s29 + $0xe6] sm:$0xff] }
 0x1e3   : > { %v2529_v61 = vmul.f32 %v3628_v35, %v6625_v49  ;;  %v2530_v17 = vmul.f32 %v3628_v35, %v3622_v62  ;;  %v2531_v38 = vmul.f32 %v3628_v35, %v3623_v47  ;;  %v2532_v19 = vmul.f32 %v3628_v35, %v6626_v16  ;;  %v3645_v34 = vld [vmem:[#allocation3 + $0x2b] ss:$0 sm:$0xff]  ;;  %v3636_v47 = vld [vmem:[%s4033_s29 + $0x12e] sm:$0xff] }
 0x1e4   : > { %v2533_v63 = vmul.f32 %v3628_v35, %v5532_v1  ;;  %v2534_v26 = vmul.f32 %v3628_v35, %v3626_v24  ;;  %v2535_v7 = vmul.f32 %v3628_v35, %v3627_v20  ;;  %v2536_v4 = vadd.f32 %v2520_v3, %v2480_v59  ;;  %v3632_v1 = vld [vmem:[%s4033_s29 + $0xee] sm:$0xff] }
 0x1e5   : > { %v2537_v54 = vadd.f32 %v2521_v43, %v2481_v60  ;;  %v2538_v28 = vadd.f32 %v2522_v25, %v2482_v5  ;;  %v2539_v44 = vadd.f32 %v2523_v14, %v2483_v8  ;;  %v2540_v55 = vadd.f32 %v2524_v57, %v2484_v58  ;;  %v3635_v5 = vld [vmem:[%s4033_s29 + $0x126] sm:$0xff]  ;;  %v3644_v20 = vld [vmem:[%s4033_s29 + $0x1ae] sm:$0xff] }
 0x1e6   : > { %v2541_v40 = vadd.f32 %v2525_v39, %v2485_v56  ;;  %v2542_v15 = vadd.f32 %v2526_v32, %v2486_v41  ;;  %v2543_v36 = vadd.f32 %v2527_v9, %v2487_v45  ;;  %v2544_v35 = vadd.f32 %v2528_v31, %v2488_v33  ;;  %v3639_v58 = vld [vmem:[%s4033_s29 + $0x166] sm:$0xff]  ;;  %v3640_v56 = vld [vmem:[%s4033_s29 + $0x16e] sm:$0xff] }
 0x1e7   : > { %v2545_v59 = vadd.f32 %v2529_v61, %v2489_v23  ;;  %v2546_v60 = vadd.f32 %v2530_v17, %v2490_v52  ;;  %v2547_v62 = vadd.f32 %v2531_v38, %v2491_v13  ;;  %v2548_v14 = vadd.f32 %v2532_v19, %v2492_v10  ;;  %v3643_v41 = vld [vmem:[%s4033_s29 + $0x1a6] sm:$0xff]  ;;  %v6627_v10 = vld [vmem:[#allocation61_spill] sm:$0xff] }
 0x1e8   : > { %v2549_v8 = vadd.f32 %v2533_v63, %v2493_v48  ;;  %v2550_v24 = vadd.f32 %v2534_v26, %v2494_v21  ;;  %v2551_v57 = vadd.f32 %v2535_v7, %v2495_v11  ;;  %v2573_v45 = vmul.f32 %v3645_v34, %v3629_v6  ;;  %v6628_v32 = vld [vmem:[#allocation62_spill] sm:$0xff] }
 0x1e9   : > { %v2574_v3 = vmul.f32 %v3645_v34, %v3630_v37  ;;  %v2575_v43 = vmul.f32 %v3645_v34, %v3631_v50  ;;  %v2576_v25 = vmul.f32 %v3645_v34, %v3632_v1  ;;  %v2577_v39 = vmul.f32 %v3645_v34, %v5551_v0  ;;  %v3646_v16 = vld [vmem:[%s4033_s29 + $0xc7] sm:$0xff] }
 0x1ea   : > { %v2578_v33 = vmul.f32 %v3645_v34, %v5554_v27  ;;  %v2579_v23 = vmul.f32 %v3645_v34, %v3635_v5  ;;  %v2580_v52 = vmul.f32 %v3645_v34, %v3636_v47  ;;  %v2581_v13 = vmul.f32 %v3645_v34, %v5557_v30  ;;  %v3647_v30 = vld [vmem:[%s4033_s29 + $0xcf] sm:$0xff]  ;;  %v3648_v6 = vld [vmem:[%s4033_s29 + $0xe7] sm:$0xff] }
 0x1eb   : > { %v2582_v48 = vmul.f32 %v3645_v34, %v6627_v10  ;;  %v2583_v21 = vmul.f32 %v3645_v34, %v3639_v58  ;;  %v2584_v11 = vmul.f32 %v3645_v34, %v3640_v56  ;;  %v2585_v9 = vmul.f32 %v3645_v34, %v6628_v32  ;;  %v3662_v37 = vld [vmem:[#allocation3 + $0x2c] ss:$0 sm:$0xff]  ;;  %v3657_v58 = vld [vmem:[%s4033_s29 + $0x16f] sm:$0xff] }
 0x1ec   : > { %v2586_v31 = vmul.f32 %v3645_v34, %v5566_v53  ;;  %v2587_v49 = vmul.f32 %v3645_v34, %v3643_v41  ;;  %v2588_v0 = vmul.f32 %v3645_v34, %v3644_v20  ;;  %v2589_v61 = vadd.f32 %v2573_v45, %v2536_v4  ;;  %v3649_v53 = vld [vmem:[%s4033_s29 + $0xef] sm:$0xff] }
 0x1ed   : > { %v2590_v17 = vadd.f32 %v2574_v3, %v2537_v54  ;;  %v2591_v27 = vadd.f32 %v2575_v43, %v2538_v28  ;;  %v2592_v38 = vadd.f32 %v2576_v25, %v2539_v44  ;;  %v2593_v19 = vadd.f32 %v2577_v39, %v2540_v55  ;;  %v3652_v28 = vld [vmem:[%s4033_s29 + $0x127] sm:$0xff]  ;;  %v3653_v34 = vld [vmem:[%s4033_s29 + $0x12f] sm:$0xff]  ;;  %v6631_v25 = vld [vmem:[#allocation65_spill] sm:$0xff] }
 0x1ee   : > { %v2594_v63 = vadd.f32 %v2578_v33, %v2541_v40  ;;  %v2595_v26 = vadd.f32 %v2579_v23, %v2542_v15  ;;  %v2596_v7 = vadd.f32 %v2580_v52, %v2543_v36  ;;  %v2597_v50 = vadd.f32 %v2581_v13, %v2544_v35  ;;  %v3656_v40 = vld [vmem:[%s4033_s29 + $0x167] sm:$0xff]  ;;  %v3661_v56 = vld [vmem:[%s4033_s29 + $0x1af] sm:$0xff] }
 0x1ef   : > { %v2598_v4 = vadd.f32 %v2582_v48, %v2545_v59  ;;  %v2599_v54 = vadd.f32 %v2583_v21, %v2546_v60  ;;  %v2600_v1 = vadd.f32 %v2584_v11, %v2547_v62  ;;  %v2601_v44 = vadd.f32 %v2585_v9, %v2548_v14  ;;  %v3660_v15 = vld [vmem:[%s4033_s29 + $0x1a7] sm:$0xff]  ;;  %v3664_v21 = vld [vmem:[%s4033_s29 + $0xd0] sm:$0xff] }
 0x1f0   : > { %v2602_v5 = vadd.f32 %v2586_v31, %v2549_v8  ;;  %v2603_v47 = vadd.f32 %v2587_v49, %v2550_v24  ;;  %v2604_v55 = vadd.f32 %v2588_v0, %v2551_v57  ;;  %v2626_v36 = vmul.f32 %v3662_v37, %v3646_v16  ;;  %v6629_v62 = vld [vmem:[#allocation63_spill] sm:$0xff]  ;;  %v6630_v8 = vld [vmem:[#allocation64_spill] sm:$0xff] }
 0x1f1   : > { %v2627_v41 = vmul.f32 %v3662_v37, %v3647_v30  ;;  %v2628_v20 = vmul.f32 %v3662_v37, %v3648_v6  ;;  %v2629_v45 = vmul.f32 %v3662_v37, %v3649_v53  ;;  %v2630_v3 = vmul.f32 %v3662_v37, %v5585_v51  ;;  %v3663_v48 = vld [vmem:[%s4033_s29 + $0xc8] sm:$0xff]  ;;  %v3670_v6 = vld [vmem:[%s4033_s29 + $0x130] sm:$0xff] }
 0x1f2   : > { %v2631_v35 = vmul.f32 %v3662_v37, %v5588_v2  ;;  %v2632_v59 = vmul.f32 %v3662_v37, %v3652_v28  ;;  %v2633_v60 = vmul.f32 %v3662_v37, %v3653_v34  ;;  %v2634_v14 = vmul.f32 %v3662_v37, %v6629_v62  ;;  %v3665_v49 = vld [vmem:[%s4033_s29 + $0xe8] sm:$0xff]  ;;  %v3674_v28 = vld [vmem:[%s4033_s29 + $0x170] sm:$0xff] }
 0x1f3   : > { %v2635_v24 = vmul.f32 %v3662_v37, %v6630_v8  ;;  %v2636_v57 = vmul.f32 %v3662_v37, %v3656_v40  ;;  %v2637_v43 = vmul.f32 %v3662_v37, %v3657_v58  ;;  %v2638_v39 = vmul.f32 %v3662_v37, %v6631_v25  ;;  %v3679_v0 = vld [vmem:[#allocation3 + $0x2d] ss:$0 sm:$0xff]  ;;  %v3678_v34 = vld [vmem:[%s4033_s29 + $0x1b0] sm:$0xff] }
 0x1f4   : > { %v2639_v33 = vmul.f32 %v3662_v37, %v5600_v18  ;;  %v2640_v23 = vmul.f32 %v3662_v37, %v3660_v15  ;;  %v2641_v51 = vmul.f32 %v3662_v37, %v3661_v56  ;;  %v2642_v52 = vadd.f32 %v2626_v36, %v2589_v61  ;;  %v3666_v18 = vld [vmem:[%s4033_s29 + $0xf0] sm:$0xff] }
 0x1f5   : > { %v2643_v13 = vadd.f32 %v2627_v41, %v2590_v17  ;;  %v2644_v2 = vadd.f32 %v2628_v20, %v2591_v27  ;;  %v2645_v10 = vadd.f32 %v2629_v45, %v2592_v38  ;;  %v2646_v11 = vadd.f32 %v2630_v3, %v2593_v19  ;;  %v3669_v27 = vld [vmem:[%s4033_s29 + $0x128] sm:$0xff]  ;;  %v6635_v20 = vld [vmem:[#allocation69_spill] sm:$0xff] }
 0x1f6   : > { %v2647_v32 = vadd.f32 %v2631_v35, %v2594_v63  ;;  %v2648_v9 = vadd.f32 %v2632_v59, %v2595_v26  ;;  %v2649_v31 = vadd.f32 %v2633_v60, %v2596_v7  ;;  %v2650_v16 = vadd.f32 %v2634_v14, %v2597_v50  ;;  %v3673_v63 = vld [vmem:[%s4033_s29 + $0x168] sm:$0xff]  ;;  %v6632_v50 = vld [vmem:[#allocation66_spill] sm:$0xff] }
 0x1f7   : > { %v2651_v61 = vadd.f32 %v2635_v24, %v2598_v4  ;;  %v2652_v17 = vadd.f32 %v2636_v57, %v2599_v54  ;;  %v2653_v30 = vadd.f32 %v2637_v43, %v2600_v1  ;;  %v2654_v38 = vadd.f32 %v2638_v39, %v2601_v44  ;;  %v3677_v26 = vld [vmem:[%s4033_s29 + $0x1a8] sm:$0xff]  ;;  %v3681_v24 = vld [vmem:[%s4033_s29 + $0xd1] sm:$0xff] }
 0x1f8   : > { %v2655_v53 = vadd.f32 %v2639_v33, %v2602_v5  ;;  %v2656_v37 = vadd.f32 %v2640_v23, %v2603_v47  ;;  %v2657_v19 = vadd.f32 %v2641_v51, %v2604_v55  ;;  %v2679_v7 = vmul.f32 %v3679_v0, %v3663_v48  ;;  %v6633_v44 = vld [vmem:[#allocation67_spill] sm:$0xff]  ;;  %v6634_v47 = vld [vmem:[#allocation68_spill] sm:$0xff] }
 0x1f9   : > { %v2680_v40 = vmul.f32 %v3679_v0, %v3664_v21  ;;  %v2681_v58 = vmul.f32 %v3679_v0, %v3665_v49  ;;  %v2682_v15 = vmul.f32 %v3679_v0, %v3666_v18  ;;  %v2683_v56 = vmul.f32 %v3679_v0, %v5619_v42  ;;  %v3680_v8 = vld [vmem:[%s4033_s29 + $0xc9] sm:$0xff]  ;;  %v3687_v21 = vld [vmem:[%s4033_s29 + $0x131] sm:$0xff] }
 0x1fa   : > { %v2684_v4 = vmul.f32 %v3679_v0, %v6632_v50  ;;  %v2685_v54 = vmul.f32 %v3679_v0, %v3669_v27  ;;  %v2686_v1 = vmul.f32 %v3679_v0, %v3670_v6  ;;  %v2687_v5 = vmul.f32 %v3679_v0, %v6633_v44  ;;  %v3682_v33 = vld [vmem:[%s4033_s29 + $0xe9] sm:$0xff]  ;;  %v3695_v27 = vld [vmem:[%s4033_s29 + $0x1b1] sm:$0xff] }
 0x1fb   : > { %v2688_v55 = vmul.f32 %v3679_v0, %v6634_v47  ;;  %v2689_v36 = vmul.f32 %v3679_v0, %v3673_v63  ;;  %v2690_v41 = vmul.f32 %v3679_v0, %v3674_v28  ;;  %v2691_v45 = vmul.f32 %v3679_v0, %v6635_v20  ;;  %v3696_v23 = vld [vmem:[#allocation3 + $0x2e] ss:$0 sm:$0xff] }
 0x1fc   : > { %v2692_v3 = vmul.f32 %v3679_v0, %v5634_v46  ;;  %v2693_v35 = vmul.f32 %v3679_v0, %v3677_v26  ;;  %v2694_v42 = vmul.f32 %v3679_v0, %v3678_v34  ;;  %v2695_v59 = vadd.f32 %v2679_v7, %v2642_v52  ;;  %v3683_v46 = vld [vmem:[%s4033_s29 + $0xf1] sm:$0xff]  ;;  %v6636_v26 = vld [vmem:[#allocation70_spill] sm:$0xff] }
 0x1fd   : > { %v2696_v60 = vadd.f32 %v2680_v40, %v2643_v13  ;;  %v2697_v62 = vadd.f32 %v2681_v58, %v2644_v2  ;;  %v2698_v14 = vadd.f32 %v2682_v15, %v2645_v10  ;;  %v2699_v57 = vadd.f32 %v2683_v56, %v2646_v11  ;;  %v3686_v2 = vld [vmem:[%s4033_s29 + $0x129] sm:$0xff]  ;;  %v3691_v0 = vld [vmem:[%s4033_s29 + $0x171] sm:$0xff]  ;;  %v6640_v58 = vld [vmem:[#allocation74_spill] sm:$0xff] }
 0x1fe   : > { %v2700_v43 = vadd.f32 %v2684_v4, %v2647_v32  ;;  %v2701_v25 = vadd.f32 %v2685_v54, %v2648_v9  ;;  %v2702_v39 = vadd.f32 %v2686_v1, %v2649_v31  ;;  %v2703_v51 = vadd.f32 %v2687_v5, %v2650_v16  ;;  %v3690_v32 = vld [vmem:[%s4033_s29 + $0x169] sm:$0xff] }
 0x1ff   : > { %v2704_v52 = vadd.f32 %v2688_v55, %v2651_v61  ;;  %v2705_v13 = vadd.f32 %v2689_v36, %v2652_v17  ;;  %v2706_v48 = vadd.f32 %v2690_v41, %v2653_v30  ;;  %v2707_v10 = vadd.f32 %v2691_v45, %v2654_v38  ;;  %v3694_v9 = vld [vmem:[%s4033_s29 + $0x1a9] sm:$0xff]  ;;  %v3698_v55 = vld [vmem:[%s4033_s29 + $0xd2] sm:$0xff] }
 0x200   : > { %v2708_v49 = vadd.f32 %v2692_v3, %v2655_v53  ;;  %v2709_v18 = vadd.f32 %v2693_v35, %v2656_v37  ;;  %v2710_v11 = vadd.f32 %v2694_v42, %v2657_v19  ;;  %v2732_v31 = vmul.f32 %v3696_v23, %v3680_v8  ;;  %v6637_v16 = vld [vmem:[#allocation71_spill] sm:$0xff]  ;;  %v6638_v38 = vld [vmem:[#allocation72_spill] sm:$0xff]  ;;  %v6639_v37 = vld [vmem:[#allocation73_spill] sm:$0xff] }
 0x201   : > { %v2733_v6 = vmul.f32 %v3696_v23, %v3681_v24  ;;  %v2734_v63 = vmul.f32 %v3696_v23, %v3682_v33  ;;  %v2735_v28 = vmul.f32 %v3696_v23, %v3683_v46  ;;  %v2736_v34 = vmul.f32 %v3696_v23, %v6636_v26  ;;  %v3697_v47 = vld [vmem:[%s4033_s29 + $0xca] sm:$0xff]  ;;  %v3704_v24 = vld [vmem:[%s4033_s29 + $0x132] sm:$0xff] }
 0x202   : > { %v2737_v61 = vmul.f32 %v3696_v23, %v6637_v16  ;;  %v2738_v17 = vmul.f32 %v3696_v23, %v3686_v2  ;;  %v2739_v30 = vmul.f32 %v3696_v23, %v3687_v21  ;;  %v2740_v53 = vmul.f32 %v3696_v23, %v6638_v38  ;;  %v3699_v3 = vld [vmem:[%s4033_s29 + $0xea] sm:$0xff]  ;;  %v3712_v2 = vld [vmem:[%s4033_s29 + $0x1b2] sm:$0xff] }
 0x203   : > { %v2741_v19 = vmul.f32 %v3696_v23, %v6639_v37  ;;  %v2742_v7 = vmul.f32 %v3696_v23, %v3690_v32  ;;  %v2743_v40 = vmul.f32 %v3696_v23, %v3691_v0  ;;  %v2744_v15 = vmul.f32 %v3696_v23, %v6640_v58  ;;  %v3713_v35 = vld [vmem:[#allocation3 + $0x2f] ss:$0 sm:$0xff]  ;;  %v3715_v37 = vld [vmem:[%s4033_s29 + $0xd3] sm:$0xff] }
 0x204   : > { %v2745_v56 = vmul.f32 %v3696_v23, %v5668_v12  ;;  %v2746_v50 = vmul.f32 %v3696_v23, %v3694_v9  ;;  %v2747_v4 = vmul.f32 %v3696_v23, %v3695_v27  ;;  %v2748_v54 = vadd.f32 %v2732_v31, %v2695_v59  ;;  %v3700_v12 = vld [vmem:[%s4033_s29 + $0xf2] sm:$0xff]  ;;  %v6641_v9 = vld [vmem:[#allocation75_spill] sm:$0xff] }
 0x205   : > { %v2749_v1 = vadd.f32 %v2733_v6, %v2696_v60  ;;  %v2750_v44 = vadd.f32 %v2734_v63, %v2697_v62  ;;  %v2751_v5 = vadd.f32 %v2735_v28, %v2698_v14  ;;  %v2752_v36 = vadd.f32 %v2736_v34, %v2699_v57  ;;  %v3703_v62 = vld [vmem:[%s4033_s29 + $0x12a] sm:$0xff]  ;;  %v3708_v23 = vld [vmem:[%s4033_s29 + $0x172] sm:$0xff] }
 0x206   : > { %v2753_v41 = vadd.f32 %v2737_v61, %v2700_v43  ;;  %v2754_v20 = vadd.f32 %v2738_v17, %v2701_v25  ;;  %v2755_v45 = vadd.f32 %v2739_v30, %v2702_v39  ;;  %v2756_v42 = vadd.f32 %v2740_v53, %v2703_v51  ;;  %v3707_v43 = vld [vmem:[%s4033_s29 + $0x16a] sm:$0xff] }
 0x207   : > { %v2757_v59 = vadd.f32 %v2741_v19, %v2704_v52  ;;  %v2758_v60 = vadd.f32 %v2742_v7, %v2705_v13  ;;  %v2759_v8 = vadd.f32 %v2743_v40, %v2706_v48  ;;  %v2760_v14 = vadd.f32 %v2744_v15, %v2707_v10  ;;  %v3711_v25 = vld [vmem:[%s4033_s29 + $0x1aa] sm:$0xff]  ;;  %v6643_v10 = vld [vmem:[#allocation77_spill] sm:$0xff] }
 0x208   : > { %v2761_v33 = vadd.f32 %v2745_v56, %v2708_v49  ;;  %v2762_v46 = vadd.f32 %v2746_v50, %v2709_v18  ;;  %v2763_v57 = vadd.f32 %v2747_v4, %v2710_v11  ;;  %v2785_v39 = vmul.f32 %v3713_v35, %v3697_v47  ;;  %v6642_v51 = vld [vmem:[#allocation76_spill] sm:$0xff]  ;;  %v6644_v18 = vld [vmem:[#allocation78_spill] sm:$0xff]  ;;  %v6645_v63 = vld [vmem:[#allocation79_spill] sm:$0xff] }
 0x209   : > { %v2786_v21 = vmul.f32 %v3713_v35, %v3698_v55  ;;  %v2787_v32 = vmul.f32 %v3713_v35, %v3699_v3  ;;  %v2788_v0 = vmul.f32 %v3713_v35, %v3700_v12  ;;  %v2789_v27 = vmul.f32 %v3713_v35, %v6641_v9  ;;  %v3714_v53 = vld [vmem:[%s4033_s29 + $0xcb] sm:$0xff]  ;;  %v3721_v47 = vld [vmem:[%s4033_s29 + $0x133] sm:$0xff] }
 0x20a   : > { %v2790_v52 = vmul.f32 %v3713_v35, %v6642_v51  ;;  %v2791_v13 = vmul.f32 %v3713_v35, %v3703_v62  ;;  %v2792_v48 = vmul.f32 %v3713_v35, %v3704_v24  ;;  %v2793_v49 = vmul.f32 %v3713_v35, %v6643_v10  ;;  %v3716_v15 = vld [vmem:[%s4033_s29 + $0xeb] sm:$0xff] }
 0x20b   : > { %v2794_v11 = vmul.f32 %v3713_v35, %v6644_v18  ;;  %v2795_v31 = vmul.f32 %v3713_v35, %v3707_v43  ;;  %v2796_v6 = vmul.f32 %v3713_v35, %v3708_v23  ;;  %v2797_v28 = vmul.f32 %v3713_v35, %v6645_v63  ;;  %v3730_v56 = vld [vmem:[#allocation3 + $0x30] ss:$0 sm:$0xff] }
 0x20c   : > { %v2798_v26 = vmul.f32 %v3713_v35, %v5702_v29  ;;  %v2799_v34 = vmul.f32 %v3713_v35, %v3711_v25  ;;  %v2800_v16 = vmul.f32 %v3713_v35, %v3712_v2  ;;  %v2801_v61 = vadd.f32 %v2785_v39, %v2748_v54  ;;  %v3717_v29 = vld [vmem:[%s4033_s29 + $0xf3] sm:$0xff]  ;;  %v3724_v3 = vld [vmem:[%s4033_s29 + $0x16b] sm:$0xff] }
 0x20d   : > { %v2802_v17 = vadd.f32 %v2786_v21, %v2749_v1  ;;  %v2803_v30 = vadd.f32 %v2787_v32, %v2750_v44  ;;  %v2804_v38 = vadd.f32 %v2788_v0, %v2751_v5  ;;  %v2805_v19 = vadd.f32 %v2789_v27, %v2752_v36  ;;  %v3720_v44 = vld [vmem:[%s4033_s29 + $0x12b] sm:$0xff] }
 0x20e   : > { %v2806_v7 = vadd.f32 %v2790_v52, %v2753_v41  ;;  %v2807_v40 = vadd.f32 %v2791_v13, %v2754_v20  ;;  %v2808_v58 = vadd.f32 %v2792_v48, %v2755_v45  ;;  %v2809_v50 = vadd.f32 %v2793_v49, %v2756_v42  ;;  %v3725_v20 = vld [vmem:[%s4033_s29 + $0x173] sm:$0xff]  ;;  %v3728_v12 = vld [vmem:[%s4033_s29 + $0x1ab] sm:$0xff] }
 0x20f   : > { %v2810_v4 = vadd.f32 %v2794_v11, %v2757_v59  ;;  %v2811_v54 = vadd.f32 %v2795_v31, %v2758_v60  ;;  %v2812_v1 = vadd.f32 %v2796_v6, %v2759_v8  ;;  %v2813_v5 = vadd.f32 %v2797_v28, %v2760_v14  ;;  %v3729_v45 = vld [vmem:[%s4033_s29 + $0x1b3] sm:$0xff]  ;;  %v6649_v39 = vld [vmem:[#allocation83_spill] sm:$0xff] }
 0x210   : > { %v2814_v55 = vadd.f32 %v2798_v26, %v2761_v33  ;;  %v2815_v36 = vadd.f32 %v2799_v34, %v2762_v46  ;;  %v2816_v41 = vadd.f32 %v2800_v16, %v2763_v57  ;;  %v2838_v35 = vmul.f32 %v3730_v56, %v3714_v53  ;;  %v6646_v59 = vld [vmem:[#allocation80_spill] sm:$0xff]  ;;  %v6647_v14 = vld [vmem:[#allocation81_spill] sm:$0xff]  ;;  %v6648_v33 = vld [vmem:[#allocation82_spill] sm:$0xff] }
 0x211   : > { %v2839_v62 = vmul.f32 %v3730_v56, %v3715_v37  ;;  %v2840_v24 = vmul.f32 %v3730_v56, %v3716_v15  ;;  %v2841_v43 = vmul.f32 %v3730_v56, %v3717_v29  ;;  %v2842_v42 = vmul.f32 %v3730_v56, %v5721_v22  ;;  %v6650_v32 = vld [vmem:[#allocation84_spill] sm:$0xff] }
 0x212   : > { %v2843_v60 = vmul.f32 %v3730_v56, %v6646_v59  ;;  %v2844_v8 = vmul.f32 %v3730_v56, %v3720_v44  ;;  %v2845_v23 = vmul.f32 %v3730_v56, %v3721_v47  ;;  %v2846_v25 = vmul.f32 %v3730_v56, %v6647_v14  ;;  %v2909_v59 = vld [vmem:[%s5869_s5 + $0x78] sm:$0xff] }
 0x213   : > { %v2847_v46 = vmul.f32 %v3730_v56, %v6648_v33  ;;  %v2848_v57 = vmul.f32 %v3730_v56, %v3724_v3  ;;  %v2849_v2 = vmul.f32 %v3730_v56, %v3725_v20  ;;  %v2850_v21 = vmul.f32 %v3730_v56, %v6649_v39 }
 0x214   : > { %v2851_v0 = vmul.f32 %v3730_v56, %v6650_v32  ;;  %v2852_v9 = vmul.f32 %v3730_v56, %v3728_v12  ;;  %v2853_v27 = vmul.f32 %v3730_v56, %v3729_v45  ;;  %v2854_v51 = vadd.f32 %v2838_v35, %v2801_v61  ;;  %v2894_v61 = vld [vmem:[%s5869_s5] sm:$0xff]  ;;  %v2904_v35 = vld [vmem:[%s5869_s5 + $0x50] sm:$0xff] }
 0x215   : > { %v2855_v22 = vadd.f32 %v2839_v62, %v2802_v17  ;;  %v2856_v52 = vadd.f32 %v2840_v24, %v2803_v30  ;;  %v2857_v13 = vadd.f32 %v2841_v43, %v2804_v38  ;;  %v2858_v48 = vadd.f32 %v2842_v42, %v2805_v19  ;;  %v6651_v17 = vld [vmem:[#allocation13_spill] sm:$0xff]  ;;  %v2895_v19 = vld [vmem:[%s5869_s5 + $0x8] sm:$0xff]  ;;  %v2906_v24 = vld [vmem:[%s5869_s5 + $0x60] sm:$0xff] }
 0x216   : > { %v2859_v10 = vadd.f32 %v2843_v60, %v2806_v7  ;;  %v2860_v49 = vadd.f32 %v2844_v8, %v2807_v40  ;;  %v2861_v18 = vadd.f32 %v2845_v23, %v2808_v58  ;;  %v2862_v11 = vadd.f32 %v2846_v25, %v2809_v50  ;;  %v2896_v7 = vld [vmem:[%s5869_s5 + $0x10] sm:$0xff]  ;;  %v2897_v40 = vld [vmem:[%s5869_s5 + $0x18] sm:$0xff]  ;;  %v2898_v50 = vld [vmem:[%s5869_s5 + $0x20] sm:$0xff] }
 0x217   : > { %v2863_v31 = vadd.f32 %v2847_v46, %v2810_v4  ;;  %v2864_v6 = vadd.f32 %v2848_v57, %v2811_v54  ;;  %v2865_v63 = vadd.f32 %v2849_v2, %v2812_v1  ;;  %v2866_v28 = vadd.f32 %v2850_v21, %v2813_v5  ;;  %v2899_v4 = vld [vmem:[%s5869_s5 + $0x28] sm:$0xff]  ;;  %v2900_v54 = vld [vmem:[%s5869_s5 + $0x30] sm:$0xff]  ;;  %v2905_v62 = vld [vmem:[%s5869_s5 + $0x58] sm:$0xff] }
 0x218   : > { %v2867_v26 = vadd.f32 %v2851_v0, %v2814_v55  ;;  %v2868_v34 = vadd.f32 %v2852_v9, %v2815_v36  ;;  %v2869_v16 = vadd.f32 %v2853_v27, %v2816_v41  ;;  %v2876_v30 = vadd.f32 %v6651_v17, %v2854_v51  ;;  %v2901_v55 = vld [vmem:[%s5869_s5 + $0x38] sm:$0xff]  ;;  %v2902_v36 = vld [vmem:[%s5869_s5 + $0x40] sm:$0xff]  ;;  %v2903_v41 = vld [vmem:[%s5869_s5 + $0x48] sm:$0xff] }
 0x219   : > { %v2877_v38 = vadd.f32 %v6651_v17, %v2855_v22  ;;  %v2878_v53 = vadd.f32 %v6651_v17, %v2856_v52  ;;  %v2879_v37 = vadd.f32 %v6651_v17, %v2857_v13  ;;  %v2880_v58 = vadd.f32 %v6651_v17, %v2858_v48  ;;  %v2907_v43 = vld [vmem:[%s5869_s5 + $0x68] sm:$0xff]  ;;  %v2908_v42 = vld [vmem:[%s5869_s5 + $0x70] sm:$0xff] }
 0x21a   : > { %v2881_v15 = vadd.f32 %v6651_v17, %v2859_v10  ;;  %v2882_v29 = vadd.f32 %v6651_v17, %v2860_v49  ;;  %v2883_v56 = vadd.f32 %v6651_v17, %v2861_v18  ;;  %v2884_v1 = vadd.f32 %v6651_v17, %v2862_v11 }
 0x21b   : > { %v2885_v44 = vadd.f32 %v6651_v17, %v2863_v31  ;;  %v2886_v47 = vadd.f32 %v6651_v17, %v2864_v6  ;;  %v2887_v5 = vadd.f32 %v6651_v17, %v2865_v63  ;;  %v2888_v3 = vadd.f32 %v6651_v17, %v2866_v28 }
 0x21c   : > { %v2889_v20 = vadd.f32 %v6651_v17, %v2867_v26  ;;  %v2890_v12 = vadd.f32 %v6651_v17, %v2868_v34  ;;  %v2891_v45 = vadd.f32 %v6651_v17, %v2869_v16  ;;  %v2910_v60 = vmul.f32 %v2894_v61, %v2876_v30 }
 0x21d   : > { %v2911_v8 = vmul.f32 %v2895_v19, %v2877_v38  ;;  %v2912_v23 = vmul.f32 %v2896_v7, %v2878_v53  ;;  %v2913_v14 = vmul.f32 %v2897_v40, %v2879_v37  ;;  %v2914_v25 = vmul.f32 %v2898_v50, %v2880_v58 }
 0x21e   : > { %v2915_v33 = vmul.f32 %v2899_v4, %v2881_v15  ;;  %v2916_v46 = vmul.f32 %v2900_v54, %v2882_v29  ;;  %v2917_v57 = vmul.f32 %v2901_v55, %v2883_v56  ;;  %v2918_v2 = vmul.f32 %v2902_v36, %v2884_v1  ;;  %2927 = vst [vmem:[%s2926_s6] sm:$0xff] %v2910_v60 }
 0x21f   : > { %v2919_v39 = vmul.f32 %v2903_v41, %v2885_v44  ;;  %v2920_v21 = vmul.f32 %v2904_v35, %v2886_v47  ;;  %v2921_v32 = vmul.f32 %v2905_v62, %v2887_v5  ;;  %2928 = vst [vmem:[%s2926_s6 + $0x8] sm:$0xff] %v2911_v8  ;;  %2929 = vst [vmem:[%s2926_s6 + $0x10] sm:$0xff] %v2912_v23 }
 0x220   : > { %2930 = vst [vmem:[%s2926_s6 + $0x18] sm:$0xff] %v2913_v14  ;;  %v2922_v0 = vmul.f32 %v2906_v24, %v2888_v3  ;;  %v2923_v9 = vmul.f32 %v2907_v43, %v2889_v20  ;;  %v2924_v27 = vmul.f32 %v2908_v42, %v2890_v12  ;;  %v2925_v51 = vmul.f32 %v2909_v59, %v2891_v45  ;;  %250 = sbr.rel (!%p248_p10) target bundleno = 119 (0x77), region = 70 }
 0x221   : > { %2931 = vst [vmem:[%s2926_s6 + $0x20] sm:$0xff] %v2914_v25  ;;  %2932 = vst [vmem:[%s2926_s6 + $0x28] sm:$0xff] %v2915_v33 }
 0x222   : > { %2933 = vst [vmem:[%s2926_s6 + $0x30] sm:$0xff] %v2916_v46  ;;  %2934 = vst [vmem:[%s2926_s6 + $0x38] sm:$0xff] %v2917_v57 }
 0x223   : > { %2935 = vst [vmem:[%s2926_s6 + $0x40] sm:$0xff] %v2918_v2  ;;  %2936 = vst [vmem:[%s2926_s6 + $0x48] sm:$0xff] %v2919_v39 }
 0x224   : > { %2937 = vst [vmem:[%s2926_s6 + $0x50] sm:$0xff] %v2920_v21  ;;  %2938 = vst [vmem:[%s2926_s6 + $0x58] sm:$0xff] %v2921_v32 }
 0x225   : > { %2939 = vst [vmem:[%s2926_s6 + $0x60] sm:$0xff] %v2922_v0  ;;  %2940 = vst [vmem:[%s2926_s6 + $0x68] sm:$0xff] %v2923_v9 }
 0x226   : > { %2941 = vst [vmem:[%s2926_s6 + $0x70] sm:$0xff] %v2924_v27  ;;  %2942 = vst [vmem:[%s2926_s6 + $0x78] sm:$0xff] %v2925_v51 }
 0x227   :  { %3833 = shalt.err (!%p3830_p1)
}
 0x228   :  { %s3834_s12 = scalar_lea.hbm %s5927_s4, 6144 }
 0x229   :  { %p3835_p2 = scmp.ne.s32.totalorder %s5927_s4, %s3834_s12  ;;  %p3838_p3 = scmp.lt.u32.totalorder %s3834_s12, %s5927_s4 }
 0x22b   :  { %p3840_p4 = pnand %p3838_p3, %p3835_p2 }
 0x22d   :  { %3843 = shalt.err (!%p3840_p4)
}
 0x22e   :  { %2954 = dma.vmem_to_hbm [thread:$0]  %s2949_s8, 6144, %s5927_s4, [#allocation5], %s3860_s27, %s3860_s27, %s3861_s28  }
 0x22f   :  { %3852 = dma.done.wait [#allocation5], 6144  }
 0x230   :  { %3853 = vsyncadd [#allocation5], 4294961152 }
 0x231   :  { %2958 = vsyncpa [#allocation4], 1 }
 0x232   :  { %2959 = vsyncpa [#allocation7], 1 }
 0x233   :  { %2960 = vsyncpa [#allocation5], 1 }

</bundles_post_ra>
